<compile_context>
chip_gen: v5e
topology: v5e:2x2
jax: 0.10.0
libtpu: 0.0.40
codegen_flags: <defaults>
</compile_context>

<pallas_src>
import jax
import jax.numpy as jnp
from jax.experimental import pallas as pl
from jax.experimental.pallas import tpu as pltpu


# ----------------------------------------------------------------------------
# Fused GNN layer kernel.
# ----------------------------------------------------------------------------
def _make_gnn_kernel(*, n_ent, dim, r_pad, e_tile, mess_func, act):
    N, D, RP, TE = n_ent, dim, r_pad, e_tile

    if mess_func not in ('DistMult', 'TransE'):
        raise NotImplementedError(
            f"MESS_FUNC={mess_func!r} not implemented (DistMult / TransE only)")
    if act not in ('relu', 'tanh', 'idd'):
        raise NotImplementedError(f"act={act!r} not implemented")

    def gnn_kernel(x_ref, bnd_ref, sub_ref, rel_ref, obj_ref, relp_ref,
                   wh1_ref, wh2_ref, bh_ref, out_ref, acc_sc, xb_sc):
        e_step = pl.program_id(1)
        last_e = pl.num_programs(1) - 1

        # ---- per-batch init (loop-invariant work hoisted here) -------------
        @pl.when(e_step == 0)
        def _init():
            # Fold boundary directly into the scatter-sum accumulator.
            acc_sc[...] = bnd_ref[0]
            # One-time f32 -> bf16 cast of layer_input for the gather matmuls.
            xb_sc[...] = x_ref[0].astype(jnp.bfloat16)

        sub_row = sub_ref[...]                        # [1, TE] i32 (lane-dense)
        rel_row = rel_ref[...]                        # [1, TE] i32
        obj_row = obj_ref[...]                        # [1, TE] i32

        # ONE shared [N, TE] row-index iota feeds both one-hots.
        iota_nt = jax.lax.broadcasted_iota(jnp.int32, (N, TE), 0)

        # ---- gather input_j = x[sub]: transposed-LHS one-hot matmul --------
        sub_oh = (iota_nt == sub_row).astype(jnp.bfloat16)          # [N, TE]
        input_j = jax.lax.dot_general(
            sub_oh, xb_sc[...],
            dimension_numbers=(((0,), (0,)), ((), ())),
            preferred_element_type=jnp.float32)                     # [TE, D]

        # ---- gather relation_j = relation[rel]: tiny K=RP one-hot matmul ---
        iota_rt = jax.lax.broadcasted_iota(jnp.int32, (RP, TE), 0)  # [RP, TE]
        rel_oh = (iota_rt == rel_row).astype(jnp.bfloat16)          # [RP, TE]
        relation_j = jax.lax.dot_general(
            rel_oh, relp_ref[0],
            dimension_numbers=(((0,), (0,)), ((), ())),
            preferred_element_type=jnp.float32)                     # [TE, D]

        if mess_func == 'TransE':
            message = input_j + relation_j
        else:  # 'DistMult'
            message = input_j * relation_j

        # ---- scatter-add over obj (standard matmul; padded edges have ------
        # ---- obj == N -> all-zero one-hot column, contribute nothing) ------
        obj_oh = (iota_nt == obj_row).astype(jnp.bfloat16)          # [N, TE]
        acc_sc[...] += jnp.dot(obj_oh, message.astype(jnp.bfloat16),
                               preferred_element_type=jnp.float32)  # [N, D]

        # ---- finalize: W_h projection, LayerNorm, activation ---------------
        @pl.when(e_step == last_e)
        def _finalize():
            agg = acc_sc[...]                                       # [N, D]
            x = x_ref[0]                                            # [N, D] f32
            # concat([agg, x]) @ W_h^T  ==  agg @ Wh1 + x @ Wh2  (f32, exact)
            h = (jnp.dot(agg, wh1_ref[...],
                         preferred_element_type=jnp.float32)
                 + jnp.dot(x, wh2_ref[...],
                           preferred_element_type=jnp.float32)
                 + bh_ref[...])                                     # [N, D]
            # Two-pass LayerNorm (no affine), eps = 1e-5 — once per batch.
            mean = jnp.mean(h, axis=-1, keepdims=True)
            hc = h - mean
            var = jnp.mean(hc * hc, axis=-1, keepdims=True)
            hn = hc * jax.lax.rsqrt(var + 1e-5)
            if act == 'relu':
                hn = jnp.maximum(hn, 0.0)
            elif act == 'tanh':
                hn = jnp.tanh(hn)
            out_ref[0] = hn.astype(out_ref.dtype)

    return gnn_kernel


# ----------------------------------------------------------------------------
# One-time parameter preparation (do NOT call per forward step).
# ----------------------------------------------------------------------------
def prepare_params(w_rel, b_rel, w_h, b_h):
    D = w_h.shape[0]
    return {
        'w_rel_t': jnp.asarray(w_rel.T),             # [D, R*D] for XLA-side relation_linear
        'b_rel': jnp.asarray(b_rel),                 # [R*D]
        'wh1': jnp.asarray(w_h[:, :D].T),            # [D, D] acts on agg
        'wh2': jnp.asarray(w_h[:, D:].T),            # [D, D] acts on layer_input
        'bh': jnp.asarray(b_h).reshape(1, -1),       # [1, D]
    }


def _pick_vmem_limit():
    """~75% of this chip's physical per-core VMEM, capped at 100 MiB."""
    try:
        cap = pltpu.get_tpu_info().vmem_capacity_bytes
        return int(min(cap * 3 // 4, 100 * 1024 * 1024))
    except Exception:  # older jax without get_tpu_info
        return 48 * 1024 * 1024


def gnn_layer_forward(query, layer_input, edges, n_ent, boundary, params,
                      n_rel, mess_func='DistMult', agg_func='sum', act='relu',
                      e_tile=256):
    """Pallas implementation of GNNLayer.forward (sum aggregation)."""
    if agg_func != 'sum':
        raise NotImplementedError("AGG_FUNC='pna' not implemented")  # TODO(synk)

    B, D = query.shape
    N = int(n_ent)
    R = 2 * int(n_rel) + 1
    R_pad = max(8, -(-R // 8) * 8)
    E = edges.shape[0]

    # ---- relation_linear hoisted into plain XLA (once per call) ------------
    relation = (query @ params['w_rel_t'] + params['b_rel']).reshape(B, R, D)
    if R_pad != R:
        relation = jnp.pad(relation, ((0, 0), (0, R_pad - R), (0, 0)))
    relation_b16 = relation.astype(jnp.bfloat16)      # [B, R_pad, D]

    # ---- pad the edge list so the reduction axis tiles evenly --------------
    # Padded edges point at obj == N (out of range) so they contribute nothing.
    E_pad = -(-E // e_tile) * e_tile
    pad = E_pad - E
    sub = edges[:, 0].astype(jnp.int32)
    rel = edges[:, 1].astype(jnp.int32)
    obj = edges[:, 2].astype(jnp.int32)
    if pad:
        sub = jnp.concatenate([sub, jnp.zeros((pad,), jnp.int32)])
        rel = jnp.concatenate([rel, jnp.zeros((pad,), jnp.int32)])
        obj = jnp.concatenate([obj, jnp.full((pad,), N, jnp.int32)])
    # Lane-dense [1, E_pad] index layout (review: avoids 1->128 lane padding).
    sub_ids = sub.reshape(1, E_pad)
    rel_ids = rel.reshape(1, E_pad)
    obj_ids = obj.reshape(1, E_pad)

    n_e = E_pad // e_tile

    kernel = _make_gnn_kernel(n_ent=N, dim=D, r_pad=R_pad, e_tile=e_tile,
                              mess_func=mess_func, act=act)

    out = pl.pallas_call(
        kernel,
        out_shape=jax.ShapeDtypeStruct((B, N, D), jnp.float32),
        grid=(B, n_e),
        in_specs=[
            pl.BlockSpec((1, N, D), lambda b, e: (b, 0, 0)),       # layer_input
            pl.BlockSpec((1, N, D), lambda b, e: (b, 0, 0)),       # boundary
            pl.BlockSpec((1, e_tile), lambda b, e: (0, e)),        # sub indices
            pl.BlockSpec((1, e_tile), lambda b, e: (0, e)),        # rel indices
            pl.BlockSpec((1, e_tile), lambda b, e: (0, e)),        # obj indices
            pl.BlockSpec((1, R_pad, D), lambda b, e: (b, 0, 0)),   # relation (bf16)
            pl.BlockSpec((D, D), lambda b, e: (0, 0)),             # Wh1
            pl.BlockSpec((D, D), lambda b, e: (0, 0)),             # Wh2
            pl.BlockSpec((1, D), lambda b, e: (0, 0)),             # b_h
        ],
        out_specs=pl.BlockSpec((1, N, D), lambda b, e: (b, 0, 0)),
        scratch_shapes=[
            pltpu.VMEM((N, D), jnp.float32),    # scatter-sum accumulator (+boundary)
            pltpu.VMEM((N, D), jnp.bfloat16),   # bf16 copy of layer_input
        ],
        compiler_params=pltpu.CompilerParams(
            dimension_semantics=("parallel", "arbitrary"),
            vmem_limit_bytes=_pick_vmem_limit()),
    )(layer_input, boundary, sub_ids, rel_ids, obj_ids, relation_b16,
      params['wh1'], params['wh2'], params['bh'])
    return out


# ----------------------------------------------------------------------------
# Plain-JAX f32 reference (mirrors the PyTorch forward) for correctness.
# ----------------------------------------------------------------------------
def gnn_layer_reference(query, layer_input, edges, n_ent, boundary,
                        w_rel, b_rel, w_h, b_h, n_rel, mess_func='DistMult'):
    B, D = query.shape
    R = 2 * n_rel + 1
    relation = (query @ w_rel.T + b_rel).reshape(B, R, D)
    sub, rel_idx, obj = edges[:, 0], edges[:, 1], edges[:, 2]
    input_j = layer_input[:, sub, :]
    relation_j = relation[:, rel_idx, :]
    if mess_func == 'TransE':
        message = input_j + relation_j
    else:
        message = input_j * relation_j
    agg = jnp.zeros((B, n_ent, D), jnp.float32).at[:, obj, :].add(message)
    agg = agg + boundary
    cat = jnp.concatenate([agg, layer_input], axis=-1)
    h = cat @ w_h.T + b_h
    mean = h.mean(-1, keepdims=True)
    var = ((h - mean) ** 2).mean(-1, keepdims=True)
    h = (h - mean) / jnp.sqrt(var + 1e-5)
    return jnp.maximum(h, 0.0)


if __name__ == "__main__":
    # Small deterministic configuration; D=128 keeps everything lane-dense.
    B, D, N, E, n_rel = 2, 128, 256, 500, 3
    R = 2 * n_rel + 1

    key = jax.random.PRNGKey(0)
    ks = jax.random.split(key, 8)

    query = jax.random.normal(ks[0], (B, D), jnp.float32)
    layer_input = jax.random.normal(ks[1], (B, N, D), jnp.float32)
    boundary = jax.random.normal(ks[2], (B, N, D), jnp.float32)
    sub = jax.random.randint(ks[3], (E,), 0, N, jnp.int32)
    rel = jax.random.randint(ks[4], (E,), 0, R, jnp.int32)
    obj = jax.random.randint(ks[5], (E,), 0, N, jnp.int32)
    edges = jnp.stack([sub, rel, obj], axis=1)

    # Deterministic parameter init (PyTorch nn.Linear-style uniform bounds).
    lim_rel = 1.0 / jnp.sqrt(D)
    w_rel = jax.random.uniform(ks[6], (R * D, D), jnp.float32,
                               -lim_rel, lim_rel)
    b_rel = jax.random.uniform(jax.random.fold_in(ks[6], 1), (R * D,),
                               jnp.float32, -lim_rel, lim_rel)
    lim_h = 1.0 / jnp.sqrt(2.0 * D)
    w_h = jax.random.uniform(ks[7], (D, 2 * D), jnp.float32, -lim_h, lim_h)
    b_h = jax.random.uniform(jax.random.fold_in(ks[7], 1), (D,),
                             jnp.float32, -lim_h, lim_h)

    params = prepare_params(w_rel, b_rel, w_h, b_h)   # one-time transposes

    out = gnn_layer_forward(query, layer_input, edges, N, boundary, params,
                            n_rel, mess_func='DistMult', agg_func='sum',
                            act='relu', e_tile=256)
    out = jax.block_until_ready(out)

    ref = gnn_layer_reference(query, layer_input, edges, N, boundary,
                              w_rel, b_rel, w_h, b_h, n_rel,
                              mess_func='DistMult')
    assert out.shape == (B, N, D)
    max_err = float(jnp.max(jnp.abs(out - ref)))
    # Gather/select/scatter matmuls run with bf16 inputs (f32 accumulation),
    # so allow a slightly looser tolerance than pure f32.
    assert jnp.allclose(out, ref, rtol=2e-2, atol=2e-2), max_err

    print("KERNEL_OK")
</pallas_src>

<mosaic_0001>
module attributes {stable_mosaic.version = 11 : i64} {
  func.func @gnn_kernel(%arg0: i32, %arg1: i32, %arg2: memref<1x256x128xf32, #tpu.memory_space<vmem>>, %arg3: memref<1x256x128xf32, #tpu.memory_space<vmem>>, %arg4: memref<1x256xi32, #tpu.memory_space<vmem>>, %arg5: memref<1x256xi32, #tpu.memory_space<vmem>>, %arg6: memref<1x256xi32, #tpu.memory_space<vmem>>, %arg7: memref<1x8x128xbf16, #tpu.memory_space<vmem>>, %arg8: memref<128x128xf32, #tpu.memory_space<vmem>>, %arg9: memref<128x128xf32, #tpu.memory_space<vmem>>, %arg10: memref<1x128xf32, #tpu.memory_space<vmem>>, %arg11: memref<1x256x128xf32, #tpu.memory_space<vmem>>, %arg12: memref<256x128xf32, #tpu.memory_space<vmem>>, %arg13: memref<256x128xbf16, #tpu.memory_space<vmem>>) attributes {dimension_semantics = [#tpu.dimension_semantics<parallel>, #tpu.dimension_semantics<arbitrary>], iteration_bounds = array<i64: 2, 2>, scalar_prefetch = 0 : i64, scratch_operands = 2 : i64, tpu.core_type = #tpu.core_type<tc>, window_params = [{transform_indices = @transform_0, window_bounds = array<i64: 1, 256, 128>}, {transform_indices = @transform_1, window_bounds = array<i64: 1, 256, 128>}, {transform_indices = @transform_2, window_bounds = array<i64: 1, 256>}, {transform_indices = @transform_3, window_bounds = array<i64: 1, 256>}, {transform_indices = @transform_4, window_bounds = array<i64: 1, 256>}, {transform_indices = @transform_5, window_bounds = array<i64: 1, 8, 128>}, {pipeline_mode = #tpu.pipeline_mode<synchronous>, transform_indices = @transform_6, window_bounds = array<i64: 128, 128>}, {pipeline_mode = #tpu.pipeline_mode<synchronous>, transform_indices = @transform_7, window_bounds = array<i64: 128, 128>}, {pipeline_mode = #tpu.pipeline_mode<synchronous>, transform_indices = @transform_8, window_bounds = array<i64: 1, 128>}, {transform_indices = @transform_9, window_bounds = array<i64: 1, 256, 128>}]} {
    %c0_i32 = arith.constant 0 : i32
    %0 = arith.cmpi eq, %arg1, %c0_i32 : i32
    %1 = arith.extui %0 : i1 to i32
    %c0_i32_0 = arith.constant 0 : i32
    %2 = arith.cmpi ne, %1, %c0_i32_0 : i32
    scf.if %2 {
      %c0_18 = arith.constant 0 : index
      %c0_19 = arith.constant 0 : index
      %c0_20 = arith.constant 0 : index
      %37 = vector.load %arg3[%c0_18, %c0_19, %c0_20] : memref<1x256x128xf32, #tpu.memory_space<vmem>>, vector<1x256x128xf32>
      %38 = vector.shape_cast %37 : vector<1x256x128xf32> to vector<256x128xf32>
      %c0_21 = arith.constant 0 : index
      %c0_22 = arith.constant 0 : index
      %39 = vector.load %arg12[%c0_21, %c0_22] : memref<256x128xf32, #tpu.memory_space<vmem>>, vector<256x128xf32>
      tpu.vector_store %arg12[%c0_21, %c0_22], %38 {strides = array<i32>} : memref<256x128xf32, #tpu.memory_space<vmem>>, vector<256x128xf32>,
      %c0_23 = arith.constant 0 : index
      %c0_24 = arith.constant 0 : index
      %c0_25 = arith.constant 0 : index
      %40 = vector.load %arg2[%c0_23, %c0_24, %c0_25] : memref<1x256x128xf32, #tpu.memory_space<vmem>>, vector<1x256x128xf32>
      %41 = vector.shape_cast %40 : vector<1x256x128xf32> to vector<256x128xf32>
      %42 = arith.truncf %41 : vector<256x128xf32> to vector<256x128xbf16>
      %c0_26 = arith.constant 0 : index
      %c0_27 = arith.constant 0 : index
      %43 = vector.load %arg13[%c0_26, %c0_27] : memref<256x128xbf16, #tpu.memory_space<vmem>>, vector<256x128xbf16>
      tpu.vector_store %arg13[%c0_26, %c0_27], %42 {strides = array<i32>} : memref<256x128xbf16, #tpu.memory_space<vmem>>, vector<256x128xbf16>,
    } else {
    }
    %c0 = arith.constant 0 : index
    %c0_1 = arith.constant 0 : index
    %3 = vector.load %arg4[%c0, %c0_1] : memref<1x256xi32, #tpu.memory_space<vmem>>, vector<1x256xi32>
    %c0_2 = arith.constant 0 : index
    %c0_3 = arith.constant 0 : index
    %4 = vector.load %arg5[%c0_2, %c0_3] : memref<1x256xi32, #tpu.memory_space<vmem>>, vector<1x256xi32>
    %c0_4 = arith.constant 0 : index
    %c0_5 = arith.constant 0 : index
    %5 = vector.load %arg6[%c0_4, %c0_5] : memref<1x256xi32, #tpu.memory_space<vmem>>, vector<1x256xi32>
    %6 = tpu.iota {dimensions = array<i32: 0>} : vector<256x256xi32>
    %7 = vector.broadcast %3 : vector<1x256xi32> to vector<256x256xi32>
    %8 = arith.cmpi eq, %6, %7 : vector<256x256xi32>
    %9 = arith.extui %8 : vector<256x256xi1> to vector<256x256xi32>
    %10 = arith.sitofp %9 : vector<256x256xi32> to vector<256x256xf32>
    %11 = arith.truncf %10 : vector<256x256xf32> to vector<256x256xbf16>
    %c0_6 = arith.constant 0 : index
    %c0_7 = arith.constant 0 : index
    %12 = vector.load %arg13[%c0_6, %c0_7] : memref<256x128xbf16, #tpu.memory_space<vmem>>, vector<256x128xbf16>
    %cst = arith.constant dense<0.000000e+00> : vector<256x128xf32>
    %13 = tpu.matmul %11, %12, %cst {dimension_numbers = #tpu.dot_dimension_numbers<[0], [0], [1], [1], [0, 1, 1, 1], [], []>} : vector<256x256xbf16>, vector<256x128xbf16>, vector<256x128xf32> -> vector<256x128xf32>
    %14 = tpu.iota {dimensions = array<i32: 0>} : vector<8x256xi32>
    %15 = vector.broadcast %4 : vector<1x256xi32> to vector<8x256xi32>
    %16 = arith.cmpi eq, %14, %15 : vector<8x256xi32>
    %17 = arith.extui %16 : vector<8x256xi1> to vector<8x256xi32>
    %18 = arith.sitofp %17 : vector<8x256xi32> to vector<8x256xf32>
    %19 = arith.truncf %18 : vector<8x256xf32> to vector<8x256xbf16>
    %c0_8 = arith.constant 0 : index
    %c0_9 = arith.constant 0 : index
    %c0_10 = arith.constant 0 : index
    %20 = vector.load %arg7[%c0_8, %c0_9, %c0_10] : memref<1x8x128xbf16, #tpu.memory_space<vmem>>, vector<1x8x128xbf16>
    %21 = vector.shape_cast %20 : vector<1x8x128xbf16> to vector<8x128xbf16>
    %cst_11 = arith.constant dense<0.000000e+00> : vector<256x128xf32>
    %22 = tpu.matmul %19, %21, %cst_11 {dimension_numbers = #tpu.dot_dimension_numbers<[0], [0], [1], [1], [0, 1, 1, 1], [], []>} : vector<8x256xbf16>, vector<8x128xbf16>, vector<256x128xf32> -> vector<256x128xf32>
    %23 = arith.mulf %13, %22 : vector<256x128xf32>
    %24 = vector.broadcast %5 : vector<1x256xi32> to vector<256x256xi32>
    %25 = arith.cmpi eq, %6, %24 : vector<256x256xi32>
    %26 = arith.extui %25 : vector<256x256xi1> to vector<256x256xi32>
    %27 = arith.sitofp %26 : vector<256x256xi32> to vector<256x256xf32>
    %28 = arith.truncf %27 : vector<256x256xf32> to vector<256x256xbf16>
    %c0_12 = arith.constant 0 : index
    %c0_13 = arith.constant 0 : index
    %29 = vector.load %arg12[%c0_12, %c0_13] : memref<256x128xf32, #tpu.memory_space<vmem>>, vector<256x128xf32>
    %30 = arith.truncf %23 : vector<256x128xf32> to vector<256x128xbf16>
    %cst_14 = arith.constant dense<0.000000e+00> : vector<256x128xf32>
    %31 = tpu.matmul %28, %30, %cst_14 {dimension_numbers = #tpu.dot_dimension_numbers<[1], [0], [0], [1], [0, 0, 1, 1], [], []>} : vector<256x256xbf16>, vector<256x128xbf16>, vector<256x128xf32> -> vector<256x128xf32>
    %32 = arith.addf %29, %31 : vector<256x128xf32>
    %c0_15 = arith.constant 0 : index
    %c0_16 = arith.constant 0 : index
    %33 = vector.load %arg12[%c0_15, %c0_16] : memref<256x128xf32, #tpu.memory_space<vmem>>, vector<256x128xf32>
    tpu.vector_store %arg12[%c0_15, %c0_16], %32 {strides = array<i32>} : memref<256x128xf32, #tpu.memory_space<vmem>>, vector<256x128xf32>,
    %c1_i32 = arith.constant 1 : i32
    %34 = arith.cmpi eq, %arg1, %c1_i32 : i32
    %35 = arith.extui %34 : i1 to i32
    %c0_i32_17 = arith.constant 0 : i32
    %36 = arith.cmpi ne, %35, %c0_i32_17 : i32
    scf.if %36 {
      %c0_18 = arith.constant 0 : index
      %c0_19 = arith.constant 0 : index
      %37 = vector.load %arg12[%c0_18, %c0_19] : memref<256x128xf32, #tpu.memory_space<vmem>>, vector<256x128xf32>
      %c0_20 = arith.constant 0 : index
      %c0_21 = arith.constant 0 : index
      %c0_22 = arith.constant 0 : index
      %38 = vector.load %arg2[%c0_20, %c0_21, %c0_22] : memref<1x256x128xf32, #tpu.memory_space<vmem>>, vector<1x256x128xf32>
      %39 = vector.shape_cast %38 : vector<1x256x128xf32> to vector<256x128xf32>
      %c0_23 = arith.constant 0 : index
      %c0_24 = arith.constant 0 : index
      %40 = vector.load %arg8[%c0_23, %c0_24] : memref<128x128xf32, #tpu.memory_space<vmem>>, vector<128x128xf32>
      %cst_25 = arith.constant dense<0.000000e+00> : vector<256x128xf32>
      %41 = tpu.matmul %37, %40, %cst_25 {dimension_numbers = #tpu.dot_dimension_numbers<[1], [0], [0], [1], [0, 0, 1, 1], [], []>} : vector<256x128xf32>, vector<128x128xf32>, vector<256x128xf32> -> vector<256x128xf32>
      %c0_26 = arith.constant 0 : index
      %c0_27 = arith.constant 0 : index
      %42 = vector.load %arg9[%c0_26, %c0_27] : memref<128x128xf32, #tpu.memory_space<vmem>>, vector<128x128xf32>
      %cst_28 = arith.constant dense<0.000000e+00> : vector<256x128xf32>
      %43 = tpu.matmul %39, %42, %cst_28 {dimension_numbers = #tpu.dot_dimension_numbers<[1], [0], [0], [1], [0, 0, 1, 1], [], []>} : vector<256x128xf32>, vector<128x128xf32>, vector<256x128xf32> -> vector<256x128xf32>
      %44 = arith.addf %41, %43 : vector<256x128xf32>
      %c0_29 = arith.constant 0 : index
      %c0_30 = arith.constant 0 : index
      %45 = vector.load %arg10[%c0_29, %c0_30] : memref<1x128xf32, #tpu.memory_space<vmem>>, vector<1x128xf32>
      %46 = vector.broadcast %45 : vector<1x128xf32> to vector<256x128xf32>
      %47 = arith.addf %44, %46 : vector<256x128xf32>
      %cst_31 = arith.constant dense<0.000000e+00> : vector<256xf32>
      %48 = vector.multi_reduction <add>, %47, %cst_31 [1] : vector<256x128xf32> to vector<256xf32>
      %49 = vector.shape_cast %48 : vector<256xf32> to vector<256x1xf32>
      %cst_32 = arith.constant 1.280000e+02 : f32
      %50 = vector.broadcast %cst_32 : f32 to vector<256x1xf32>
      %51 = arith.divf %49, %50 : vector<256x1xf32>
      %52 = vector.broadcast %51 : vector<256x1xf32> to vector<256x128xf32>
      %53 = arith.subf %47, %52 : vector<256x128xf32>
      %54 = arith.mulf %53, %53 : vector<256x128xf32>
      %cst_33 = arith.constant dense<0.000000e+00> : vector<256xf32>
      %55 = vector.multi_reduction <add>, %54, %cst_33 [1] : vector<256x128xf32> to vector<256xf32>
      %56 = vector.shape_cast %55 : vector<256xf32> to vector<256x1xf32>
      %cst_34 = arith.constant 1.280000e+02 : f32
      %57 = vector.broadcast %cst_34 : f32 to vector<256x1xf32>
      %58 = arith.divf %56, %57 : vector<256x1xf32>
      %cst_35 = arith.constant 9.99999974E-6 : f32
      %59 = vector.broadcast %cst_35 : f32 to vector<256x1xf32>
      %60 = arith.addf %58, %59 : vector<256x1xf32>
      %61 = math.rsqrt %60 : vector<256x1xf32>
      %62 = vector.broadcast %61 : vector<256x1xf32> to vector<256x128xf32>
      %63 = arith.mulf %53, %62 : vector<256x128xf32>
      %cst_36 = arith.constant 0.000000e+00 : f32
      %64 = vector.broadcast %cst_36 : f32 to vector<256x128xf32>
      %65 = arith.maximumf %63, %64 : vector<256x128xf32>
      %c0_37 = arith.constant 0 : index
      %c0_38 = arith.constant 0 : index
      %c0_39 = arith.constant 0 : index
      %66 = vector.load %arg11[%c0_37, %c0_38, %c0_39] : memref<1x256x128xf32, #tpu.memory_space<vmem>>, vector<1x256x128xf32>
      %67 = vector.shape_cast %66 : vector<1x256x128xf32> to vector<256x128xf32>
      %68 = vector.shape_cast %65 : vector<256x128xf32> to vector<1x256x128xf32>
      tpu.vector_store %arg11[%c0_37, %c0_38, %c0_39], %68 {strides = array<i32>} : memref<1x256x128xf32, #tpu.memory_space<vmem>>, vector<1x256x128xf32>,
    } else {
    }
    return
  }
  func.func @transform_0(%arg0: i32, %arg1: i32) -> (i32, i32, i32) {
    %c0_i32 = arith.constant 0 : i32
    %c0_i32_0 = arith.constant 0 : i32
    %c0_i32_1 = arith.constant 0 : i32
    return %arg0, %c0_i32, %c0_i32_0 : i32, i32, i32
  }
  func.func @transform_1(%arg0: i32, %arg1: i32) -> (i32, i32, i32) {
    %c0_i32 = arith.constant 0 : i32
    %c0_i32_0 = arith.constant 0 : i32
    %c0_i32_1 = arith.constant 0 : i32
    return %arg0, %c0_i32, %c0_i32_0 : i32, i32, i32
  }
  func.func @transform_2(%arg0: i32, %arg1: i32) -> (i32, i32) {
    %c0_i32 = arith.constant 0 : i32
    %c0_i32_0 = arith.constant 0 : i32
    return %c0_i32, %arg1 : i32, i32
  }
  func.func @transform_3(%arg0: i32, %arg1: i32) -> (i32, i32) {
    %c0_i32 = arith.constant 0 : i32
    %c0_i32_0 = arith.constant 0 : i32
    return %c0_i32, %arg1 : i32, i32
  }
  func.func @transform_4(%arg0: i32, %arg1: i32) -> (i32, i32) {
    %c0_i32 = arith.constant 0 : i32
    %c0_i32_0 = arith.constant 0 : i32
    return %c0_i32, %arg1 : i32, i32
  }
  func.func @transform_5(%arg0: i32, %arg1: i32) -> (i32, i32, i32) {
    %c0_i32 = arith.constant 0 : i32
    %c0_i32_0 = arith.constant 0 : i32
    %c0_i32_1 = arith.constant 0 : i32
    return %arg0, %c0_i32, %c0_i32_0 : i32, i32, i32
  }
  func.func @transform_6(%arg0: i32, %arg1: i32) -> (i32, i32) {
    %c0_i32 = arith.constant 0 : i32
    %c0_i32_0 = arith.constant 0 : i32
    %c0_i32_1 = arith.constant 0 : i32
    return %c0_i32, %c0_i32_0 : i32, i32
  }
  func.func @transform_7(%arg0: i32, %arg1: i32) -> (i32, i32) {
    %c0_i32 = arith.constant 0 : i32
    %c0_i32_0 = arith.constant 0 : i32
    %c0_i32_1 = arith.constant 0 : i32
    return %c0_i32, %c0_i32_0 : i32, i32
  }
  func.func @transform_8(%arg0: i32, %arg1: i32) -> (i32, i32) {
    %c0_i32 = arith.constant 0 : i32
    %c0_i32_0 = arith.constant 0 : i32
    %c0_i32_1 = arith.constant 0 : i32
    return %c0_i32, %c0_i32_0 : i32, i32
  }
  func.func @transform_9(%arg0: i32, %arg1: i32) -> (i32, i32, i32) {
    %c0_i32 = arith.constant 0 : i32
    %c0_i32_0 = arith.constant 0 : i32
    %c0_i32_1 = arith.constant 0 : i32
    return %arg0, %c0_i32, %c0_i32_0 : i32, i32, i32
  }
}

</mosaic_0001>

<bundles_post_ra>
// kernel: tpu_custom_call.1
= control target key start
LH: loop header
LB: loop body
LE: loop exit
PB: predicated region body
PF: predicated region fallthrough
CT: control target
= control target key end

     0   :  { %s6223_s0 = inlined_call_operand.hbm [shape: f32[2,256,128], index: 0, kind: input, shape index: {}]   ;;  %s6224_s1 = inlined_call_operand.hbm [shape: f32[2,256,128], index: 1, kind: input, shape index: {}]   ;;  %s6225_s2 = inlined_call_operand.hbm [shape: s32[1,512], index: 2, kind: input, shape index: {}]   ;;  %s6226_s3 = inlined_call_operand.hbm [shape: s32[1,512], index: 3, kind: input, shape index: {}]   ;;  %s6227_s4 = inlined_call_operand.hbm [shape: s32[1,512], index: 4, kind: input, shape index: {}]   ;;  %s6228_s5 = inlined_call_operand.hbm [shape: bf16[2,8,128], index: 5, kind: input, shape index: {}]   ;;  %s6229_s6 = inlined_call_operand.hbm [shape: f32[128,128], index: 6, kind: input, shape index: {}]   ;;  %s6230_s7 = inlined_call_operand.hbm [shape: f32[128,128], index: 7, kind: input, shape index: {}]   ;;  %s6231_s8 = inlined_call_operand.vmem [shape: f32[1,128], index: 8, kind: input, shape index: {}]   ;;  %s6232_s9 = inlined_call_operand.hbm [shape: f32[2,256,128], index: 9, kind: output, shape index: {}]  }
   0x1   :  { %6298 = sst [smem:[#allocation62_spill]] %s6223_s0 }
   0x2   :  { %6299 = sst [smem:[#allocation63_spill]] %s6224_s1 }
   0x3   :  { %6300 = sst [smem:[#allocation64_spill]] %s6229_s6 }
   0x4   :  { %6301 = sst [smem:[#allocation65_spill]] %s6231_s8 }
   0x5   :  { %6302 = sst [smem:[#allocation66_spill]] %s6232_s9 }
   0x6   :  { %14 = vsyncpa [#allocation5], 0 }
   0x7   :  { %16 = vsyncpa [#allocation5 + $0x1], 0 }
   0x8   :  { %17 = vsyncpa [#allocation8], 0 }
   0x9   :  { %19 = vsyncpa [#allocation8 + $0x1], 0 }
   0xa   :  { %20 = vsyncpa [#allocation11], 0 }
   0xb   :  { %22 = vsyncpa [#allocation11 + $0x1], 0 }
   0xc   :  { %23 = vsyncpa [#allocation14], 0 }
   0xd   :  { %25 = vsyncpa [#allocation14 + $0x1], 0 }
   0xe   :  { %26 = vsyncpa [#allocation17], 0 }
   0xf   :  { %27 = vsyncpa [#allocation6], 0 }
  0x10   :  { %29 = vsyncpa [#allocation6 + $0x1], 0  ;;  %s4544_s30 = smov 0   ;;  %s4546_s10 = smov 0  }
  0x11   :  { %s4548_s11 = smov 0   ;;  %s4550_s12 = smov 0  }
  0x12   :  { %s4552_s13 = smov 0   ;;  %s4554_s14 = smov 0  }
  0x13   :  { %s4556_s15 = smov 0   ;;  %s4558_s16 = smov 0  }
  0x14   :  { %s4560_s17 = smov 0   ;;  %s4562_s18 = smov 0  }
  0x15   :  { %s4564_s19 = smov 0  }
  0x16 LB: > { %6303 = sst [smem:[#allocation27_spill]] %s4447_s10  ;;  %s4600_s20 = sadd.s32 4294967295, %s4483_s19   ;;  %s4483_s19 = sphi %s4564_s19, %s35_s19   ;;  %s4479_s18 = sphi %s4562_s18, %s6407_s18   ;;  %s4475_s17 = sphi %s4560_s17, %s6402_s17   ;;  %s4471_s16 = sphi %s4558_s16, %s6406_s16   ;;  %s4467_s15 = sphi %s4556_s15, %s6401_s15   ;;  %s4463_s14 = sphi %s4554_s14, %s6405_s14   ;;  %s4459_s13 = sphi %s4552_s13, %s6404_s13   ;;  %s4455_s12 = sphi %s4550_s12, %s6400_s12   ;;  %s4451_s11 = sphi %s4548_s11, %s6399_s11   ;;  %s4447_s10 = sphi %s4546_s10, %s6398_s10   ;;  %s4443_s30 = sphi %s4544_s30, %s6397_s30  }
  0x17   : > { %6304 = sst [smem:[#allocation28_spill]] %s4451_s11  ;;  %s3401_s21 = sadd.s32 4294967294, %s4483_s19  }
  0x18   : > { %6305 = sst [smem:[#allocation29_spill]] %s4455_s12  ;;  %p67_p0 = scmp.ne.s32.totalorder %s4459_s13, %s4455_s12 }
  0x19   : > { %6306 = sst [smem:[#allocation30_spill]] %s4459_s13  ;;  %p68_p1 = scmp.eq.s32.totalorder %s4600_s20, 0 }
  0x1a   : > { %6307 = sst [smem:[#allocation31_spill]] %s4467_s15  ;;  %p284_p2 = scmp.eq.s32.totalorder %s4600_s20, 3 }
  0x1b   : > { %6308 = sst [smem:[#allocation32_spill]] %s4471_s16  ;;  %p290_p3 = scmp.eq.s32.totalorder %s3401_s21, 3 }
  0x1c   : > { %6309 = sst [smem:[#allocation33_spill]] %s4475_s17  ;;  %p4609_p4 = por %p68_p1, %p67_p0 }
  0x1d   : > { %6310 = sst [smem:[#allocation34_spill]] %s4483_s19  ;;  %p3402_p5 = scmp.ge.s32.totalorder %s4483_s19, 1 }
  0x1e   : > { %s6311_s22 = scalar_select %p4609_p4, 1, 0 }
  0x1f   : > { %p4614_p6 = por %p290_p3, %p67_p0  ;;  %p297_p7 = scmp.lt.s32.totalorder %s4483_s19, 5 }
  0x20   : > { %6312 = sst [smem:[#allocation35_spill]] %s6311_s22  ;;  %s4485_s28 = smov [#allocation15]  }
  0x21   : > { %s6313_s23 = scalar_select %p4614_p6, 1, 0 }
  0x22   : > { %s6315_s6 = sld [smem:[#allocation64_spill]]  ;;  %p4622_p8 = pnand %p3402_p5, %p297_p7 }
  0x23   : > { %6314 = sst [smem:[#allocation36_spill]] %s6313_s23  ;;  %s310_s29 = sshll.u32 %s4485_s28, 4  ;;  %s311_s29 = int_to_ptr.vmem [resolvable:$true] %s310_s29 }
  0x24   : > { %p3896_p9 = pneg %p4622_p8  ;;  %s6235_s24 = smov 128  }
  0x25   : > { %s6237_s25 = smov 8   ;;  %p62_p11 = scmp.eq.s32.totalorder %s4483_s19, 0 }
  0x26   : > { %p4630_p10 = pnand %p3896_p9, %p68_p1  ;;  %p61_p12 = scmp.ne.s32.totalorder %s4463_s14, %s4459_s13 }
  0x27   : > { %p6245_p13 = scmp.lt.s32.totalorder %s4483_s19, 4  ;;  %s4645_s28 = sand.u32 1, %s4463_s14  }
  0x28   : > { %s308_s26 = sshll.u32 %s6315_s6, 4  ;;  %p63_p0 = por %p62_p11, %p61_p12  ;;  %s309_s26 = int_to_ptr.hbm [resolvable:$true] %s308_s26 }
  0x29   : > { %3899 = dma.hbm_to_vmem [thread:$0]  (!%p4630_p10), %s309_s26, 2048, %s311_s29, [#allocation14], %s6235_s24, %s6235_s24, %s6237_s25  }
  0x2a   : > { %p4651_p3 = por %p284_p2, %p61_p12  ;;  %s6247_s26 = sshll.u32 %s4479_s18, 8 }
  0x2b   : > { %p4659_p5 = pnand %p6245_p13, %p63_p0  ;;  %s4664_s6 = sand.u32 1, %s4483_s19  }
  0x2c   : > { %s6318_s23 = scalar_select %p4651_p3, 1, 0 }
  0x2d   : > { %s6321_s1 = sld [smem:[#allocation63_spill]]  ;;  %s6246_s15 = scalar_lea.sflag [#allocation8], %s4664_s6 }
  0x2e   : > { %6319 = sst [smem:[#allocation37_spill]] %s6318_s23  ;;  %s6322_s23 = sshll.u32 %s4645_s28, 8 }
  0x2f   : > { %s367_s16 = scalar_lea.vmem [#allocation7], %s6322_s23  ;;  %s6323_s22 = smov 8  }
  0x30   : > { %s375_s8 = sshll.u32 %s367_s16, 4  ;;  %s6324_s13 = smov 128   ;;  %s376_s8 = int_to_ptr.vmem [resolvable:$true] %s375_s8 }
  0x31   : > { %s44_s24 = sadd.s32 1, %s4475_s17  ;;  %s47_s25 = sadd.s32 1, %s4479_s18 }
  0x32   : > { %p45_p2 = scmp.ge.s32.totalorder %s44_s24, 2  ;;  %p113_p7 = scmp.ne.s32.totalorder %s4451_s11, %s4447_s10 }
  0x33   : > { %s372_s12 = scalar_lea.hbm %s6321_s1, %s6247_s26  ;;  %p119_p9 = scmp.ne.s32.totalorder %s4447_s10, %s4443_s30 }
  0x34   : > { %s373_s9 = sshll.u32 %s372_s12, 4  ;;  %s106_s12 = sadd.s32 1, %s4451_s11  ;;  %s374_s9 = int_to_ptr.hbm [resolvable:$true] %s373_s9 }
  0x35   : > { %3909 = dma.hbm_to_vmem [thread:$0]  (!%p4659_p5), %s374_s9, 4096, %s376_s8, %s6246_s15, %s6324_s13, %s6324_s13, %s6323_s22  }
  0x36   : > { %s6409_s24 = smov (%p45_p2, %s44_s24), 0  ;;  %s6411_s25 = smov (!%p45_p2, %s47_s25), %s4479_s18 }
  0x37   : > { %6325 = sst [smem:[#allocation38_spill]] %s6409_s24  ;;  %s103_s16 = ssub.s32 %s4475_s17, %s6409_s24 }
  0x38   : > { %p115_p12 = por %p113_p7, %p62_p11  ;;  %p49_p0 = scmp.ge.s32.totalorder %s6411_s25, 2 }
  0x39   : > { %p104_p13 = scmp.eq.s32.totalorder %s103_s16, 0  ;;  %p4697_p6 = por %p119_p9, %p68_p1 }
  0x3a   : > { %s387_s9 = sand.u32 1, %s4451_s11   ;;  %s6413_s25 = smov (%p49_p0, %s6411_s25), 0 }
  0x3b   : > { %s6326_s8 = scalar_select %p4697_p6, 1, 0 }
  0x3c   : > { %6328 = sst [smem:[#allocation40_spill]] %s6413_s25  ;;  %s51_s23 = ssub.s32 %s4479_s18, %s6413_s25 }
  0x3d   : > { %6327 = sst [smem:[#allocation39_spill]] %s6326_s8  ;;  %s4709_s15 = sshll.u32 %s387_s9, 1 }
  0x3e   : > { %s4705_s30 = scalar_select %p104_p13, %s4451_s11, %s106_s12  }
  0x3f   : > { %p52_p11 = scmp.eq.s32.totalorder %s51_s23, 0  ;;  %s4712_s26 = sshll.u32 %s4475_s17, 1 }
  0x40   : > { %6329 = sst [smem:[#allocation41_spill]] %s4705_s30  ;;  %p6330_p2 = scmp.lt.s32.totalorder %s4483_s19, 4 }
  0x41   : > { %s6332_s1 = sadd.s32 1, %s4463_s14  ;;  %s412_s9 = scalar_lea.hbm %s6226_s3, %s4712_s26 }
  0x42   : > { %p4716_p7 = pnand %p6330_p2, %p115_p12  ;;  %s408_s23 = scalar_lea.vmem [#allocation10], %s4709_s15 }
  0x43   : > { %s4723_s24 = scalar_select %p52_p11, %s4463_s14, %s6332_s1  }
  0x44   : > { %s416_s17 = sshll.u32 %s408_s23, 4  ;;  %s414_s30 = sshll.u32 %s412_s9, 4  ;;  %s417_s17 = int_to_ptr.vmem [resolvable:$true] %s416_s17  ;;  %s415_s30 = int_to_ptr.hbm [resolvable:$true] %s414_s30 }
  0x45   : > { %s322_s8 = sshll.u32 %s6230_s7, 4  ;;  %s6257_s10 = scalar_lea.sflag [#allocation11], %s4664_s6  ;;  %s323_s8 = int_to_ptr.hbm [resolvable:$true] %s322_s8 }
  0x46   : > { %3915 = dma.hbm_to_vmem [thread:$0]  (!%p4716_p7), %s415_s30, 32, %s417_s17, %s6257_s10  }
  0x47   : > { %s4488_s1 = smov [#allocation16]   ;;  %s6333_s11 = sshll.u32 %s4479_s18, 8 }
  0x48   : > { %s324_s25 = sshll.u32 %s4488_s1, 4  ;;  %s6334_s0 = sld [smem:[#allocation62_spill]]  ;;  %s325_s25 = int_to_ptr.vmem [resolvable:$true] %s324_s25 }
  0x49   : > { %3902 = dma.hbm_to_vmem [thread:$0]  (!%p4630_p10), %s323_s8, 2048, %s325_s25, [#allocation17], %s6324_s13, %s6324_s13, %s6323_s22  }
  0x4a   : > { %s6335_s23 = sshll.u32 %s4645_s28, 8  ;;  %s342_s21 = scalar_lea.sflag [#allocation5], %s4645_s28 }
  0x4b   : > { %s345_s17 = scalar_lea.vmem [#allocation4], %s6335_s23  ;;  %s393_s25 = scalar_lea.hbm %s6225_s2, %s4712_s26 }
  0x4c   : > { %s353_s30 = sshll.u32 %s345_s17, 4  ;;  %s395_s12 = sshll.u32 %s393_s25, 4  ;;  %s354_s30 = int_to_ptr.vmem [resolvable:$true] %s353_s30  ;;  %s396_s12 = int_to_ptr.hbm [resolvable:$true] %s395_s12 }
  0x4d   : > { %s3419_s8 = sshll.u32 %s4479_s18, 2 }
  0x4e   : > { %s350_s9 = scalar_lea.hbm %s6334_s0, %s6333_s11  ;;  %s389_s11 = scalar_lea.vmem [#allocation9], %s4709_s15 }
  0x4f   : > { %s351_s10 = sshll.u32 %s350_s9, 4  ;;  %s397_s19 = sshll.u32 %s389_s11, 4  ;;  %s352_s10 = int_to_ptr.hbm [resolvable:$true] %s351_s10  ;;  %s398_s19 = int_to_ptr.vmem [resolvable:$true] %s397_s19 }
  0x50   : > { %3906 = dma.hbm_to_vmem [thread:$0]  (!%p4659_p5), %s352_s10, 4096, %s354_s30, %s342_s21, %s6324_s13, %s6324_s13, %s6323_s22  }
  0x51   : > { %s6336_s9 = scalar_lea.sflag [#allocation8], %s4664_s6  ;;  %s431_s0 = scalar_lea.hbm %s6227_s4, %s4712_s26 }
  0x52   : > { %3912 = dma.hbm_to_vmem [thread:$0]  (!%p4716_p7), %s396_s12, 32, %s398_s19, %s6336_s9  }
  0x53   : > { %s427_s10 = scalar_lea.vmem [#allocation12], %s4709_s15  ;;  %s433_s22 = sshll.u32 %s431_s0, 4  ;;  %s434_s22 = int_to_ptr.hbm [resolvable:$true] %s433_s22 }
  0x54   : > { %s435_s13 = sshll.u32 %s427_s10, 4  ;;  %s6337_s30 = scalar_lea.sflag [#allocation11], %s4664_s6  ;;  %s436_s13 = int_to_ptr.vmem [resolvable:$true] %s435_s13 }
  0x55   : > { %3918 = dma.hbm_to_vmem [thread:$0]  (!%p4716_p7), %s434_s22, 32, %s436_s13, %s6337_s30  }
  0x56   : > { %s3418_s21 = sshll.u32 %s4645_s28, 2  ;;  %s450_s11 = scalar_lea.hbm %s6228_s5, %s3419_s8 }
  0x57   : > { %s452_s19 = sshll.u32 %s450_s11, 4  ;;  %s446_s12 = scalar_lea.vmem [#allocation13], %s3418_s21  ;;  %s453_s19 = int_to_ptr.hbm [resolvable:$true] %s452_s19 }
  0x58   : > { %s454_s9 = sshll.u32 %s446_s12, 4  ;;  %s443_s26 = scalar_lea.sflag [#allocation14], %s4664_s6  ;;  %s455_s9 = int_to_ptr.vmem [resolvable:$true] %s454_s9 }
  0x59   : > { %3921 = dma.hbm_to_vmem [thread:$0]  (!%p4659_p5), %s453_s19, 64, %s455_s9, %s443_s26  }
  0x5a   : > { %463 = sbr.rel (%p4622_p8) target bundleno = 1826 (0x722), region = 56 }
  0x5f   : > { %s6338_s0 = sld [smem:[#allocation30_spill]] }
  0x65   : > { %s4785_s16 = sand.u32 1, %s6338_s0  }
  0x66   : > { %s3421_s28 = sshll.u32 %s4785_s16, 8  ;;  %s466_s23 = scalar_lea.sflag [#allocation5], %s4785_s16 }
  0x67   : > { %s4789_s17 = scalar_lea.vmem [#allocation4], %s3421_s28 }
  0x68   : > { %4410 = dma.done.wait (%p4609_p4), %s466_s23, 4096  }
  0x69   : > { %4412 = vsyncadd (%p4609_p4), %s466_s23, 4294963200  ;;  %s475_s6 = sand.u32 1, %s4600_s20   ;;  %s4796_s29 = scalar_lea.vmem [#allocation7], %s3421_s28 }
  0x6a   : > { %s476_s27 = scalar_lea.sflag [#allocation8], %s475_s6 }
  0x6b   : > { %4414 = dma.done.wait (%p4609_p4), %s476_s27, 4096  }
  0x6c   : > { %4416 = vsyncadd (%p4609_p4), %s476_s27, 4294963200  ;;  %s6340_s10 = sld [smem:[#allocation27_spill]] }
  0x72   : > { %s487_s22 = sand.u32 1, %s6340_s10  }
  0x73   : > { %s4803_s30 = sshll.u32 %s487_s22, 1 }
  0x74   : > { %s489_s21 = scalar_lea.vmem [#allocation9], %s4803_s30 }
  0x75   : > { %4418 = dma.done.wait (%p4697_p6), %s476_s27, 32  }
  0x76   : > { %4420 = vsyncadd (%p4697_p6), %s476_s27, 4294967264  ;;  %s496_s8 = scalar_lea.sflag [#allocation11], %s475_s6  ;;  %s499_s1 = scalar_lea.vmem [#allocation10], %s4803_s30 }
  0x77   : > { %4422 = dma.done.wait (%p4697_p6), %s496_s8, 64  }
  0x78   : > { %4424 = vsyncadd (%p4697_p6), %s496_s8, 4294967232  ;;  %s3426_s25 = sshll.u32 %s4785_s16, 2  ;;  %s509_s11 = scalar_lea.vmem [#allocation12], %s4803_s30 }
  0x79   : > { %s516_s19 = scalar_lea.sflag [#allocation14], %s475_s6  ;;  %s4817_s12 = scalar_lea.vmem [#allocation13], %s3426_s25 }
  0x7a   : > { %4426 = dma.done.wait (%p4609_p4), %s516_s19, 64  }
  0x7b   : > { %4428 = vsyncadd (%p4609_p4), %s516_s19, 4294967232 }
  0x7c   : > { %4430 = dma.done.wait (%p68_p1), [#allocation14], 2048  }
  0x7d   : > { %4432 = vsyncadd (%p68_p1), [#allocation14], 4294965248 }
  0x7e   : > { %4434 = dma.done.wait (%p68_p1), [#allocation17], 2048  }
  0x7f   : > { %4436 = vsyncadd (%p68_p1), [#allocation17], 4294965248  ;;  %s4831_s9 = scalar_lea.vmem [#allocation18], %s3421_s28  ;;  %s6342_s26 = sld [smem:[#allocation31_spill]] }
  0x85   : > { %p3430_p6 = scmp.ne.s32.totalorder %s6342_s26, 0 }
  0x87   : > { %597 = sbr.rel (%p3430_p6) target bundleno = 189 (0xbd), region = 92 }
  0x8c   : > { %v598_v0 = vld [vmem:[%s4796_s29] sm:$0xff]  ;;  %v599_v1 = vld [vmem:[%s4796_s29 + $0x8] sm:$0xff]  ;;  %v600_v2 = vld [vmem:[%s4796_s29 + $0x10] sm:$0xff] }
  0x8d   : > { %630 = vst [vmem:[#allocation2 + $0xb0] sm:$0xff] %v598_v0  ;;  %v601_v3 = vld [vmem:[%s4796_s29 + $0x18] sm:$0xff]  ;;  %v602_v4 = vld [vmem:[%s4796_s29 + $0x20] sm:$0xff]  ;;  %v603_v5 = vld [vmem:[%s4796_s29 + $0x28] sm:$0xff] }
  0x8e   : > { %631 = vst [vmem:[#allocation2] sm:$0xff] %v599_v1  ;;  %v604_v6 = vld [vmem:[%s4796_s29 + $0x30] sm:$0xff]  ;;  %v605_v7 = vld [vmem:[%s4796_s29 + $0x38] sm:$0xff]  ;;  %v606_v8 = vld [vmem:[%s4796_s29 + $0x40] sm:$0xff] }
  0x8f   : > { %632 = vst [vmem:[#allocation2 + $0xd8] sm:$0xff] %v600_v2  ;;  %v607_v9 = vld [vmem:[%s4796_s29 + $0x48] sm:$0xff]  ;;  %v608_v10 = vld [vmem:[%s4796_s29 + $0x50] sm:$0xff]  ;;  %v609_v11 = vld [vmem:[%s4796_s29 + $0x58] sm:$0xff] }
  0x90   : > { %633 = vst [vmem:[#allocation2 + $0x18] sm:$0xff] %v601_v3  ;;  %v610_v12 = vld [vmem:[%s4796_s29 + $0x60] sm:$0xff]  ;;  %v611_v13 = vld [vmem:[%s4796_s29 + $0x68] sm:$0xff]  ;;  %v612_v14 = vld [vmem:[%s4796_s29 + $0x70] sm:$0xff] }
  0x91   : > { %634 = vst [vmem:[#allocation2 + $0x50] sm:$0xff] %v602_v4  ;;  %v613_v15 = vld [vmem:[%s4796_s29 + $0x78] sm:$0xff]  ;;  %v614_v16 = vld [vmem:[%s4796_s29 + $0x80] sm:$0xff]  ;;  %v615_v17 = vld [vmem:[%s4796_s29 + $0x88] sm:$0xff] }
  0x92   : > { %635 = vst [vmem:[#allocation2 + $0x68] sm:$0xff] %v603_v5  ;;  %v616_v18 = vld [vmem:[%s4796_s29 + $0x90] sm:$0xff]  ;;  %v617_v19 = vld [vmem:[%s4796_s29 + $0x98] sm:$0xff]  ;;  %v618_v20 = vld [vmem:[%s4796_s29 + $0xa0] sm:$0xff] }
  0x93   : > { %636 = vst [vmem:[#allocation2 + $0x30] sm:$0xff] %v604_v6  ;;  %v619_v21 = vld [vmem:[%s4796_s29 + $0xa8] sm:$0xff]  ;;  %v620_v22 = vld [vmem:[%s4796_s29 + $0xb0] sm:$0xff]  ;;  %v621_v23 = vld [vmem:[%s4796_s29 + $0xb8] sm:$0xff] }
  0x94   : > { %637 = vst [vmem:[#allocation2 + $0x48] sm:$0xff] %v605_v7  ;;  %v622_v24 = vld [vmem:[%s4796_s29 + $0xc0] sm:$0xff]  ;;  %v623_v25 = vld [vmem:[%s4796_s29 + $0xc8] sm:$0xff]  ;;  %v624_v26 = vld [vmem:[%s4796_s29 + $0xd0] sm:$0xff] }
  0x95   : > { %638 = vst [vmem:[#allocation2 + $0x80] sm:$0xff] %v606_v8  ;;  %v625_v27 = vld [vmem:[%s4796_s29 + $0xd8] sm:$0xff]  ;;  %v626_v28 = vld [vmem:[%s4796_s29 + $0xe0] sm:$0xff]  ;;  %v663_v30 = vld [vmem:[%s4789_s17 + $0x8] sm:$0xff] }
  0x96   : > { %639 = vst [vmem:[#allocation2 + $0x88] sm:$0xff] %v607_v9  ;;  %v662_v29 = vld [vmem:[%s4789_s17] sm:$0xff]  ;;  %v627_v31 = vld [vmem:[%s4796_s29 + $0xe8] sm:$0xff]  ;;  %v664_v32 = vld [vmem:[%s4789_s17 + $0x10] sm:$0xff] }
  0x97   : > { %640 = vst [vmem:[#allocation2 + $0xe8] sm:$0xff] %v608_v10  ;;  %v665_v33 = vld [vmem:[%s4789_s17 + $0x18] sm:$0xff]  ;;  %v628_v34 = vld [vmem:[%s4796_s29 + $0xf0] sm:$0xff]  ;;  %v666_v35 = vld [vmem:[%s4789_s17 + $0x20] sm:$0xff]  ;;  %v3733_v38 = vpack.c.bf16 %v663_v30, %v662_v29 }
  0x98   : > { %641 = vst [vmem:[#allocation2 + $0xb8] sm:$0xff] %v609_v11  ;;  %v667_v36 = vld [vmem:[%s4789_s17 + $0x28] sm:$0xff]  ;;  %v629_v37 = vld [vmem:[%s4796_s29 + $0xf8] sm:$0xff]  ;;  %v668_v39 = vld [vmem:[%s4789_s17 + $0x30] sm:$0xff]  ;;  %v3738_v41 = vpack.c.bf16 %v665_v33, %v664_v32 }
  0x99   : > { %642 = vst [vmem:[#allocation2 + $0x60] sm:$0xff] %v610_v12  ;;  %v669_v40 = vld [vmem:[%s4789_s17 + $0x38] sm:$0xff]  ;;  %v670_v42 = vld [vmem:[%s4789_s17 + $0x40] sm:$0xff]  ;;  %v671_v43 = vld [vmem:[%s4789_s17 + $0x48] sm:$0xff]  ;;  %v3743_v44 = vpack.c.bf16 %v667_v36, %v666_v35 }
  0x9a   : > { %643 = vst [vmem:[#allocation2 + $0xf0] sm:$0xff] %v611_v13  ;;  %v672_v45 = vld [vmem:[%s4789_s17 + $0x50] sm:$0xff]  ;;  %v673_v46 = vld [vmem:[%s4789_s17 + $0x58] sm:$0xff]  ;;  %v3748_v47 = vpack.c.bf16 %v669_v40, %v668_v39  ;;  %v674_v48 = vld [vmem:[%s4789_s17 + $0x60] sm:$0xff]  ;;  %v3753_v50 = vpack.c.bf16 %v671_v43, %v670_v42 }
  0x9b   : > { %644 = vst [vmem:[#allocation2 + $0x8] sm:$0xff] %v612_v14  ;;  %v675_v49 = vld [vmem:[%s4789_s17 + $0x68] sm:$0xff]  ;;  %v676_v51 = vld [vmem:[%s4789_s17 + $0x70] sm:$0xff]  ;;  %v677_v52 = vld [vmem:[%s4789_s17 + $0x78] sm:$0xff]  ;;  %v3758_v53 = vpack.c.bf16 %v673_v46, %v672_v45 }
  0x9c   : > { %645 = vst [vmem:[#allocation2 + $0x78] sm:$0xff] %v613_v15  ;;  %v678_v54 = vld [vmem:[%s4789_s17 + $0x80] sm:$0xff]  ;;  %v679_v55 = vld [vmem:[%s4789_s17 + $0x88] sm:$0xff]  ;;  %v3763_v56 = vpack.c.bf16 %v675_v49, %v674_v48  ;;  %v680_v57 = vld [vmem:[%s4789_s17 + $0x90] sm:$0xff]  ;;  %v3768_v59 = vpack.c.bf16 %v677_v52, %v676_v51 }
  0x9d   : > { %646 = vst [vmem:[#allocation2 + $0x38] sm:$0xff] %v614_v16  ;;  %v681_v58 = vld [vmem:[%s4789_s17 + $0x98] sm:$0xff]  ;;  %v682_v60 = vld [vmem:[%s4789_s17 + $0xa0] sm:$0xff]  ;;  %v683_v61 = vld [vmem:[%s4789_s17 + $0xa8] sm:$0xff]  ;;  %v3773_v62 = vpack.c.bf16 %v679_v55, %v678_v54 }
  0x9e   : > { %647 = vst [vmem:[#allocation2 + $0x58] sm:$0xff] %v615_v17  ;;  %v684_v63 = vld [vmem:[%s4789_s17 + $0xb0] sm:$0xff]  ;;  %v685_v0 = vld [vmem:[%s4789_s17 + $0xb8] sm:$0xff]  ;;  %v3778_v1 = vpack.c.bf16 %v681_v58, %v680_v57  ;;  %v686_v2 = vld [vmem:[%s4789_s17 + $0xc0] sm:$0xff]  ;;  %v3783_v4 = vpack.c.bf16 %v683_v61, %v682_v60 }
  0x9f   : > { %648 = vst [vmem:[#allocation2 + $0x40] sm:$0xff] %v616_v18  ;;  %v687_v3 = vld [vmem:[%s4789_s17 + $0xc8] sm:$0xff]  ;;  %v688_v5 = vld [vmem:[%s4789_s17 + $0xd0] sm:$0xff]  ;;  %v689_v6 = vld [vmem:[%s4789_s17 + $0xd8] sm:$0xff]  ;;  %v3788_v7 = vpack.c.bf16 %v685_v0, %v684_v63 }
  0xa0   : > { %649 = vst [vmem:[#allocation2 + $0xc8] sm:$0xff] %v617_v19  ;;  %v690_v8 = vld [vmem:[%s4789_s17 + $0xe0] sm:$0xff]  ;;  %v691_v9 = vld [vmem:[%s4789_s17 + $0xe8] sm:$0xff]  ;;  %v3793_v10 = vpack.c.bf16 %v687_v3, %v686_v2  ;;  %v692_v11 = vld [vmem:[%s4789_s17 + $0xf0] sm:$0xff]  ;;  %v3798_v13 = vpack.c.bf16 %v689_v6, %v688_v5 }
  0xa1   : > { %650 = vst [vmem:[#allocation2 + $0xe0] sm:$0xff] %v618_v20  ;;  %v693_v12 = vld [vmem:[%s4789_s17 + $0xf8] sm:$0xff]  ;;  %v3803_v14 = vpack.c.bf16 %v691_v9, %v690_v8 }
  0xa2   : > { %651 = vst [vmem:[#allocation2 + $0x90] sm:$0xff] %v619_v21  ;;  %v3808_v15 = vpack.c.bf16 %v693_v12, %v692_v11 }
  0xa3   : > { %652 = vst [vmem:[#allocation2 + $0x70] sm:$0xff] %v620_v22 }
  0xa4   : > { %653 = vst [vmem:[#allocation2 + $0xc0] sm:$0xff] %v621_v23 }
  0xa5   : > { %654 = vst [vmem:[#allocation2 + $0xa8] sm:$0xff] %v622_v24 }
  0xa6   : > { %655 = vst [vmem:[#allocation2 + $0xd0] sm:$0xff] %v623_v25 }
  0xa7   : > { %656 = vst [vmem:[#allocation2 + $0x10] sm:$0xff] %v624_v26 }
  0xa8   : > { %657 = vst [vmem:[#allocation2 + $0x28] sm:$0xff] %v625_v27 }
  0xa9   : > { %658 = vst [vmem:[#allocation2 + $0xa0] sm:$0xff] %v626_v28 }
  0xaa   : > { %659 = vst [vmem:[#allocation2 + $0xf8] sm:$0xff] %v627_v31 }
  0xab   : > { %660 = vst [vmem:[#allocation2 + $0x20] sm:$0xff] %v628_v34 }
  0xac   : > { %661 = vst [vmem:[#allocation2 + $0x98] sm:$0xff] %v629_v37 }
  0xad   : > { %3734 = vst [vmem:[#allocation3] sm:$0xff] %v3733_v38  }
  0xae   : > { %3810 = vst [vmem:[#allocation3 + $0x48] sm:$0xff] %v3738_v41  }
  0xaf   : > { %3811 = vst [vmem:[#allocation3 + $0x68] sm:$0xff] %v3743_v44  }
  0xb0   : > { %3812 = vst [vmem:[#allocation3 + $0x78] sm:$0xff] %v3748_v47  }
  0xb1   : > { %3813 = vst [vmem:[#allocation3 + $0x8] sm:$0xff] %v3753_v50  }
  0xb2   : > { %3814 = vst [vmem:[#allocation3 + $0x50] sm:$0xff] %v3758_v53  }
  0xb3   : > { %3815 = vst [vmem:[#allocation3 + $0x40] sm:$0xff] %v3763_v56  }
  0xb4   : > { %3816 = vst [vmem:[#allocation3 + $0x38] sm:$0xff] %v3768_v59  }
  0xb5   : > { %3817 = vst [vmem:[#allocation3 + $0x70] sm:$0xff] %v3773_v62  }
  0xb6   : > { %3818 = vst [vmem:[#allocation3 + $0x60] sm:$0xff] %v3778_v1  }
  0xb7   : > { %3819 = vst [vmem:[#allocation3 + $0x18] sm:$0xff] %v3783_v4  }
  0xb8   : > { %3820 = vst [vmem:[#allocation3 + $0x20] sm:$0xff] %v3788_v7  }
  0xb9   : > { %3821 = vst [vmem:[#allocation3 + $0x10] sm:$0xff] %v3793_v10  }
  0xba   : > { %3822 = vst [vmem:[#allocation3 + $0x30] sm:$0xff] %v3798_v13  }
  0xbb   : > { %3823 = vst [vmem:[#allocation3 + $0x28] sm:$0xff] %v3803_v14  }
  0xbc   : > { %3824 = vst [vmem:[#allocation3 + $0x58] sm:$0xff] %v3808_v15  }
  0xbd PF: > { %v758_v16 = vld [vmem:[%s489_s21] sm:$0x3]  ;;  %v761_v17 = vlaneseq  ;;  %v4489_v22 = vmov 0.0   ;;  %s6387_s20 = sld [smem:[#allocation31_spill]] }
  0xbe   : > { %v4900_v18 = vperm.slane %v758_v16, 0  ;;  %v4902_v19 = vperm.slane %v758_v16, 1 }
  0xbf   : > { %v4904_v20 = vshrl.u32 %v761_v17, 7 }
  0xc1   : > { %v4907_v21 = vadd.s32 8, %v4904_v20  ;;  %vm796_vm0 = vcmp.eq.s32.totalorder %v4904_v20, %v4900_v18  ;;  %vm797_vm1 = vcmp.eq.s32.totalorder %v4904_v20, %v4902_v19  ;;  %v4922_v29 = vadd.s32 16, %v4904_v20 }
  0xc2   : > { %v3431_v23 = vsel %vm796_vm0, 1.0, %v4489_v22  ;;  %v3432_v24 = vsel %vm797_vm1, 1.0, %v4489_v22  ;;  %v4925_v30 = vadd.s32 24, %v4904_v20  ;;  %v4940_v37 = vadd.s32 32, %v4904_v20 }
  0xc3   : > { %vm798_vm2 = vcmp.eq.s32.totalorder %v4907_v21, %v4900_v18  ;;  %vm799_vm3 = vcmp.eq.s32.totalorder %v4907_v21, %v4902_v19  ;;  %vm800_vm4 = vcmp.eq.s32.totalorder %v4922_v29, %v4900_v18  ;;  %vm801_vm5 = vcmp.eq.s32.totalorder %v4922_v29, %v4902_v19  ;;  %p3705_p1 = scmp.ne.s32.totalorder %s6387_s20, 1 }
  0xc4   : > { %v3433_v25 = vsel %vm798_vm2, 1.0, %v4489_v22  ;;  %v3434_v26 = vsel %vm799_vm3, 1.0, %v4489_v22  ;;  %vm802_vm6 = vcmp.eq.s32.totalorder %v4925_v30, %v4900_v18  ;;  %vm803_vm7 = vcmp.eq.s32.totalorder %v4925_v30, %v4902_v19  ;;  %s6388_s28 = sld [smem:[#allocation65_spill]] (!%p3705_p1) }
  0xc5   : > { %v988_v27 = vpack.c.bf16 %v3433_v25, %v3431_v23  ;;  %v989_v28 = vpack.c.bf16 %v3434_v26, %v3432_v24  ;;  %v3435_v31 = vsel %vm800_vm4, 1.0, %v4489_v22  ;;  %v3436_v32 = vsel %vm801_vm5, 1.0, %v4489_v22 }
  0xc6   : > { %v3437_v33 = vsel %vm802_vm6, 1.0, %v4489_v22  ;;  %v3438_v34 = vsel %vm803_vm7, 1.0, %v4489_v22  ;;  %v4943_v38 = vadd.s32 40, %v4904_v20  ;;  %vm804_vm8 = vcmp.eq.s32.totalorder %v4940_v37, %v4900_v18 }
  0xc7   : > { %1052 = vxpose.binary.xlu0.c.b16.start [1/16] %v989_v28, %v988_v27, 128  ;;  %v990_v35 = vpack.c.bf16 %v3437_v33, %v3435_v31  ;;  %v991_v36 = vpack.c.bf16 %v3438_v34, %v3436_v32  ;;  %vm805_vm9 = vcmp.eq.s32.totalorder %v4940_v37, %v4902_v19  ;;  %v3439_v39 = vsel %vm804_vm8, 1.0, %v4489_v22 }
  0xc8   : > { %vm806_vm10 = vcmp.eq.s32.totalorder %v4943_v38, %v4900_v18  ;;  %vm807_vm11 = vcmp.eq.s32.totalorder %v4943_v38, %v4902_v19  ;;  %v3440_v40 = vsel %vm805_vm9, 1.0, %v4489_v22  ;;  %v4958_v45 = vadd.s32 128, %v4904_v20 }
  0xc9   : > { %v3441_v41 = vsel %vm806_vm10, 1.0, %v4489_v22  ;;  %v3442_v42 = vsel %vm807_vm11, 1.0, %v4489_v22  ;;  %v4961_v46 = vadd.s32 136, %v4904_v20  ;;  %v4964_v47 = vadd.s32 48, %v4904_v20 }
  0xca   : > { %v992_v43 = vpack.c.bf16 %v3441_v41, %v3439_v39  ;;  %v993_v44 = vpack.c.bf16 %v3442_v42, %v3440_v40  ;;  %6343 = vst [vmem:[#allocation42_spill] sm:$0xff] %v4958_v45  ;;  %v4967_v48 = vadd.s32 56, %v4904_v20  ;;  %vm828_vm12 = vcmp.eq.s32.totalorder %v4958_v45, %v4900_v18  ;;  %v3720_v41 = vld [vmem:[#allocation3 + $0x38] sm:$0xff] }
  0xcb   : > { %6344 = vst [vmem:[#allocation43_spill] sm:$0xff] %v4961_v46  ;;  %vm829_vm13 = vcmp.eq.s32.totalorder %v4958_v45, %v4902_v19  ;;  %vm830_vm14 = vcmp.eq.s32.totalorder %v4961_v46, %v4900_v18  ;;  %vm831_vm15 = vcmp.eq.s32.totalorder %v4961_v46, %v4902_v19  ;;  %v3463_v49 = vsel %vm828_vm12, 1.0, %v4489_v22  ;;  %1196 = vmatpush.bf16.msra.mxu0 %v3720_v41 }
  0xcc   : > { %v3464_v50 = vsel %vm829_vm13, 1.0, %v4489_v22  ;;  %v3465_v51 = vsel %vm830_vm14, 1.0, %v4489_v22  ;;  %v3466_v52 = vsel %vm831_vm15, 1.0, %v4489_v22  ;;  %vm808_vm0 = vcmp.eq.s32.totalorder %v4964_v47, %v4900_v18  ;;  %3825 = vmatpush.bf16.msra.mxu1 %v3720_v41  ;;  %3826 = vmatpush.bf16.msra.mxu3 %v3720_v41 }
  0xcd   : > { %v1004_v53 = vpack.c.bf16 %v3465_v51, %v3463_v49  ;;  %v1005_v54 = vpack.c.bf16 %v3466_v52, %v3464_v50  ;;  %vm809_vm1 = vcmp.eq.s32.totalorder %v4964_v47, %v4902_v19  ;;  %vm810_vm2 = vcmp.eq.s32.totalorder %v4967_v48, %v4900_v18  ;;  %v3719_v51 = vld [vmem:[#allocation3 + $0x40] sm:$0xff] }
  0xce   : > { %vm811_vm3 = vcmp.eq.s32.totalorder %v4967_v48, %v4902_v19  ;;  %v3443_v55 = vsel %vm808_vm0, 1.0, %v4489_v22  ;;  %v3444_v56 = vsel %vm809_vm1, 1.0, %v4489_v22  ;;  %v3445_v57 = vsel %vm810_vm2, 1.0, %v4489_v22 }
  0xcf   : > { %1076 = vxpose.binary.xlu1.c.b16.start [1/16] %v1005_v54, %v1004_v53, 128  ;;  %v3446_v58 = vsel %vm811_vm3, 1.0, %v4489_v22  ;;  %v994_v59 = vpack.c.bf16 %v3445_v57, %v3443_v55  ;;  %v4994_v61 = vadd.s32 144, %v4904_v20  ;;  %v4997_v62 = vadd.s32 152, %v4904_v20 }
  0xd0   : > { %v995_v60 = vpack.c.bf16 %v3446_v58, %v3444_v56  ;;  %v5000_v63 = vadd.s32 64, %v4904_v20  ;;  %v5003_v0 = vadd.s32 72, %v4904_v20  ;;  %v5030_v13 = vadd.s32 160, %v4904_v20  ;;  %1197 = vmatpush.bf16.msra.mxu0 %v3719_v51  ;;  %v3718_v56 = vld [vmem:[#allocation3 + $0x50] sm:$0xff]  ;;  %3827 = vmatpush.bf16.msra.mxu1 %v3719_v51 }
  0xd1   : > { %6345 = vst [vmem:[#allocation44_spill] sm:$0xff] %v4994_v61  ;;  %vm832_vm4 = vcmp.eq.s32.totalorder %v4994_v61, %v4900_v18  ;;  %vm833_vm5 = vcmp.eq.s32.totalorder %v4994_v61, %v4902_v19  ;;  %vm834_vm6 = vcmp.eq.s32.totalorder %v4997_v62, %v4900_v18  ;;  %vm835_vm7 = vcmp.eq.s32.totalorder %v4997_v62, %v4902_v19 }
  0xd2   : > { %6346 = vst [vmem:[#allocation45_spill] sm:$0xff] %v4997_v62  ;;  %v3467_v1 = vsel %vm832_vm4, 1.0, %v4489_v22  ;;  %v3468_v2 = vsel %vm833_vm5, 1.0, %v4489_v22  ;;  %v3469_v3 = vsel %vm834_vm6, 1.0, %v4489_v22  ;;  %v3470_v4 = vsel %vm835_vm7, 1.0, %v4489_v22  ;;  %3828 = vmatpush.bf16.msra.mxu3 %v3719_v51 }
  0xd3   : > { %v1006_v5 = vpack.c.bf16 %v3469_v3, %v3467_v1  ;;  %v1007_v6 = vpack.c.bf16 %v3470_v4, %v3468_v2  ;;  %vm812_vm8 = vcmp.eq.s32.totalorder %v5000_v63, %v4900_v18  ;;  %vm813_vm9 = vcmp.eq.s32.totalorder %v5000_v63, %v4902_v19  ;;  %6347 = vst [vmem:[#allocation46_spill] sm:$0xff] %v5030_v13  ;;  %v3717_v3 = vld [vmem:[#allocation3 + $0x8] sm:$0xff] }
  0xd4   : > { %vm814_vm10 = vcmp.eq.s32.totalorder %v5003_v0, %v4900_v18  ;;  %vm815_vm11 = vcmp.eq.s32.totalorder %v5003_v0, %v4902_v19  ;;  %v3447_v7 = vsel %vm812_vm8, 1.0, %v4489_v22  ;;  %v3448_v8 = vsel %vm813_vm9, 1.0, %v4489_v22  ;;  %1198 = vmatpush.bf16.msra.mxu0 %v3718_v56  ;;  %3829 = vmatpush.bf16.msra.mxu1 %v3718_v56 }
  0xd5   : > { %v3449_v9 = vsel %vm814_vm10, 1.0, %v4489_v22  ;;  %v3450_v10 = vsel %vm815_vm11, 1.0, %v4489_v22  ;;  %v5033_v14 = vadd.s32 168, %v4904_v20  ;;  %v5036_v15 = vadd.s32 80, %v4904_v20 }
  0xd6   : > { %v996_v11 = vpack.c.bf16 %v3449_v9, %v3447_v7  ;;  %v997_v12 = vpack.c.bf16 %v3450_v10, %v3448_v8  ;;  %v5039_v16 = vadd.s32 88, %v4904_v20  ;;  %vm836_vm12 = vcmp.eq.s32.totalorder %v5030_v13, %v4900_v18  ;;  %3830 = vmatpush.bf16.msra.mxu3 %v3718_v56  ;;  %v3716_v8 = vld [vmem:[#allocation3 + $0x78] sm:$0xff] }
  0xd7   : > { %1053 = vxpose.binary.xlu0.c.b16.cont [2/16] %v991_v36, %v990_v35, 128  ;;  %6348 = vst [vmem:[#allocation47_spill] sm:$0xff] %v5033_v14  ;;  %vm837_vm13 = vcmp.eq.s32.totalorder %v5030_v13, %v4902_v19  ;;  %vm838_vm14 = vcmp.eq.s32.totalorder %v5033_v14, %v4900_v18  ;;  %v3471_v17 = vsel %vm836_vm12, 1.0, %v4489_v22  ;;  %v5066_v36 = vadd.s32 96, %v4904_v20 }
  0xd8   : > { %vm839_vm15 = vcmp.eq.s32.totalorder %v5033_v14, %v4902_v19  ;;  %v3472_v23 = vsel %vm837_vm13, 1.0, %v4489_v22  ;;  %v3473_v24 = vsel %vm838_vm14, 1.0, %v4489_v22  ;;  %vm816_vm0 = vcmp.eq.s32.totalorder %v5036_v15, %v4900_v18  ;;  %1199 = vmatpush.bf16.msra.mxu0 %v3717_v3  ;;  %3831 = vmatpush.bf16.msra.mxu1 %v3717_v3 }
  0xd9   : > { %v3474_v25 = vsel %vm839_vm15, 1.0, %v4489_v22  ;;  %v1008_v26 = vpack.c.bf16 %v3473_v24, %v3471_v17  ;;  %vm817_vm1 = vcmp.eq.s32.totalorder %v5036_v15, %v4902_v19  ;;  %vm818_vm2 = vcmp.eq.s32.totalorder %v5039_v16, %v4900_v18  ;;  %6349 = vst [vmem:[#allocation48_spill] sm:$0xff] %v5066_v36  ;;  %v3715_v17 = vld [vmem:[#allocation3 + $0x68] sm:$0xff] }
  0xda   : > { %v1009_v27 = vpack.c.bf16 %v3474_v25, %v3472_v23  ;;  %vm819_vm3 = vcmp.eq.s32.totalorder %v5039_v16, %v4902_v19  ;;  %v3451_v28 = vsel %vm816_vm0, 1.0, %v4489_v22  ;;  %v3452_v31 = vsel %vm817_vm1, 1.0, %v4489_v22  ;;  %3832 = vmatpush.bf16.msra.mxu3 %v3717_v3  ;;  %v759_v23 = vld [vmem:[%s499_s1] sm:$0x3] }
  0xdb   : > { %v3453_v32 = vsel %vm818_vm2, 1.0, %v4489_v22  ;;  %v3454_v33 = vsel %vm819_vm3, 1.0, %v4489_v22  ;;  %v5069_v39 = vadd.s32 176, %v4904_v20  ;;  %v5072_v40 = vadd.s32 184, %v4904_v20 }
  0xdc   : > { %v998_v34 = vpack.c.bf16 %v3453_v32, %v3451_v28  ;;  %v999_v35 = vpack.c.bf16 %v3454_v33, %v3452_v31  ;;  %v5075_v42 = vadd.s32 104, %v4904_v20  ;;  %vm820_vm8 = vcmp.eq.s32.totalorder %v5066_v36, %v4900_v18  ;;  %1200 = vmatpush.bf16.msra.mxu0 %v3716_v8  ;;  %3833 = vmatpush.bf16.msra.mxu1 %v3716_v8 }
  0xdd   : > { %6350 = vst [vmem:[#allocation49_spill] sm:$0xff] %v5069_v39  ;;  %vm840_vm4 = vcmp.eq.s32.totalorder %v5069_v39, %v4900_v18  ;;  %vm841_vm5 = vcmp.eq.s32.totalorder %v5069_v39, %v4902_v19  ;;  %vm842_vm6 = vcmp.eq.s32.totalorder %v5072_v40, %v4900_v18  ;;  %vm843_vm7 = vcmp.eq.s32.totalorder %v5072_v40, %v4902_v19 }
  0xde   : > { %6351 = vst [vmem:[#allocation50_spill] sm:$0xff] %v5072_v40  ;;  %v3477_v49 = vsel %vm842_vm6, 1.0, %v4489_v22  ;;  %v3478_v50 = vsel %vm843_vm7, 1.0, %v4489_v22  ;;  %vm821_vm9 = vcmp.eq.s32.totalorder %v5066_v36, %v4902_v19  ;;  %vm822_vm10 = vcmp.eq.s32.totalorder %v5075_v42, %v4900_v18  ;;  %3834 = vmatpush.bf16.msra.mxu3 %v3716_v8 }
  0xdf   : > { %1077 = vxpose.binary.xlu1.c.b16.cont [2/16] %v1007_v6, %v1006_v5, 128  ;;  %6352 = vst [vmem:[#allocation51_spill] sm:$0xff] %v5075_v42  ;;  %vm823_vm11 = vcmp.eq.s32.totalorder %v5075_v42, %v4902_v19  ;;  %v3455_v54 = vsel %vm820_vm8, 1.0, %v4489_v22  ;;  %v5099_v55 = vadd.s32 192, %v4904_v20  ;;  %v3456_v57 = vsel %vm821_vm9, 1.0, %v4489_v22 }
  0xe0   : > { %v3457_v58 = vsel %vm822_vm10, 1.0, %v4489_v22  ;;  %v5120_v9 = vadd.s32 112, %v4904_v20  ;;  %v5123_v10 = vadd.s32 120, %v4904_v20  ;;  %1201 = vmatpush.bf16.msra.mxu0 %v3715_v17  ;;  %v1375_v28 = vperm.slane %v759_v23, 1  ;;  %3835 = vmatpush.bf16.msra.mxu1 %v3715_v17 }
  0xe1   : > { %6353 = vst [vmem:[#allocation52_spill] sm:$0xff] %v5099_v55  ;;  %v1000_v1 = vpack.c.bf16 %v3457_v58, %v3455_v54  ;;  %vm844_vm12 = vcmp.eq.s32.totalorder %v5099_v55, %v4900_v18  ;;  %vm845_vm13 = vcmp.eq.s32.totalorder %v5099_v55, %v4902_v19  ;;  %v5140_v33 = vadd.s32 208, %v4904_v20 }
  0xe2   : > { %v3479_v4 = vsel %vm844_vm12, 1.0, %v4489_v22  ;;  %v3480_v5 = vsel %vm845_vm13, 1.0, %v4489_v22  ;;  %6355 = vst [vmem:[#allocation54_spill] sm:$0xff] %v5120_v9  ;;  %vm824_vm0 = vcmp.eq.s32.totalorder %v5120_v9, %v4900_v18  ;;  %vm825_vm1 = vcmp.eq.s32.totalorder %v5120_v9, %v4902_v19  ;;  %3836 = vmatpush.bf16.msra.mxu3 %v3715_v17 }
  0xe3   : > { %6356 = vst [vmem:[#allocation55_spill] sm:$0xff] %v5123_v10  ;;  %vm826_vm2 = vcmp.eq.s32.totalorder %v5123_v10, %v4900_v18  ;;  %vm827_vm3 = vcmp.eq.s32.totalorder %v5123_v10, %v4902_v19  ;;  %v3459_v24 = vsel %vm824_vm0, 1.0, %v4489_v22  ;;  %v3460_v25 = vsel %vm825_vm1, 1.0, %v4489_v22 }
  0xe4   : > { %v3461_v31 = vsel %vm826_vm2, 1.0, %v4489_v22  ;;  %v3462_v32 = vsel %vm827_vm3, 1.0, %v4489_v22  ;;  %6357 = vst [vmem:[#allocation56_spill] sm:$0xff] %v5140_v33  ;;  %vm848_vm6 = vcmp.eq.s32.totalorder %v5140_v33, %v4900_v18  ;;  %vm849_vm7 = vcmp.eq.s32.totalorder %v5140_v33, %v4902_v19 }
  0xe5   : > { %v5180_v8 = vadd.s32 240, %v4904_v20  ;;  %vm1458_vm2 = vcmask 1043456   ;;  %vm1409_vm3 = vcmask 64512  }
  0xe7   : > { %1054 = vxpose.binary.xlu0.c.b16.cont [3/16] %v993_v44, %v992_v43, 128  ;;  %v3475_v43 = vsel %vm840_vm4, 1.0, %v4489_v22  ;;  %v3476_v44 = vsel %vm841_vm5, 1.0, %v4489_v22  ;;  %vm1377_vm5 = vcmp.eq.s32.totalorder %v4904_v20, %v1375_v28  ;;  %6361 = vst [vmem:[#allocation60_spill] sm:$0xff] %v5180_v8 }
  0xe8   : > { %v1010_v52 = vpack.c.bf16 %v3477_v49, %v3475_v43  ;;  %v1011_v53 = vpack.c.bf16 %v3478_v50, %v3476_v44  ;;  %v3560_v41 = vsel %vm1377_vm5, 1.0, %v4489_v22  ;;  %v1002_v43 = vpack.c.bf16 %v3461_v31, %v3459_v24  ;;  %v3713_v49 = vld [vmem:[#allocation3] sm:$0xff]  ;;  %v3728_v31 = vld [vmem:[#allocation3 + $0x58] sm:$0xff] }
  0xe9   : > { %v1003_v44 = vpack.c.bf16 %v3462_v32, %v3460_v25  ;;  %v1383_v51 = vpack.c.bf16 %v3560_v41, %v3560_v41 }
  0xef   : > { %1078 = vxpose.binary.xlu1.c.b16.cont [3/16] %v1009_v27, %v1008_v26, 128  ;;  %v3714_v26 = vld [vmem:[#allocation3 + $0x48] sm:$0xff]  ;;  %v1374_v27 = vperm.slane %v759_v23, 0 }
  0xf0   : > { %1202 = vmatpush.bf16.msra.mxu0 %v3714_v26  ;;  %3837 = vmatpush.bf16.msra.mxu1 %v3714_v26 }
  0xf1   : > { %vm1376_vm4 = vcmp.eq.s32.totalorder %v4904_v20, %v1374_v27  ;;  %3838 = vmatpush.bf16.msra.mxu3 %v3714_v26 }
  0xf4   : > { %1203 = vmatpush.bf16.msra.mxu0 %v3713_v49  ;;  %3839 = vmatpush.bf16.msra.mxu1 %v3713_v49 }
  0xf5   : > { %3840 = vmatpush.bf16.msra.mxu3 %v3713_v49  ;;  %v3722_v49 = vld [vmem:[#allocation3 + $0x60] sm:$0xff] }
  0xf7   : > { %1055 = vxpose.binary.xlu0.c.b16.cont [4/16] %v995_v60, %v994_v59, 128  ;;  %v3458_v59 = vsel %vm823_vm11, 1.0, %v4489_v22  ;;  %v5105_v60 = vadd.s32 200, %v4904_v20 }
  0xf8   : > { %v1001_v2 = vpack.c.bf16 %v3458_v59, %v3456_v57  ;;  %v5162_v59 = vadd.s32 224, %v4904_v20  ;;  %1285 = vmatpush.bf16.msrb.mxu1 %v3728_v31 }
  0xf9   : > { %6354 = vst [vmem:[#allocation53_spill] sm:$0xff] %v5105_v60  ;;  %vm846_vm14 = vcmp.eq.s32.totalorder %v5105_v60, %v4900_v18  ;;  %vm847_vm15 = vcmp.eq.s32.totalorder %v5105_v60, %v4902_v19 }
  0xfa   : > { %v3481_v6 = vsel %vm846_vm14, 1.0, %v4489_v22  ;;  %v3482_v7 = vsel %vm847_vm15, 1.0, %v4489_v22  ;;  %6359 = vst [vmem:[#allocation58_spill] sm:$0xff] %v5162_v59  ;;  %vm852_vm10 = vcmp.eq.s32.totalorder %v5162_v59, %v4900_v18  ;;  %vm853_vm11 = vcmp.eq.s32.totalorder %v5162_v59, %v4902_v19 }
  0xfb   : > { %v3488_v3 = vsel %vm853_vm11, 1.0, %v4489_v22  ;;  %vm856_vm14 = vcmp.eq.s32.totalorder %v5180_v8, %v4900_v18  ;;  %vm857_vm15 = vcmp.eq.s32.totalorder %v5180_v8, %v4902_v19 }
  0xfc   : > { %v3492_v17 = vsel %vm857_vm15, 1.0, %v4489_v22 }
  0xff   : > { %1079 = vxpose.binary.xlu1.c.b16.cont [4/16] %v1011_v53, %v1010_v52, 128  ;;  %v3483_v52 = vsel %vm848_vm6, 1.0, %v4489_v22  ;;  %v3484_v53 = vsel %vm849_vm7, 1.0, %v4489_v22 }
 0x107   : > { %1056 = vxpose.binary.xlu0.c.b16.cont [5/16] %v997_v12, %v996_v11, 128  ;;  %v1012_v11 = vpack.c.bf16 %v3481_v6, %v3479_v4  ;;  %v1013_v12 = vpack.c.bf16 %v3482_v7, %v3480_v5 }
 0x10f   : > { %1080 = vxpose.binary.xlu1.c.b16.cont [5/16] %v1013_v12, %v1012_v11, 128  ;;  %v5183_v11 = vadd.s32 248, %v4904_v20  ;;  %v3491_v12 = vsel %vm856_vm14, 1.0, %v4489_v22 }
 0x111   : > { %6362 = vst [vmem:[#allocation61_spill] sm:$0xff] %v5183_v11  ;;  %vm858_vm0 = vcmp.eq.s32.totalorder %v5183_v11, %v4900_v18  ;;  %vm859_vm1 = vcmp.eq.s32.totalorder %v5183_v11, %v4902_v19 }
 0x112   : > { %v3493_v23 = vsel %vm858_vm0, 1.0, %v4489_v22  ;;  %v3494_v24 = vsel %vm859_vm1, 1.0, %v4489_v22 }
 0x113   : > { %v1018_v25 = vpack.c.bf16 %v3493_v23, %v3491_v12  ;;  %v1019_v26 = vpack.c.bf16 %v3494_v24, %v3492_v17 }
 0x117   : > { %1057 = vxpose.binary.xlu0.c.b16.cont [6/16] %v999_v35, %v998_v34, 128  ;;  %v5143_v34 = vadd.s32 216, %v4904_v20  ;;  %v3559_v35 = vsel %vm1376_vm4, 1.0, %v4489_v22 }
 0x118   : > { %v1382_v50 = vpack.c.bf16 %v3559_v35, %v3559_v35  ;;  %v3725_v35 = vld [vmem:[#allocation3 + $0x10] sm:$0xff] }
 0x119   : > { %6358 = vst [vmem:[#allocation57_spill] sm:$0xff] %v5143_v34  ;;  %vm850_vm8 = vcmp.eq.s32.totalorder %v5143_v34, %v4900_v18  ;;  %vm851_vm9 = vcmp.eq.s32.totalorder %v5143_v34, %v4902_v19 }
 0x11a   : > { %1385 = vxpose.binary.xlu2.c.b16.start.end [1/2] (short) %v1383_v51, %v1382_v50, 128  ;;  %v3485_v54 = vsel %vm850_vm8, 1.0, %v4489_v22  ;;  %v3486_v56 = vsel %vm851_vm9, 1.0, %v4489_v22  ;;  %v3721_v50 = vld [vmem:[#allocation3 + $0x70] sm:$0xff] }
 0x11b   : > { %v1014_v57 = vpack.c.bf16 %v3485_v54, %v3483_v52  ;;  %v1015_v58 = vpack.c.bf16 %v3486_v56, %v3484_v53 }
 0x11f   : > { %1081 = vxpose.binary.xlu1.c.b16.cont [6/16] %v1015_v58, %v1014_v57, 128 }
 0x127   : > { %1058 = vxpose.binary.xlu0.c.b16.cont [7/16] %v1001_v2, %v1000_v1, 128  ;;  %v5165_v1 = vadd.s32 232, %v4904_v20  ;;  %v3487_v2 = vsel %vm852_vm10, 1.0, %v4489_v22 }
 0x129   : > { %6360 = vst [vmem:[#allocation59_spill] sm:$0xff] %v5165_v1  ;;  %vm854_vm12 = vcmp.eq.s32.totalorder %v5165_v1, %v4900_v18  ;;  %vm855_vm13 = vcmp.eq.s32.totalorder %v5165_v1, %v4902_v19  ;;  %v3727_v18 = vld [vmem:[#allocation3 + $0x28] sm:$0xff]  ;;  %v3726_v19 = vld [vmem:[#allocation3 + $0x30] sm:$0xff] }
 0x12a   : > { %v3489_v4 = vsel %vm854_vm12, 1.0, %v4489_v22  ;;  %v3490_v5 = vsel %vm855_vm13, 1.0, %v4489_v22  ;;  %1286 = vmatpush.bf16.msrb.mxu1 %v3727_v18  ;;  %v3723_v22 = vld [vmem:[#allocation3 + $0x18] sm:$0xff] }
 0x12b   : > { %v1016_v6 = vpack.c.bf16 %v3489_v4, %v3487_v2  ;;  %v1017_v7 = vpack.c.bf16 %v3490_v5, %v3488_v3  ;;  %v1384_v2 = vld [vmem:[%s4817_s12] sm:$0xf] }
 0x12c   : > { %v1460_v3 = vsel %vm1458_vm2, %v1384_v2, 0 }
 0x12d   : > { %1469 = vmatpush.bf16.msrb.mxu0 %v1460_v3  ;;  %3841 = vmatpush.bf16.msra.mxu2 %v1460_v3 }
 0x12e   : > { %1287 = vmatpush.bf16.msrb.mxu1 %v3726_v19 }
 0x12f   : > { %1082 = vxpose.binary.xlu1.c.b16.cont [7/16] %v1017_v7, %v1016_v6, 128 }
 0x132   : > { %1288 = vmatpush.bf16.msrb.mxu1 %v3725_v35 }
 0x137   : > { %1059 = vxpose.binary.xlu0.c.b16.end [8/16] %v1003_v44, %v1002_v43, 128  ;;  %v3724_v43 = vld [vmem:[#allocation3 + $0x20] sm:$0xff] }
 0x138   : > { %1289 = vmatpush.bf16.msrb.mxu1 %v3724_v43 }
 0x13c   : > { %1290 = vmatpush.bf16.msrb.mxu1 %v3723_v22 }
 0x13f   : > { %1083 = vxpose.binary.xlu1.c.b16.end [8/16] %v1019_v26, %v1018_v25, 128 }
 0x140   : > { %1291 = vmatpush.bf16.msrb.mxu1 %v3722_v49 }
 0x144   : > { %1292 = vmatpush.bf16.msrb.mxu1 %v3721_v50 }
 0x173   : > { %v1060_v27 = vpop.trf.xlu0 }
 0x174   : > { %1204 = vmatmul.bf16.vlgmr.msra.gmra.mxu0 %v1060_v27 }
 0x17b   : > { %v1061_v28 = vpop.trf.xlu0  ;;  %v1084_v52 = vpop.trf.xlu1 }
 0x183   : > { %v1062_v32 = vpop.trf.xlu0  ;;  %v5197_v54 = vpop.trf.xlu1 }
 0x184   : > { %1209 = vmatmul.bf16.gmra.mxu0 %v1062_v32 }
 0x18b   : > { %v1063_v41 = vpop.trf.xlu0  ;;  %v1086_v57 = vpop.trf.xlu1 }
 0x193   : > { %v1064_v44 = vpop.trf.xlu0  ;;  %v5200_v4 = vpop.trf.xlu1 }
 0x194   : > { %1214 = vmatmul.bf16.gmra.mxu0 %v1064_v44 }
 0x19b   : > { %v1065_v51 = vpop.trf.xlu0  ;;  %v1088_v7 = vpop.trf.xlu1 }
 0x19c   : > { %1254 = vmatmul.bf16.vlgmr.msra.gmra.mxu1 %v1065_v51 }
 0x1a3   : > { %v1066_v53 = vpop.trf.xlu0  ;;  %v5202_v17 = vpop.trf.xlu1 }
 0x1a4   : > { %1219 = vmatmul.bf16.gmra.mxu0 %v1066_v53 }
 0x1ab   : > { %v1067_v56 = vpop.trf.xlu0  ;;  %v1090_v24 = vpop.trf.xlu1 }
 0x1ac   : > { %1259 = vmatmul.bf16.gmra.mxu1 %v1067_v56 }
 0x1b3   : > { %v1068_v58 = vpop.trf.xlu0  ;;  %v5204_v26 = vpop.trf.xlu1 }
 0x1b4   : > { %1224 = vmatmul.bf16.gmra.mxu0 %v1068_v58 }
 0x1bb   : > { %v1069_v5 = vpop.trf.xlu0  ;;  %v1092_v31 = vpop.trf.xlu1 }
 0x1bc   : > { %1293 = vmatmul.bf16.vlgmr.msrb.gmra.mxu1 %v1084_v52  ;;  %1264 = vmatmul.bf16.vlgmr.msra.gmra.mxu3 %v1069_v5  ;;  %v1393_v32 = vpop.trf.xlu2 }
 0x1c3   : > { %v1070_v6 = vpop.trf.xlu0  ;;  %v5208_v19 = vpop.trf.xlu1 }
 0x1c4   : > { %1229 = vmatmul.bf16.gmra.mxu0 %v1070_v6  ;;  %v5212_v43 = vpop.trf.xlu2 }
 0x1cb   : > { %v1071_v12 = vpop.trf.xlu0  ;;  %v1094_v22 = vpop.trf.xlu1 }
 0x1cc   : > { %1298 = vmatmul.bf16.gmra.mxu1 %v1086_v57  ;;  %1269 = vmatmul.bf16.gmra.mxu3 %v1071_v12  ;;  %v1395_v49 = vpop.trf.xlu2 }
 0x1d3   : > { %v1072_v23 = vpop.trf.xlu0  ;;  %v5220_v52 = vpop.trf.xlu1 }
 0x1d4   : > { %1234 = vmatmul.bf16.gmra.mxu0 %v1072_v23  ;;  %v5218_v51 = vpop.trf.xlu2 }
 0x1db   : > { %v1073_v25 = vpop.trf.xlu0  ;;  %v1096_v56 = vpop.trf.xlu1 }
 0x1dc   : > { %1303 = vmatmul.bf16.gmra.mxu1 %v1088_v7  ;;  %1274 = vmatmul.bf16.gmra.mxu3 %v1073_v25  ;;  %v1397_v53 = vpop.trf.xlu2 }
 0x1e3   : > { %v1074_v27 = vpop.trf.xlu0 }
 0x1e4   : > { %1239 = vmatmul.bf16.gmra.mxu0 %v1074_v27  ;;  %v1398_v2 = vpop.trf.xlu2 }
 0x1e5   : > { %3571 = vmatmul.msk.bf16.vlgmr.msra.gmra.mxu2 %vm1409_vm3, %v1398_v2 }
 0x1ec   : > { %1308 = vmatmul.bf16.gmra.mxu1 %v1090_v24  ;;  %v1399_v6 = vpop.trf.xlu2 }
 0x1f1   : > { %v5206_v18 = vpop.f32.mrf.mxu0 }
 0x1f4   : > { %1244 = vmatmul.bf16.gmra.mxu0 %v1061_v28  ;;  %v1400_v24 = vpop.trf.xlu2 }
 0x1f5   : > { %3572 = vmatmul.msk.bf16.gmra.mxu2 %vm1409_vm3, %v1400_v24 }
 0x1f9   : > { %v5210_v35 = vpop.f32.mrf.mxu0 }
 0x1fc   : > { %1313 = vmatmul.bf16.gmra.mxu1 %v1092_v31  ;;  %v1401_v31 = vpop.trf.xlu2 }
 0x201   : > { %v5214_v44 = vpop.f32.mrf.mxu0 }
 0x204   : > { %1249 = vmatmul.bf16.gmra.mxu0 %v1063_v41  ;;  %v5230_v41 = vpop.trf.xlu1 }
 0x209   : > { %v5216_v50 = vpop.f32.mrf.mxu0 }
 0x20c   : > { %1318 = vmatmul.bf16.gmra.mxu1 %v1094_v22  ;;  %v1098_v7 = vpop.trf.xlu1 }
 0x211   : > { %v5222_v28 = vpop.f32.mrf.mxu0 }
 0x214   : > { %3561 = vmatmul.msk.bf16.vlgmr.msrb.gmra.mxu0 %vm1409_vm3, %v1393_v32 }
 0x219   : > { %v5225_v57 = vpop.f32.mrf.mxu0  ;;  %v5227_v58 = vpop.f32.mrf.mxu1 }
 0x21c   : > { %1323 = vmatmul.bf16.gmra.mxu1 %v1096_v56 }
 0x221   : > { %v5232_v3 = vpop.f32.mrf.mxu0  ;;  %v5234_v5 = vpop.f32.mrf.mxu1 }
 0x224   : > { %3562 = vmatmul.msk.bf16.gmra.mxu0 %vm1409_vm3, %v1395_v49  ;;  %v1402_v49 = vpop.trf.xlu2 }
 0x225   : > { %3573 = vmatmul.msk.bf16.gmra.mxu2 %vm1409_vm3, %v1402_v49 }
 0x229   : > { %v5237_v12 = vpop.f32.mrf.mxu0  ;;  %v5239_v23 = vpop.f32.mrf.mxu1 }
 0x22c   : > { %1328 = vmatmul.bf16.gmra.mxu1 %v1098_v7  ;;  %v1403_v24 = vpop.trf.xlu2 }
 0x231   : > { %v5242_v25 = vpop.f32.mrf.mxu0  ;;  %v5244_v27 = vpop.f32.mrf.mxu1 }
 0x234   : > { %3563 = vmatmul.msk.bf16.gmra.mxu0 %vm1409_vm3, %v1397_v53  ;;  %v1404_v8 = vpop.trf.xlu2 }
 0x235   : > { %3574 = vmatmul.msk.bf16.gmra.mxu2 %vm1409_vm3, %v1404_v8 }
 0x239   : > { %v5247_v32 = vpop.f32.mrf.mxu0  ;;  %v1294_v22 = vpop.f32.mrf.mxu1 }
 0x23c   : > { %1333 = vmatmul.bf16.gmra.mxu1 %v5197_v54  ;;  %v1405_v49 = vpop.trf.xlu2 }
 0x241   : > { %v5251_v56 = vpop.f32.mrf.mxu0  ;;  %v1296_v2 = vpop.f32.mrf.mxu1 }
 0x244   : > { %3564 = vmatmul.msk.bf16.gmra.mxu0 %vm1409_vm3, %v1399_v6  ;;  %v1406_v34 = vpop.trf.xlu2 }
 0x245   : > { %3575 = vmatmul.msk.bf16.gmra.mxu2 %vm1409_vm3, %v1406_v34 }
 0x249   : > { %v5254_v7 = vpop.f32.mrf.mxu0  ;;  %v1299_v11 = vpop.f32.mrf.mxu1 }
 0x24c   : > { %1338 = vmatmul.bf16.gmra.mxu1 %v5200_v4  ;;  %v1407_v55 = vpop.trf.xlu2 }
 0x251   : > { %v5258_v53 = vpop.f32.mrf.mxu0  ;;  %v1301_v1 = vpop.f32.mrf.mxu1 }
 0x254   : > { %3565 = vmatmul.msk.bf16.gmra.mxu0 %vm1409_vm3, %v1401_v31  ;;  %v1408_v39 = vpop.trf.xlu2 }
 0x255   : > { %3576 = vmatmul.msk.bf16.gmra.mxu2 %vm1409_vm3, %v1408_v39  ;;  %v1297_v39 = vadd.f32 %v1296_v2, %v5210_v35  ;;  %v1302_v35 = vadd.f32 %v1301_v1, %v5216_v50 }
 0x259   : > { %v5261_v54 = vpop.f32.mrf.mxu0  ;;  %v1304_v59 = vpop.f32.mrf.mxu1 }
 0x25c   : > { %1343 = vmatmul.bf16.gmra.mxu1 %v5202_v17  ;;  %v1075_v17 = vpop.trf.xlu0 }
 0x25d   : > { %1279 = vmatmul.bf16.gmra.mxu3 %v1075_v17 }
 0x261   : > { %v5265_v6 = vpop.f32.mrf.mxu0  ;;  %v1306_v33 = vpop.f32.mrf.mxu1 }
 0x264   : > { %3566 = vmatmul.msk.bf16.gmra.mxu0 %vm1409_vm3, %v1403_v24 }
 0x269   : > { %v5268_v8 = vpop.f32.mrf.mxu0  ;;  %v1309_v4 = vpop.f32.mrf.mxu1 }
 0x26c   : > { %1348 = vmatmul.bf16.gmra.mxu1 %v5204_v26 }
 0x271   : > { %v5271_v60 = vpop.f32.mrf.mxu0  ;;  %v1311_v31 = vpop.f32.mrf.mxu1 }
 0x274   : > { %3567 = vmatmul.msk.bf16.gmra.mxu0 %vm1409_vm3, %v1405_v49  ;;  %v1295_v49 = vadd.f32 %v1294_v22, %v5206_v18  ;;  %v1300_v18 = vadd.f32 %v1299_v11, %v5214_v44  ;;  %v1305_v44 = vadd.f32 %v1304_v59, %v5222_v28  ;;  %v1521_v11 = vpop.f32.mrf.mxu2 }
 0x279   : > { %v5274_v40 = vpop.f32.mrf.mxu0  ;;  %v1314_v34 = vpop.f32.mrf.mxu1 }
 0x27c   : > { %1353 = vmatmul.bf16.gmra.mxu1 %v5208_v19 }
 0x281   : > { %v5278_v24 = vpop.f32.mrf.mxu0  ;;  %v1316_v14 = vpop.f32.mrf.mxu1 }
 0x284   : > { %3568 = vmatmul.msk.bf16.gmra.mxu0 %vm1409_vm3, %v1407_v55 }
 0x289   : > { %v5281_v26 = vpop.f32.mrf.mxu0  ;;  %v5283_v13 = vpop.f32.mrf.mxu1 }
 0x28c   : > { %1358 = vmatmul.bf16.gmra.mxu1 %v5220_v52 }
 0x291   : > { %v1321_v62 = vpop.f32.mrf.mxu1  ;;  %v1471_v19 = vpop.f32.mrf.mxu0 }
 0x292   : > { %v5287_v61 = vmul.f32 %v1471_v19, %v1295_v49 }
 0x294   : > { %3569 = vmatmul.msk.bf16.gmra.mxu0 %vm1409_vm3, %v5212_v43  ;;  %v1099_v43 = vpop.trf.xlu1 }
 0x299   : > { %v5292_v17 = vpop.f32.mrf.mxu1  ;;  %v1473_v55 = vpop.f32.mrf.mxu0 }
 0x29a   : > { %v5294_v46 = vmul.f32 %v1473_v55, %v1297_v39 }
 0x29c   : > { %1363 = vmatmul.bf16.gmra.mxu1 %v5230_v41 }
 0x2a1   : > { %v5300_v22 = vpop.f32.mrf.mxu1  ;;  %v1476_v49 = vpop.f32.mrf.mxu0 }
 0x2a2   : > { %v5302_v19 = vmul.f32 %v1476_v49, %v1300_v18 }
 0x2a4   : > { %3570 = vmatmul.msk.bf16.gmra.mxu0 %vm1409_vm3, %v5218_v51  ;;  %v1307_v51 = vadd.f32 %v1306_v33, %v5225_v57 }
 0x2a9   : > { %v5307_v2 = vpop.f32.mrf.mxu1  ;;  %v1478_v39 = vpop.f32.mrf.mxu0 }
 0x2aa   : > { %v5309_v41 = vmul.f32 %v1478_v39, %v1302_v35  ;;  %v1315_v35 = vadd.f32 %v1314_v34, %v5242_v25 }
 0x2ac   : > { %1368 = vmatmul.bf16.gmra.mxu1 %v1099_v43  ;;  %v1310_v43 = vadd.f32 %v1309_v4, %v5232_v3 }
 0x2b1   : > { %v5314_v55 = vpop.f32.mrf.mxu1  ;;  %v1481_v18 = vpop.f32.mrf.mxu0 }
 0x2b2   : > { %v5316_v49 = vmul.f32 %v1481_v18, %v1305_v44  ;;  %v1312_v44 = vadd.f32 %v1311_v31, %v5237_v12 }
 0x2b9   : > { %v5319_v1 = vpop.f32.mrf.mxu1  ;;  %v1483_v50 = vpop.f32.mrf.mxu0 }
 0x2ba   : > { %v5321_v52 = vmul.f32 %v1483_v50, %v1307_v51  ;;  %v1523_v50 = vpop.f32.mrf.mxu2 }
 0x2c1   : > { %v5326_v39 = vpop.f32.mrf.mxu1  ;;  %v1486_v59 = vpop.f32.mrf.mxu0 }
 0x2c2   : > { %v5328_v28 = vmul.f32 %v1486_v59, %v1310_v43  ;;  %v1317_v43 = vadd.f32 %v1316_v14, %v5247_v32  ;;  %v1526_v59 = vpop.f32.mrf.mxu2  ;;  %v1320_v32 = vadd.f32 %v5283_v13, %v5251_v56  ;;  %v1327_v56 = vadd.f32 %v5300_v22, %v5261_v54 }
 0x2c3   : > { %v1332_v54 = vadd.f32 %v5314_v55, %v5268_v8  ;;  %v1337_v8 = vadd.f32 %v5326_v39, %v5274_v40  ;;  %v6364_v40 = vpack.c.bf16 %v5321_v52, %v5316_v49  ;;  %v6365_v39 = vpack.c.bf16 %v5309_v41, %v5302_v19  ;;  %v760_v49 = vld [vmem:[%s509_s11] sm:$0x3] }
 0x2c4   : > { %v6366_v52 = vpack.c.bf16 %v5294_v46, %v5287_v61  ;;  %v5411_v19 = vperm.slane %v760_v49, 0 }
 0x2c6   : > { %vm1585_vm4 = vcmp.eq.s32.totalorder %v4904_v20, %v5411_v19  ;;  %vm1587_vm5 = vcmp.eq.s32.totalorder %v4907_v21, %v5411_v19  ;;  %vm1589_vm7 = vcmp.eq.s32.totalorder %v4922_v29, %v5411_v19  ;;  %vm1591_vm8 = vcmp.eq.s32.totalorder %v4925_v30, %v5411_v19 }
 0x2c7   : > { %vm3641_vm6 = vmpackc.low %vm1587_vm5, %vm1585_vm4  ;;  %vm1593_vm10 = vcmp.eq.s32.totalorder %v4940_v37, %v5411_v19  ;;  %vm1595_vm11 = vcmp.eq.s32.totalorder %v4943_v38, %v5411_v19  ;;  %vm1597_vm0 = vcmp.eq.s32.totalorder %v4964_v47, %v5411_v19  ;;  %vm1599_vm1 = vcmp.eq.s32.totalorder %v4967_v48, %v5411_v19 }
 0x2c8   : > { %vm3643_vm9 = vmpackc.low %vm1591_vm8, %vm1589_vm7  ;;  %vm1603_vm7 = vcmp.eq.s32.totalorder %v5003_v0, %v5411_v19 }
 0x2c9   : > { %v5331_v18 = vpop.f32.mrf.mxu1  ;;  %v1488_v33 = vpop.f32.mrf.mxu0  ;;  %vm3645_vm12 = vmpackc.low %vm1595_vm11, %vm1593_vm10 }
 0x2ca   : > { %v5333_v57 = vmul.f32 %v1488_v33, %v1312_v44  ;;  %v1528_v34 = vpop.f32.mrf.mxu2  ;;  %vm3647_vm2 = vmpackc.low %vm1599_vm1, %vm1597_vm0 }
 0x2d1   : > { %v5338_v3 = vpop.f32.mrf.mxu1  ;;  %v1491_v4 = vpop.f32.mrf.mxu0 }
 0x2d2   : > { %v5340_v45 = vmul.f32 %v1491_v4, %v1315_v35 }
 0x2d9   : > { %v1344_v12 = vpop.f32.mrf.mxu1  ;;  %v1493_v31 = vpop.f32.mrf.mxu0 }
 0x2da   : > { %v1345_v10 = vadd.f32 %v1344_v12, %v5227_v58  ;;  %v1560_v44 = vmul.f32 %v1493_v31, %v1317_v43  ;;  %v1322_v58 = vadd.f32 %v1321_v62, %v5254_v7  ;;  %v1265_v43 = vpop.f32.mrf.mxu3 }
 0x2dc   : > { %v5344_v33 = vmul.f32 %v1521_v11, %v1345_v10  ;;  %v1845_v51 = vpack.c.bf16 %v1560_v44, %v5340_v45 }
 0x2e1   : > { %v1346_v9 = vpop.f32.mrf.mxu1  ;;  %v1496_v42 = vpop.f32.mrf.mxu0 }
 0x2e2   : > { %v1347_v25 = vadd.f32 %v1346_v9, %v5234_v5  ;;  %v1561_v11 = vmul.f32 %v1496_v42, %v1320_v32  ;;  %v1531_v9 = vpop.f32.mrf.mxu2  ;;  %v5361_v13 = vpop.f32.mrf.mxu3 }
 0x2e4   : > { %v5348_v36 = vmul.f32 %v1523_v50, %v1347_v25 }
 0x2e6   : > { %v1851_v14 = vpack.c.bf16 %v5348_v36, %v5344_v33  ;;  %v6375_v36 = vld [vmem:[#allocation46_spill] sm:$0xff]  ;;  %v6376_v33 = vld [vmem:[#allocation47_spill] sm:$0xff] }
 0x2e9   : > { %v1349_v35 = vpop.f32.mrf.mxu1  ;;  %v1498_v10 = vpop.f32.mrf.mxu0 }
 0x2ea   : > { %v1350_v45 = vadd.f32 %v1349_v35, %v5239_v23  ;;  %v1562_v4 = vmul.f32 %v1498_v10, %v1322_v58  ;;  %v5363_v62 = vpop.f32.mrf.mxu2  ;;  %v1325_v23 = vadd.f32 %v5292_v17, %v5258_v53  ;;  %v5373_v10 = vpop.f32.mrf.mxu3  ;;  %v1330_v53 = vadd.f32 %v5307_v2, %v5265_v6 }
 0x2eb   : > { %v1335_v6 = vadd.f32 %v5319_v1, %v5271_v60 }
 0x2ec   : > { %v5356_v12 = vmul.f32 %v1526_v59, %v1350_v45  ;;  %v1846_v5 = vpack.c.bf16 %v1562_v4, %v1561_v11 }
 0x2f1   : > { %v1351_v50 = vpop.f32.mrf.mxu1  ;;  %v1501_v31 = vpop.f32.mrf.mxu0 }
 0x2f2   : > { %v1352_v44 = vadd.f32 %v1351_v50, %v5244_v27  ;;  %v1563_v32 = vmul.f32 %v1501_v31, %v1325_v23  ;;  %v5375_v11 = vpop.f32.mrf.mxu2  ;;  %v1272_v31 = vpop.f32.mrf.mxu3 }
 0x2f4   : > { %v5359_v25 = vmul.f32 %v1528_v34, %v1352_v44 }
 0x2f6   : > { %v1852_v42 = vpack.c.bf16 %v5359_v25, %v5356_v12  ;;  %v1809_v12 = vld [vmem:[#allocation2 + $0xb0] sm:$0xff] }
 0x2f9   : > { %v1354_v7 = vpop.f32.mrf.mxu1  ;;  %v1503_v59 = vpop.f32.mrf.mxu0 }
 0x2fa   : > { %v1355_v58 = vadd.f32 %v1354_v7, %v1265_v43  ;;  %v1564_v27 = vmul.f32 %v1503_v59, %v1327_v56  ;;  %v1275_v59 = vpop.f32.mrf.mxu3 }
 0x2fc   : > { %v5371_v34 = vmul.f32 %v1531_v9, %v1355_v58  ;;  %v1847_v35 = vpack.c.bf16 %v1564_v27, %v1563_v32  ;;  %v1538_v9 = vpop.f32.mrf.mxu2 }
 0x301   : > { %v5377_v45 = vpop.f32.mrf.mxu1  ;;  %v1506_v4 = vpop.f32.mrf.mxu0 }
 0x302   : > { %v1565_v43 = vmul.f32 %v1506_v4, %v1330_v53  ;;  %v1277_v60 = vpop.f32.mrf.mxu3  ;;  %v1340_v53 = vadd.f32 %v5331_v18, %v5278_v24  ;;  %v4490_v24 = vmov 1.0|1.0  }
 0x304   : > { %v1541_v7 = vpop.f32.mrf.mxu2 }
 0x309   : > { %v1359_v17 = vpop.f32.mrf.mxu1  ;;  %v1508_v22 = vpop.f32.mrf.mxu0 }
 0x30a   : > { %v1566_v50 = vmul.f32 %v1508_v22, %v1332_v54 }
 0x30c   : > { %v1848_v44 = vpack.c.bf16 %v1566_v50, %v1565_v43 }
 0x30e   : > { %1857 = vmatpush.bf16.msrb.mxu3 %v1848_v44 }
 0x311   : > { %v1361_v23 = vpop.f32.mrf.mxu1  ;;  %v1511_v56 = vpop.f32.mrf.mxu0 }
 0x312   : > { %1858 = vmatpush.bf16.msrb.mxu3 %v1847_v35  ;;  %v5387_v32 = vmul.f32 %v1511_v56, %v1335_v6  ;;  %v1543_v35 = vpop.f32.mrf.mxu2 }
 0x316   : > { %1859 = vmatpush.bf16.msrb.mxu3 %v1846_v5  ;;  %v6363_v5 = vpack.c.bf16 %v5333_v57, %v5328_v28  ;;  %v1342_v28 = vadd.f32 %v5338_v3, %v5281_v26 }
 0x319   : > { %v1364_v2 = vpop.f32.mrf.mxu1  ;;  %v1513_v55 = vpop.f32.mrf.mxu0 }
 0x31a   : > { %v5389_v58 = vmul.f32 %v1513_v55, %v1337_v8  ;;  %1860 = vmatpush.bf16.msrb.mxu3 %v1845_v51  ;;  %v1280_v51 = vpop.f32.mrf.mxu3  ;;  %v1546_v57 = vpop.f32.mrf.mxu2  ;;  %v1365_v56 = vadd.f32 %v1364_v2, %v1275_v59  ;;  %v1362_v55 = vadd.f32 %v1361_v23, %v1272_v31 }
 0x31c   : > { %v1849_v27 = vpack.c.bf16 %v5389_v58, %v5387_v32 }
 0x31e   : > { %1861 = vmatpush.bf16.msrb.mxu3 %v6363_v5 }
 0x321   : > { %v1366_v1 = vpop.f32.mrf.mxu1  ;;  %v1516_v4 = vpop.f32.mrf.mxu0 }
 0x322   : > { %1862 = vmatpush.bf16.msrb.mxu3 %v6364_v40  ;;  %v1569_v43 = vmul.f32 %v1516_v4, %v1340_v53  ;;  %v1282_v18 = vpop.f32.mrf.mxu3  ;;  %v1367_v46 = vadd.f32 %v1366_v1, %v1277_v60  ;;  %v1548_v44 = vpop.f32.mrf.mxu2  ;;  %v1360_v40 = vadd.f32 %v1359_v17, %v5373_v10  ;;  %v1357_v60 = vadd.f32 %v5377_v45, %v5361_v13  ;;  %v6378_v45 = vld [vmem:[#allocation50_spill] sm:$0xff] }
 0x323   : > { %v1578_v1 = vmul.f32 %v1538_v9, %v1362_v55  ;;  %v5439_v13 = vperm.slane %v760_v49, 1  ;;  %v1810_v9 = vld [vmem:[#allocation2] sm:$0xff] }
 0x324   : > { %v1580_v5 = vmul.f32 %v1543_v35, %v1367_v46  ;;  %v1577_v2 = vmul.f32 %v5375_v11, %v1360_v40  ;;  %v1576_v31 = vmul.f32 %v5363_v62, %v1357_v60  ;;  %v6377_v11 = vld [vmem:[#allocation49_spill] sm:$0xff] }
 0x325   : > { %vm1586_vm13 = vcmp.eq.s32.totalorder %v4904_v20, %v5439_v13  ;;  %vm1588_vm14 = vcmp.eq.s32.totalorder %v4907_v21, %v5439_v13  ;;  %vm1590_vm3 = vcmp.eq.s32.totalorder %v4922_v29, %v5439_v13  ;;  %vm1592_vm4 = vcmp.eq.s32.totalorder %v4925_v30, %v5439_v13  ;;  %v6367_v20 = vld [vmem:[#allocation48_spill] sm:$0xff]  ;;  %v6368_v21 = vld [vmem:[#allocation51_spill] sm:$0xff]  ;;  %v6369_v29 = vld [vmem:[#allocation54_spill] sm:$0xff] }
 0x326   : > { %1863 = vmatpush.bf16.msrb.mxu3 %v6365_v39  ;;  %v1579_v39 = vmul.f32 %v1541_v7, %v1365_v56  ;;  %v1854_v10 = vpack.c.bf16 %v1578_v1, %v1577_v2  ;;  %v1853_v17 = vpack.c.bf16 %v1576_v31, %v5371_v34  ;;  %vm3673_vm15 = vmpackc.low %vm1588_vm14, %vm1586_vm13  ;;  %vm1596_vm10 = vcmp.eq.s32.totalorder %v4943_v38, %v5439_v13  ;;  %v6370_v30 = vld [vmem:[#allocation55_spill] sm:$0xff]  ;;  %v1814_v56 = vld [vmem:[#allocation2 + $0x68] sm:$0xff] }
 0x327   : > { %vm3675_vm5 = vmpackc.low %vm1592_vm4, %vm1590_vm3  ;;  %vm1607_vm13 = vcmp.eq.s32.totalorder %v5039_v16, %v5411_v19  ;;  %vm1600_vm0 = vcmp.eq.s32.totalorder %v4967_v48, %v5439_v13  ;;  %vm1611_vm3 = vcmp.eq.s32.totalorder %v6368_v21, %v5411_v19  ;;  %v6372_v38 = vld [vmem:[#allocation43_spill] sm:$0xff]  ;;  %v1816_v31 = vld [vmem:[#allocation2 + $0x48] sm:$0xff] }
 0x328   : > { %v1855_v59 = vpack.c.bf16 %v1580_v5, %v1579_v39  ;;  %v6384_v2 = vld [vmem:[#allocation59_spill] sm:$0xff] }
 0x329   : > { %v1369_v54 = vpop.f32.mrf.mxu1  ;;  %v1518_v22 = vpop.f32.mrf.mxu0 }
 0x32a   : > { %v1570_v50 = vmul.f32 %v1518_v22, %v1342_v28  ;;  %1864 = vmatpush.bf16.msrb.mxu3 %v6366_v52  ;;  %v1370_v26 = vadd.f32 %v1369_v54, %v1280_v51  ;;  %v6380_v54 = vld [vmem:[#allocation53_spill] sm:$0xff]  ;;  %v1812_v22 = vld [vmem:[#allocation2 + $0x18] sm:$0xff] }
 0x32c   : > { %v1850_v41 = vpack.c.bf16 %v1570_v50, %v1569_v43  ;;  %v1581_v6 = vmul.f32 %v1546_v57, %v1370_v26  ;;  %v6379_v57 = vld [vmem:[#allocation52_spill] sm:$0xff] }
 0x32d   : > { %3642 = vmatmul.msk.bf16.vlgmr.msrb.gmra.mxu3 %vm3641_vm6, %v4490_v24  ;;  %vm1601_vm6 = vcmp.eq.s32.totalorder %v5000_v63, %v5411_v19 }
 0x32e   : > { %vm3649_vm8 = vmpackc.low %vm1603_vm7, %vm1601_vm6  ;;  %vm1604_vm6 = vcmp.eq.s32.totalorder %v5003_v0, %v5439_v13  ;;  %v6374_v0 = vld [vmem:[#allocation45_spill] sm:$0xff] }
 0x331   : > { %v1371_v3 = vpop.f32.mrf.mxu1 }
 0x332   : > { %v1372_v61 = vadd.f32 %v1371_v3, %v1282_v18 }
 0x334   : > { %v1582_v8 = vmul.f32 %v1548_v44, %v1372_v61  ;;  %v6381_v61 = vld [vmem:[#allocation56_spill] sm:$0xff]  ;;  %v6382_v44 = vld [vmem:[#allocation57_spill] sm:$0xff] }
 0x336   : > { %v1856_v4 = vpack.c.bf16 %v1582_v8, %v1581_v6 }
 0x338   : > { %1946 = vmatpush.bf16.msrb.mxu2 %v1856_v4  ;;  %v1815_v4 = vld [vmem:[#allocation2 + $0x30] sm:$0xff] }
 0x33c   : > { %1947 = vmatpush.bf16.msrb.mxu2 %v1855_v59  ;;  %v6383_v59 = vld [vmem:[#allocation58_spill] sm:$0xff] }
 0x33d   : > { %3644 = vmatmul.msk.bf16.gmra.mxu3 %vm3643_vm9, %v4490_v24  ;;  %vm1594_vm9 = vcmp.eq.s32.totalorder %v4940_v37, %v5439_v13  ;;  %v6371_v37 = vld [vmem:[#allocation42_spill] sm:$0xff] }
 0x33e   : > { %vm3677_vm11 = vmpackc.low %vm1596_vm10, %vm1594_vm9  ;;  %vm1615_vm9 = vcmp.eq.s32.totalorder %v6370_v30, %v5411_v19 }
 0x340   : > { %1948 = vmatpush.bf16.msrb.mxu2 %v1854_v10 }
 0x344   : > { %1949 = vmatpush.bf16.msrb.mxu2 %v1853_v17 }
 0x348   : > { %1950 = vmatpush.bf16.msrb.mxu2 %v1852_v42 }
 0x34c   : > { %1951 = vmatpush.bf16.msrb.mxu2 %v1851_v14 }
 0x34d   : > { %3646 = vmatmul.msk.bf16.gmra.mxu3 %vm3645_vm12, %v4490_v24  ;;  %vm1605_vm12 = vcmp.eq.s32.totalorder %v5036_v15, %v5411_v19 }
 0x34e   : > { %vm3651_vm14 = vmpackc.low %vm1607_vm13, %vm1605_vm12  ;;  %vm1608_vm12 = vcmp.eq.s32.totalorder %v5039_v16, %v5439_v13 }
 0x350   : > { %1952 = vmatpush.bf16.msrb.mxu2 %v1850_v41  ;;  %v1813_v41 = vld [vmem:[#allocation2 + $0x50] sm:$0xff] }
 0x354   : > { %1953 = vmatpush.bf16.msrb.mxu2 %v1849_v27  ;;  %v1811_v27 = vld [vmem:[#allocation2 + $0xd8] sm:$0xff] }
 0x357   : > { %3674 = vmatmul.msk.bf16.vlgmr.msrb.gmra.mxu2 %vm3673_vm15, %v4490_v24  ;;  %vm1598_vm15 = vcmp.eq.s32.totalorder %v4964_v47, %v5439_v13 }
 0x358   : > { %vm3679_vm1 = vmpackc.low %vm1600_vm0, %vm1598_vm15  ;;  %vm1619_vm15 = vcmp.eq.s32.totalorder %v6372_v38, %v5411_v19 }
 0x35d   : > { %3648 = vmatmul.msk.bf16.gmra.mxu3 %vm3647_vm2, %v4490_v24  ;;  %vm1609_vm2 = vcmp.eq.s32.totalorder %v6367_v20, %v5411_v19 }
 0x35e   : > { %vm3653_vm4 = vmpackc.low %vm1611_vm3, %vm1609_vm2  ;;  %vm1612_vm2 = vcmp.eq.s32.totalorder %v6368_v21, %v5439_v13 }
 0x367   : > { %3676 = vmatmul.msk.bf16.gmra.mxu2 %vm3675_vm5, %v4490_v24  ;;  %vm1602_vm5 = vcmp.eq.s32.totalorder %v5000_v63, %v5439_v13  ;;  %v6373_v63 = vld [vmem:[#allocation44_spill] sm:$0xff] }
 0x368   : > { %vm3681_vm7 = vmpackc.low %vm1604_vm6, %vm1602_vm5  ;;  %vm1623_vm5 = vcmp.eq.s32.totalorder %v6374_v0, %v5411_v19 }
 0x36d   : > { %3650 = vmatmul.msk.bf16.gmra.mxu3 %vm3649_vm8, %v4490_v24  ;;  %vm1613_vm8 = vcmp.eq.s32.totalorder %v6369_v29, %v5411_v19 }
 0x36e   : > { %vm3655_vm10 = vmpackc.low %vm1615_vm9, %vm1613_vm8  ;;  %vm1616_vm8 = vcmp.eq.s32.totalorder %v6370_v30, %v5439_v13 }
 0x377   : > { %3678 = vmatmul.msk.bf16.gmra.mxu2 %vm3677_vm11, %v4490_v24  ;;  %vm1606_vm11 = vcmp.eq.s32.totalorder %v5036_v15, %v5439_v13 }
 0x378   : > { %vm3683_vm13 = vmpackc.low %vm1608_vm12, %vm1606_vm11  ;;  %vm1627_vm11 = vcmp.eq.s32.totalorder %v6376_v33, %v5411_v19 }
 0x37d   : > { %3652 = vmatmul.msk.bf16.gmra.mxu3 %vm3651_vm14, %v4490_v24  ;;  %vm1617_vm14 = vcmp.eq.s32.totalorder %v6371_v37, %v5411_v19 }
 0x37e   : > { %vm3657_vm0 = vmpackc.low %vm1619_vm15, %vm1617_vm14  ;;  %vm1620_vm14 = vcmp.eq.s32.totalorder %v6372_v38, %v5439_v13 }
 0x387   : > { %3680 = vmatmul.msk.bf16.gmra.mxu2 %vm3679_vm1, %v4490_v24  ;;  %vm1610_vm1 = vcmp.eq.s32.totalorder %v6367_v20, %v5439_v13 }
 0x388   : > { %vm3685_vm3 = vmpackc.low %vm1612_vm2, %vm1610_vm1  ;;  %vm1631_vm1 = vcmp.eq.s32.totalorder %v6378_v45, %v5411_v19 }
 0x38d   : > { %3654 = vmatmul.msk.bf16.gmra.mxu3 %vm3653_vm4, %v4490_v24  ;;  %vm1621_vm4 = vcmp.eq.s32.totalorder %v6373_v63, %v5411_v19 }
 0x38e   : > { %vm3659_vm6 = vmpackc.low %vm1623_vm5, %vm1621_vm4  ;;  %vm1624_vm4 = vcmp.eq.s32.totalorder %v6374_v0, %v5439_v13  ;;  %v1818_v0 = vld [vmem:[#allocation2 + $0x88] sm:$0xff] }
 0x397   : > { %3682 = vmatmul.msk.bf16.gmra.mxu2 %vm3681_vm7, %v4490_v24  ;;  %vm1614_vm7 = vcmp.eq.s32.totalorder %v6369_v29, %v5439_v13  ;;  %v1817_v29 = vld [vmem:[#allocation2 + $0x80] sm:$0xff] }
 0x398   : > { %vm3687_vm9 = vmpackc.low %vm1616_vm8, %vm1614_vm7  ;;  %vm1635_vm7 = vcmp.eq.s32.totalorder %v6380_v54, %v5411_v19 }
 0x39d   : > { %3656 = vmatmul.msk.bf16.gmra.mxu3 %vm3655_vm10, %v4490_v24  ;;  %vm1625_vm10 = vcmp.eq.s32.totalorder %v6375_v36, %v5411_v19 }
 0x39e   : > { %vm3661_vm12 = vmpackc.low %vm1627_vm11, %vm1625_vm10  ;;  %vm1628_vm10 = vcmp.eq.s32.totalorder %v6376_v33, %v5439_v13  ;;  %v1819_v33 = vld [vmem:[#allocation2 + $0xe8] sm:$0xff] }
 0x3a7   : > { %3684 = vmatmul.msk.bf16.gmra.mxu2 %vm3683_vm13, %v4490_v24  ;;  %vm1618_vm13 = vcmp.eq.s32.totalorder %v6371_v37, %v5439_v13 }
 0x3a8   : > { %vm3689_vm15 = vmpackc.low %vm1620_vm14, %vm1618_vm13  ;;  %vm1639_vm13 = vcmp.eq.s32.totalorder %v6382_v44, %v5411_v19 }
 0x3ad   : > { %3658 = vmatmul.msk.bf16.gmra.mxu3 %vm3657_vm0, %v4490_v24  ;;  %vm1629_vm0 = vcmp.eq.s32.totalorder %v6377_v11, %v5411_v19 }
 0x3ae   : > { %vm3663_vm2 = vmpackc.low %vm1631_vm1, %vm1629_vm0  ;;  %vm1632_vm0 = vcmp.eq.s32.totalorder %v6378_v45, %v5439_v13 }
 0x3b0   : > { %v1866_v47 = vpop.f32.mrf.mxu3 }
 0x3b7   : > { %3686 = vmatmul.msk.bf16.gmra.mxu2 %vm3685_vm3, %v4490_v24  ;;  %vm1622_vm3 = vcmp.eq.s32.totalorder %v6373_v63, %v5439_v13 }
 0x3b8   : > { %v1868_v48 = vpop.f32.mrf.mxu3  ;;  %vm3691_vm5 = vmpackc.low %vm1624_vm4, %vm1622_vm3  ;;  %vm1643_vm3 = vcmp.eq.s32.totalorder %v6384_v2, %v5411_v19 }
 0x3bd   : > { %3660 = vmatmul.msk.bf16.gmra.mxu3 %vm3659_vm6, %v4490_v24  ;;  %vm1633_vm6 = vcmp.eq.s32.totalorder %v6379_v57, %v5411_v19 }
 0x3be   : > { %vm3665_vm8 = vmpackc.low %vm1635_vm7, %vm1633_vm6  ;;  %vm1636_vm6 = vcmp.eq.s32.totalorder %v6380_v54, %v5439_v13 }
 0x3c0   : > { %v1871_v15 = vpop.f32.mrf.mxu3 }
 0x3c7   : > { %3688 = vmatmul.msk.bf16.gmra.mxu2 %vm3687_vm9, %v4490_v24  ;;  %vm1626_vm9 = vcmp.eq.s32.totalorder %v6375_v36, %v5439_v13 }
 0x3c8   : > { %v1873_v16 = vpop.f32.mrf.mxu3  ;;  %vm3693_vm11 = vmpackc.low %vm1628_vm10, %vm1626_vm9 }
 0x3cd   : > { %3662 = vmatmul.msk.bf16.gmra.mxu3 %vm3661_vm12, %v4490_v24  ;;  %vm1637_vm12 = vcmp.eq.s32.totalorder %v6381_v61, %v5411_v19 }
 0x3ce   : > { %vm3667_vm14 = vmpackc.low %vm1639_vm13, %vm1637_vm12  ;;  %vm1640_vm12 = vcmp.eq.s32.totalorder %v6382_v44, %v5439_v13  ;;  %v1826_v44 = vld [vmem:[#allocation2 + $0x58] sm:$0xff] }
 0x3d0   : > { %v1876_v14 = vpop.f32.mrf.mxu3 }
 0x3d7   : > { %3690 = vmatmul.msk.bf16.gmra.mxu2 %vm3689_vm15, %v4490_v24  ;;  %vm1630_vm15 = vcmp.eq.s32.totalorder %v6377_v11, %v5439_v13 }
 0x3d8   : > { %v1878_v62 = vpop.f32.mrf.mxu3  ;;  %vm3695_vm1 = vmpackc.low %vm1632_vm0, %vm1630_vm15  ;;  %vm1644_vm15 = vcmp.eq.s32.totalorder %v6384_v2, %v5439_v13 }
 0x3da   : > { %v1955_v25 = vpop.f32.mrf.mxu2 }
 0x3db   : > { %v1956_v42 = vadd.f32 %v1955_v25, %v1866_v47  ;;  %v6385_v47 = vld [vmem:[#allocation60_spill] sm:$0xff] }
 0x3dd   : > { %v2035_v34 = vadd.f32 %v1956_v42, %v1809_v12  ;;  %3664 = vmatmul.msk.bf16.gmra.mxu3 %vm3663_vm2, %v4490_v24  ;;  %vm1641_vm2 = vcmp.eq.s32.totalorder %v6383_v59, %v5411_v19 }
 0x3de   : > { %vm3669_vm4 = vmpackc.low %vm1643_vm3, %vm1641_vm2 }
 0x3df   : > { %2067 = vst [vmem:[#allocation2 + $0xb0] sm:$0xff] %v2035_v34 }
 0x3e0   : > { %v1881_v7 = vpop.f32.mrf.mxu3 }
 0x3e2   : > { %v1957_v23 = vpop.f32.mrf.mxu2 }
 0x3e3   : > { %v1958_v32 = vadd.f32 %v1957_v23, %v1868_v48  ;;  %v6386_v48 = vld [vmem:[#allocation61_spill] sm:$0xff] }
 0x3e4   : > { %vm1647_vm9 = vcmp.eq.s32.totalorder %v6386_v48, %v5411_v19  ;;  %vm1648_vm2 = vcmp.eq.s32.totalorder %v6386_v48, %v5439_v13  ;;  %v1831_v48 = vld [vmem:[#allocation2 + $0x70] sm:$0xff] }
 0x3e5   : > { %v2036_v58 = vadd.f32 %v1958_v32, %v1810_v9  ;;  %v1821_v9 = vld [vmem:[#allocation2 + $0x60] sm:$0xff] }
 0x3e7   : > { %2068 = vst [vmem:[#allocation2] sm:$0xff] %v2036_v58  ;;  %3692 = vmatmul.msk.bf16.gmra.mxu2 %vm3691_vm5, %v4490_v24  ;;  %vm1634_vm5 = vcmp.eq.s32.totalorder %v6379_v57, %v5439_v13  ;;  %v1823_v57 = vld [vmem:[#allocation2 + $0x8] sm:$0xff] }
 0x3e8   : > { %v1883_v51 = vpop.f32.mrf.mxu3  ;;  %vm3697_vm7 = vmpackc.low %vm1636_vm6, %vm1634_vm5 }
 0x3ea   : > { %v1960_v35 = vpop.f32.mrf.mxu2 }
 0x3eb   : > { %v1961_v53 = vadd.f32 %v1960_v35, %v1871_v15 }
 0x3ed   : > { %v2037_v28 = vadd.f32 %v1961_v53, %v1811_v27  ;;  %3666 = vmatmul.msk.bf16.gmra.mxu3 %vm3665_vm8, %v4490_v24  ;;  %vm1645_vm8 = vcmp.eq.s32.totalorder %v6385_v47, %v5411_v19  ;;  %v1822_v27 = vld [vmem:[#allocation2 + $0xf0] sm:$0xff] }
 0x3ee   : > { %vm3671_vm10 = vmpackc.low %vm1647_vm9, %vm1645_vm8 }
 0x3ef   : > { %2069 = vst [vmem:[#allocation2 + $0xd8] sm:$0xff] %v2037_v28 }
 0x3f0   : > { %v1886_v50 = vpop.f32.mrf.mxu3 }
 0x3f2   : > { %v1962_v43 = vpop.f32.mrf.mxu2 }
 0x3f3   : > { %v1963_v52 = vadd.f32 %v1962_v43, %v1873_v16 }
 0x3f5   : > { %v2038_v49 = vadd.f32 %v1963_v52, %v1812_v22  ;;  %v1824_v52 = vld [vmem:[#allocation2 + $0x78] sm:$0xff] }
 0x3f7   : > { %2070 = vst [vmem:[#allocation2 + $0x18] sm:$0xff] %v2038_v49  ;;  %3694 = vmatmul.msk.bf16.gmra.mxu2 %vm3693_vm11, %v4490_v24  ;;  %vm1638_vm11 = vcmp.eq.s32.totalorder %v6381_v61, %v5439_v13 }
 0x3f8   : > { %v1888_v18 = vpop.f32.mrf.mxu3  ;;  %vm3699_vm13 = vmpackc.low %vm1640_vm12, %vm1638_vm11 }
 0x3fa   : > { %v1965_v26 = vpop.f32.mrf.mxu2 }
 0x3fb   : > { %v1966_v3 = vadd.f32 %v1965_v26, %v1876_v14 }
 0x3fd   : > { %v2039_v46 = vadd.f32 %v1966_v3, %v1813_v41  ;;  %3668 = vmatmul.msk.bf16.gmra.mxu3 %vm3667_vm14, %v4490_v24  ;;  %vm1642_vm14 = vcmp.eq.s32.totalorder %v6383_v59, %v5439_v13 }
 0x3fe   : > { %vm3701_vm0 = vmpackc.low %vm1644_vm15, %vm1642_vm14 }
 0x3ff   : > { %2071 = vst [vmem:[#allocation2 + $0x50] sm:$0xff] %v2039_v46 }
 0x400   : > { %v1891_v8 = vpop.f32.mrf.mxu3 }
 0x402   : > { %v1967_v6 = vpop.f32.mrf.mxu2 }
 0x403   : > { %v1968_v55 = vadd.f32 %v1967_v6, %v1878_v62  ;;  %v1820_v62 = vld [vmem:[#allocation2 + $0xb8] sm:$0xff] }
 0x405   : > { %v2040_v5 = vadd.f32 %v1968_v55, %v1814_v56  ;;  %v1827_v55 = vld [vmem:[#allocation2 + $0x40] sm:$0xff] }
 0x407   : > { %2072 = vst [vmem:[#allocation2 + $0x68] sm:$0xff] %v2040_v5  ;;  %3696 = vmatmul.msk.bf16.gmra.mxu2 %vm3695_vm1, %v4490_v24  ;;  %vm1646_vm1 = vcmp.eq.s32.totalorder %v6385_v47, %v5439_v13  ;;  %v1825_v13 = vld [vmem:[#allocation2 + $0x38] sm:$0xff] }
 0x408   : > { %v1893_v39 = vpop.f32.mrf.mxu3  ;;  %vm3703_vm3 = vmpackc.low %vm1648_vm2, %vm1646_vm1 }
 0x40a   : > { %v1970_v40 = vpop.f32.mrf.mxu2 }
 0x40b   : > { %v1971_v60 = vadd.f32 %v1970_v40, %v1881_v7 }
 0x40d   : > { %v2041_v1 = vadd.f32 %v1971_v60, %v1815_v4  ;;  %3670 = vmatmul.msk.bf16.gmra.mxu3 %vm3669_vm4, %v4490_v24  ;;  %v1828_v60 = vld [vmem:[#allocation2 + $0xc8] sm:$0xff] }
 0x40f   : > { %2073 = vst [vmem:[#allocation2 + $0x30] sm:$0xff] %v2041_v1 }
 0x410   : > { %v1896_v20 = vpop.f32.mrf.mxu3 }
 0x412   : > { %v1972_v10 = vpop.f32.mrf.mxu2 }
 0x413   : > { %v1973_v17 = vadd.f32 %v1972_v10, %v1883_v51  ;;  %v1829_v10 = vld [vmem:[#allocation2 + $0xe0] sm:$0xff] }
 0x415   : > { %v2042_v21 = vadd.f32 %v1973_v17, %v1816_v31 }
 0x417   : > { %2074 = vst [vmem:[#allocation2 + $0x48] sm:$0xff] %v2042_v21  ;;  %3698 = vmatmul.msk.bf16.gmra.mxu2 %vm3697_vm7, %v4490_v24 }
 0x418   : > { %v1898_v63 = vpop.f32.mrf.mxu3 }
 0x41a   : > { %v1975_v30 = vpop.f32.mrf.mxu2 }
 0x41b   : > { %v1976_v37 = vadd.f32 %v1975_v30, %v1886_v50 }
 0x41d   : > { %v2043_v38 = vadd.f32 %v1976_v37, %v1817_v29  ;;  %3672 = vmatmul.msk.bf16.gmra.mxu3 %vm3671_vm10, %v4490_v24  ;;  %v1830_v29 = vld [vmem:[#allocation2 + $0x90] sm:$0xff] }
 0x41f   : > { %2075 = vst [vmem:[#allocation2 + $0x80] sm:$0xff] %v2043_v38 }
 0x420   : > { %v1901_v19 = vpop.f32.mrf.mxu3 }
 0x422   : > { %v1977_v15 = vpop.f32.mrf.mxu2 }
 0x423   : > { %v1978_v16 = vadd.f32 %v1977_v15, %v1888_v18 }
 0x425   : > { %v2044_v36 = vadd.f32 %v1978_v16, %v1818_v0 }
 0x427   : > { %2076 = vst [vmem:[#allocation2 + $0x88] sm:$0xff] %v2044_v36  ;;  %3700 = vmatmul.msk.bf16.gmra.mxu2 %vm3699_vm13, %v4490_v24  ;;  %v1832_v36 = vld [vmem:[#allocation2 + $0xc0] sm:$0xff] }
 0x428   : > { %v1903_v34 = vpop.f32.mrf.mxu3 }
 0x42a   : > { %v1980_v14 = vpop.f32.mrf.mxu2 }
 0x42b   : > { %v1981_v12 = vadd.f32 %v1980_v14, %v1891_v8 }
 0x42d   : > { %v2045_v25 = vadd.f32 %v1981_v12, %v1819_v33 }
 0x42f   : > { %2077 = vst [vmem:[#allocation2 + $0xe8] sm:$0xff] %v2045_v25  ;;  %v1833_v25 = vld [vmem:[#allocation2 + $0xa8] sm:$0xff] }
 0x430   : > { %v1906_v32 = vpop.f32.mrf.mxu3 }
 0x432   : > { %v1982_v42 = vpop.f32.mrf.mxu2 }
 0x433   : > { %v1983_v11 = vadd.f32 %v1982_v42, %v1893_v39 }
 0x435   : > { %v2046_v45 = vadd.f32 %v1983_v11, %v1820_v62 }
 0x437   : > { %2078 = vst [vmem:[#allocation2 + $0xb8] sm:$0xff] %v2046_v45  ;;  %3702 = vmatmul.msk.bf16.gmra.mxu2 %vm3701_vm0, %v4490_v24  ;;  %v1834_v45 = vld [vmem:[#allocation2 + $0xd0] sm:$0xff] }
 0x438   : > { %v1908_v28 = vpop.f32.mrf.mxu3 }
 0x43a   : > { %v1985_v23 = vpop.f32.mrf.mxu2 }
 0x43b   : > { %v1986_v7 = vadd.f32 %v1985_v23, %v1896_v20 }
 0x43d   : > { %v2047_v58 = vadd.f32 %v1986_v7, %v1821_v9 }
 0x43f   : > { %2079 = vst [vmem:[#allocation2 + $0x60] sm:$0xff] %v2047_v58 }
 0x440   : > { %v1911_v50 = vpop.f32.mrf.mxu3 }
 0x442   : > { %v1987_v35 = vpop.f32.mrf.mxu2 }
 0x443   : > { %v1988_v51 = vadd.f32 %v1987_v35, %v1898_v63 }
 0x445   : > { %v2048_v53 = vadd.f32 %v1988_v51, %v1822_v27 }
 0x447   : > { %2080 = vst [vmem:[#allocation2 + $0xf0] sm:$0xff] %v2048_v53  ;;  %3704 = vmatmul.msk.bf16.gmra.mxu2 %vm3703_vm3, %v4490_v24  ;;  %v1836_v53 = vld [vmem:[#allocation2 + $0x28] sm:$0xff] }
 0x448   : > { %v1913_v3 = vpop.f32.mrf.mxu3 }
 0x44a   : > { %v1990_v54 = vpop.f32.mrf.mxu2 }
 0x44b   : > { %v1991_v22 = vadd.f32 %v1990_v54, %v1901_v19 }
 0x44d   : > { %v2049_v43 = vadd.f32 %v1991_v22, %v1823_v57 }
 0x44f   : > { %2081 = vst [vmem:[#allocation2 + $0x8] sm:$0xff] %v2049_v43  ;;  %v1837_v43 = vld [vmem:[#allocation2 + $0xa0] sm:$0xff] }
 0x450   : > { %v1916_v6 = vpop.f32.mrf.mxu3 }
 0x452   : > { %v1992_v49 = vpop.f32.mrf.mxu2 }
 0x453   : > { %v1993_v41 = vadd.f32 %v1992_v49, %v1903_v34 }
 0x455   : > { %v2050_v26 = vadd.f32 %v1993_v41, %v1824_v52 }
 0x457   : > { %2082 = vst [vmem:[#allocation2 + $0x78] sm:$0xff] %v2050_v26  ;;  %v1838_v26 = vld [vmem:[#allocation2 + $0xf8] sm:$0xff] }
 0x458   : > { %v1918_v39 = vpop.f32.mrf.mxu3 }
 0x45a   : > { %v1995_v18 = vpop.f32.mrf.mxu2 }
 0x45b   : > { %v1996_v46 = vadd.f32 %v1995_v18, %v1906_v32  ;;  %v1835_v32 = vld [vmem:[#allocation2 + $0x10] sm:$0xff] }
 0x45d   : > { %v2051_v61 = vadd.f32 %v1996_v46, %v1825_v13 }
 0x45f   : > { %2083 = vst [vmem:[#allocation2 + $0x38] sm:$0xff] %v2051_v61  ;;  %v1839_v61 = vld [vmem:[#allocation2 + $0x20] sm:$0xff] }
 0x460   : > { %v1921_v31 = vpop.f32.mrf.mxu3 }
 0x462   : > { %v1997_v56 = vpop.f32.mrf.mxu2 }
 0x463   : > { %v1998_v24 = vadd.f32 %v1997_v56, %v1908_v28 }
 0x465   : > { %v2052_v8 = vadd.f32 %v1998_v24, %v1826_v44 }
 0x467   : > { %2084 = vst [vmem:[#allocation2 + $0x58] sm:$0xff] %v2052_v8  ;;  %v1840_v8 = vld [vmem:[#allocation2 + $0x98] sm:$0xff] }
 0x468   : > { %v1923_v37 = vpop.f32.mrf.mxu3 }
 0x46a   : > { %v2000_v5 = vpop.f32.mrf.mxu2 }
 0x46b   : > { %v2001_v4 = vadd.f32 %v2000_v5, %v1911_v50 }
 0x46d   : > { %v2053_v40 = vadd.f32 %v2001_v4, %v1827_v55 }
 0x46f   : > { %2085 = vst [vmem:[#allocation2 + $0x40] sm:$0xff] %v2053_v40 }
 0x470   : > { %v1926_v15 = vpop.f32.mrf.mxu3 }
 0x472   : > { %v2002_v1 = vpop.f32.mrf.mxu2 }
 0x473   : > { %v2003_v59 = vadd.f32 %v2002_v1, %v1913_v3 }
 0x475   : > { %v2054_v2 = vadd.f32 %v2003_v59, %v1828_v60 }
 0x477   : > { %2086 = vst [vmem:[#allocation2 + $0xc8] sm:$0xff] %v2054_v2 }
 0x478   : > { %v1928_v12 = vpop.f32.mrf.mxu3 }
 0x47a   : > { %v2005_v17 = vpop.f32.mrf.mxu2 }
 0x47b   : > { %v2006_v20 = vadd.f32 %v2005_v17, %v1916_v6 }
 0x47d   : > { %v2055_v21 = vadd.f32 %v2006_v20, %v1829_v10 }
 0x47f   : > { %2087 = vst [vmem:[#allocation2 + $0xe0] sm:$0xff] %v2055_v21 }
 0x480   : > { %v1931_v11 = vpop.f32.mrf.mxu3 }
 0x482   : > { %v2007_v30 = vpop.f32.mrf.mxu2 }
 0x483   : > { %v2008_v38 = vadd.f32 %v2007_v30, %v1918_v39 }
 0x485   : > { %v2056_v47 = vadd.f32 %v2008_v38, %v1830_v29 }
 0x487   : > { %2088 = vst [vmem:[#allocation2 + $0x90] sm:$0xff] %v2056_v47 }
 0x488   : > { %v1933_v27 = vpop.f32.mrf.mxu3 }
 0x48a   : > { %v2010_v63 = vpop.f32.mrf.mxu2 }
 0x48b   : > { %v2011_v0 = vadd.f32 %v2010_v63, %v1921_v31 }
 0x48d   : > { %v2057_v16 = vadd.f32 %v2011_v0, %v1831_v48 }
 0x48f   : > { %2089 = vst [vmem:[#allocation2 + $0x70] sm:$0xff] %v2057_v16 }
 0x490   : > { %v1936_v54 = vpop.f32.mrf.mxu3 }
 0x492   : > { %v2012_v19 = vpop.f32.mrf.mxu2 }
 0x493   : > { %v2013_v33 = vadd.f32 %v2012_v19, %v1923_v37 }
 0x495   : > { %v2058_v14 = vadd.f32 %v2013_v33, %v1832_v36 }
 0x497   : > { %2090 = vst [vmem:[#allocation2 + $0xc0] sm:$0xff] %v2058_v14 }
 0x498   : > { %v1938_v41 = vpop.f32.mrf.mxu3 }
 0x49a   : > { %v2015_v62 = vpop.f32.mrf.mxu2 }
 0x49b   : > { %v2016_v42 = vadd.f32 %v2015_v62, %v1926_v15 }
 0x49d   : > { %v2059_v34 = vadd.f32 %v2016_v42, %v1833_v25 }
 0x49f   : > { %2091 = vst [vmem:[#allocation2 + $0xa8] sm:$0xff] %v2059_v34 }
 0x4a0   : > { %v1941_v46 = vpop.f32.mrf.mxu3 }
 0x4a2   : > { %v2017_v9 = vpop.f32.mrf.mxu2 }
 0x4a3   : > { %v2018_v23 = vadd.f32 %v2017_v9, %v1928_v12 }
 0x4a5   : > { %v2060_v7 = vadd.f32 %v2018_v23, %v1834_v45 }
 0x4a7   : > { %2092 = vst [vmem:[#allocation2 + $0xd0] sm:$0xff] %v2060_v7 }
 0x4a8   : > { %v1943_v6 = vpop.f32.mrf.mxu3 }
 0x4aa   : > { %v2020_v58 = vpop.f32.mrf.mxu2 }
 0x4ab   : > { %v2021_v35 = vadd.f32 %v2020_v58, %v1931_v11 }
 0x4ad   : > { %v2061_v51 = vadd.f32 %v2021_v35, %v1835_v32 }
 0x4af   : > { %2093 = vst [vmem:[#allocation2 + $0x10] sm:$0xff] %v2061_v51 }
 0x4b2   : > { %v2022_v28 = vpop.f32.mrf.mxu2 }
 0x4b3   : > { %v2023_v57 = vadd.f32 %v2022_v28, %v1933_v27 }
 0x4b5   : > { %v2062_v22 = vadd.f32 %v2023_v57, %v1836_v53 }
 0x4b7   : > { %2094 = vst [vmem:[#allocation2 + $0x28] sm:$0xff] %v2062_v22 }
 0x4ba   : > { %v2025_v50 = vpop.f32.mrf.mxu2 }
 0x4bb   : > { %v2026_v52 = vadd.f32 %v2025_v50, %v1936_v54 }
 0x4bd   : > { %v2063_v49 = vadd.f32 %v2026_v52, %v1837_v43 }
 0x4bf   : > { %2095 = vst [vmem:[#allocation2 + $0xa0] sm:$0xff] %v2063_v49 }
 0x4c2   : > { %v2027_v13 = vpop.f32.mrf.mxu2 }
 0x4c3   : > { %v2028_v18 = vadd.f32 %v2027_v13, %v1938_v41 }
 0x4c5   : > { %v2064_v3 = vadd.f32 %v2028_v18, %v1838_v26 }
 0x4c7   : > { %2096 = vst [vmem:[#allocation2 + $0xf8] sm:$0xff] %v2064_v3 }
 0x4ca   : > { %v2030_v44 = vpop.f32.mrf.mxu2 }
 0x4cb   : > { %v2031_v56 = vadd.f32 %v2030_v44, %v1941_v46 }
 0x4cd   : > { %v2065_v24 = vadd.f32 %v2031_v56, %v1839_v61 }
 0x4cf   : > { %2097 = vst [vmem:[#allocation2 + $0x20] sm:$0xff] %v2065_v24 }
 0x4d2   : > { %v2032_v55 = vpop.f32.mrf.mxu2 }
 0x4d3   : > { %v2033_v5 = vadd.f32 %v2032_v55, %v1943_v6  ;;  %2102 = sbr.rel (%p3705_p1) target bundleno = 1804 (0x70c), region = 96 }
 0x4d5   : > { %v2066_v4 = vadd.f32 %v2033_v5, %v1840_v8 }
 0x4d7   : > { %2098 = vst [vmem:[#allocation2 + $0x98] sm:$0xff] %v2066_v4 }
 0x4d8   : > { %v2198_v40 = vld [vmem:[#allocation16 + $0x78] sm:$0xff]  ;;  %v2197_v60 = vld [vmem:[#allocation16 + $0x70] sm:$0xff]  ;;  %v2196_v59 = vld [vmem:[#allocation16 + $0x68] sm:$0xff] }
 0x4d9   : > { %v2182_v39 = vld [vmem:[#allocation15 + $0x78] sm:$0xff]  ;;  %2199 = vmatpush.msra.mxu0 %v2198_v40  ;;  %3842 = vmatpush.msra.mxu2 %v2198_v40  ;;  %v2181_v1 = vld [vmem:[#allocation15 + $0x70] sm:$0xff]  ;;  %v2180_v2 = vld [vmem:[#allocation15 + $0x68] sm:$0xff] }
 0x4da   : > { %2312 = vmatpush.msra.mxu1 %v2182_v39  ;;  %3858 = vmatpush.msra.mxu3 %v2182_v39  ;;  %v2195_v31 = vld [vmem:[#allocation16 + $0x60] sm:$0xff]  ;;  %v2194_v17 = vld [vmem:[#allocation16 + $0x58] sm:$0xff]  ;;  %v2193_v21 = vld [vmem:[#allocation16 + $0x50] sm:$0xff] }
 0x4db   : > { %2200 = vmatpush.msra.mxu0 %v2197_v60  ;;  %3843 = vmatpush.msra.mxu2 %v2197_v60  ;;  %v2179_v10 = vld [vmem:[#allocation15 + $0x60] sm:$0xff]  ;;  %v2178_v20 = vld [vmem:[#allocation15 + $0x58] sm:$0xff]  ;;  %v2177_v29 = vld [vmem:[#allocation15 + $0x50] sm:$0xff] }
 0x4dc   : > { %2313 = vmatpush.msra.mxu1 %v2181_v1  ;;  %3859 = vmatpush.msra.mxu3 %v2181_v1  ;;  %v2192_v30 = vld [vmem:[#allocation16 + $0x48] sm:$0xff]  ;;  %v2191_v38 = vld [vmem:[#allocation16 + $0x40] sm:$0xff]  ;;  %v2190_v48 = vld [vmem:[#allocation16 + $0x38] sm:$0xff] }
 0x4dd   : > { %2201 = vmatpush.msra.mxu0 %v2196_v59  ;;  %3844 = vmatpush.msra.mxu2 %v2196_v59  ;;  %v2176_v37 = vld [vmem:[#allocation15 + $0x48] sm:$0xff]  ;;  %v2175_v47 = vld [vmem:[#allocation15 + $0x40] sm:$0xff]  ;;  %v2174_v63 = vld [vmem:[#allocation15 + $0x38] sm:$0xff] }
 0x4de   : > { %2314 = vmatpush.msra.mxu1 %v2180_v2  ;;  %3860 = vmatpush.msra.mxu3 %v2180_v2  ;;  %v2189_v0 = vld [vmem:[#allocation16 + $0x30] sm:$0xff]  ;;  %v2188_v16 = vld [vmem:[#allocation16 + $0x28] sm:$0xff]  ;;  %v2187_v19 = vld [vmem:[#allocation16 + $0x20] sm:$0xff] }
 0x4df   : > { %2202 = vmatpush.msra.mxu0 %v2195_v31  ;;  %3845 = vmatpush.msra.mxu2 %v2195_v31  ;;  %v2173_v15 = vld [vmem:[#allocation15 + $0x30] sm:$0xff]  ;;  %v2172_v36 = vld [vmem:[#allocation15 + $0x28] sm:$0xff]  ;;  %v2171_v33 = vld [vmem:[#allocation15 + $0x20] sm:$0xff] }
 0x4e0   : > { %2315 = vmatpush.msra.mxu1 %v2179_v10  ;;  %3861 = vmatpush.msra.mxu3 %v2179_v10  ;;  %v2186_v14 = vld [vmem:[#allocation16 + $0x18] sm:$0xff]  ;;  %v2185_v25 = vld [vmem:[#allocation16 + $0x10] sm:$0xff]  ;;  %v2184_v42 = vld [vmem:[#allocation16 + $0x8] sm:$0xff] }
 0x4e1   : > { %2203 = vmatpush.msra.mxu0 %v2194_v17  ;;  %3846 = vmatpush.msra.mxu2 %v2194_v17  ;;  %v2170_v12 = vld [vmem:[#allocation15 + $0x18] sm:$0xff]  ;;  %v2169_v62 = vld [vmem:[#allocation15 + $0x10] sm:$0xff]  ;;  %v2168_v34 = vld [vmem:[#allocation15 + $0x8] sm:$0xff] }
 0x4e2   : > { %2316 = vmatpush.msra.mxu1 %v2178_v20  ;;  %3862 = vmatpush.msra.mxu3 %v2178_v20  ;;  %v2183_v11 = vld [vmem:[#allocation16] sm:$0xff]  ;;  %v2135_v9 = vld [vmem:[%s4789_s17] sm:$0xff]  ;;  %v2136_v58 = vld [vmem:[%s4789_s17 + $0x8] sm:$0xff] }
 0x4e3   : > { %2204 = vmatpush.msra.mxu0 %v2193_v21  ;;  %3847 = vmatpush.msra.mxu2 %v2193_v21  ;;  %v2167_v45 = vld [vmem:[#allocation15] sm:$0xff]  ;;  %v2151_v23 = vld [vmem:[%s4789_s17 + $0x80] sm:$0xff]  ;;  %v2152_v27 = vld [vmem:[%s4789_s17 + $0x88] sm:$0xff] }
 0x4e4   : > { %2317 = vmatpush.msra.mxu1 %v2177_v29  ;;  %3863 = vmatpush.msra.mxu3 %v2177_v29  ;;  %v2103_v7 = vld [vmem:[#allocation2 + $0xb0] sm:$0xff]  ;;  %v2119_v32 = vld [vmem:[#allocation2 + $0x38] sm:$0xff]  ;;  %v2104_v35 = vld [vmem:[#allocation2] sm:$0xff] }
 0x4e5   : > { %2205 = vmatpush.msra.mxu0 %v2192_v30  ;;  %3848 = vmatpush.msra.mxu2 %v2192_v30  ;;  %v2120_v51 = vld [vmem:[#allocation2 + $0x58] sm:$0xff]  ;;  %v2137_v53 = vld [vmem:[%s4789_s17 + $0x10] sm:$0xff]  ;;  %v2121_v54 = vld [vmem:[#allocation2 + $0x40] sm:$0xff] }
 0x4e6   : > { %2318 = vmatpush.msra.mxu1 %v2176_v37  ;;  %3864 = vmatpush.msra.mxu3 %v2176_v37  ;;  %v2153_v28 = vld [vmem:[%s4789_s17 + $0x90] sm:$0xff]  ;;  %v2105_v57 = vld [vmem:[#allocation2 + $0xd8] sm:$0xff]  ;;  %v2122_v52 = vld [vmem:[#allocation2 + $0xc8] sm:$0xff] }
 0x4e7   : > { %2206 = vmatpush.msra.mxu0 %v2191_v38  ;;  %3849 = vmatpush.msra.mxu2 %v2191_v38  ;;  %v2138_v22 = vld [vmem:[%s4789_s17 + $0x18] sm:$0xff]  ;;  %v2139_v49 = vld [vmem:[%s4789_s17 + $0x20] sm:$0xff]  ;;  %v2107_v26 = vld [vmem:[#allocation2 + $0x50] sm:$0xff] }
 0x4e8   : > { %2319 = vmatpush.msra.mxu1 %v2175_v47  ;;  %3865 = vmatpush.msra.mxu3 %v2175_v47  ;;  %v2154_v43 = vld [vmem:[%s4789_s17 + $0x98] sm:$0xff]  ;;  %v2155_v41 = vld [vmem:[%s4789_s17 + $0xa0] sm:$0xff]  ;;  %v2156_v18 = vld [vmem:[%s4789_s17 + $0xa8] sm:$0xff] }
 0x4e9   : > { %2207 = vmatpush.msra.mxu0 %v2190_v48  ;;  %3850 = vmatpush.msra.mxu2 %v2190_v48  ;;  %v2106_v50 = vld [vmem:[#allocation2 + $0x18] sm:$0xff]  ;;  %v2123_v13 = vld [vmem:[#allocation2 + $0xe0] sm:$0xff]  ;;  %v2140_v3 = vld [vmem:[%s4789_s17 + $0x28] sm:$0xff] }
 0x4ea   : > { %2320 = vmatpush.msra.mxu1 %v2174_v63  ;;  %3866 = vmatpush.msra.mxu3 %v2174_v63  ;;  %v2124_v46 = vld [vmem:[#allocation2 + $0x90] sm:$0xff]  ;;  %v2108_v61 = vld [vmem:[#allocation2 + $0x68] sm:$0xff]  ;;  %v2158_v8 = vld [vmem:[%s4789_s17 + $0xb8] sm:$0xff] }
 0x4eb   : > { %2208 = vmatpush.msra.mxu0 %v2189_v0  ;;  %3851 = vmatpush.msra.mxu2 %v2189_v0  ;;  %v2157_v44 = vld [vmem:[%s4789_s17 + $0xb0] sm:$0xff]  ;;  %v2142_v55 = vld [vmem:[%s4789_s17 + $0x38] sm:$0xff]  ;;  %v2126_v5 = vld [vmem:[#allocation2 + $0xc0] sm:$0xff] }
 0x4ec   : > { %2321 = vmatpush.msra.mxu1 %v2173_v15  ;;  %3867 = vmatpush.msra.mxu3 %v2173_v15  ;;  %v2141_v56 = vld [vmem:[%s4789_s17 + $0x30] sm:$0xff]  ;;  %v2110_v4 = vld [vmem:[#allocation2 + $0x48] sm:$0xff]  ;;  %v2159_v40 = vld [vmem:[%s4789_s17 + $0xc0] sm:$0xff] }
 0x4ed   : > { %2209 = vmatpush.msra.mxu0 %v2188_v16  ;;  %3852 = vmatpush.msra.mxu2 %v2188_v16  ;;  %v2125_v24 = vld [vmem:[#allocation2 + $0x70] sm:$0xff]  ;;  %v2143_v39 = vld [vmem:[%s4789_s17 + $0x40] sm:$0xff]  ;;  %v2127_v60 = vld [vmem:[#allocation2 + $0xa8] sm:$0xff] }
 0x4ee   : > { %2322 = vmatpush.msra.mxu1 %v2172_v36  ;;  %3868 = vmatpush.msra.mxu3 %v2172_v36  ;;  %v2109_v6 = vld [vmem:[#allocation2 + $0x30] sm:$0xff]  ;;  %v2111_v1 = vld [vmem:[#allocation2 + $0x80] sm:$0xff]  ;;  %v2160_v59 = vld [vmem:[%s4789_s17 + $0xc8] sm:$0xff] }
 0x4ef   : > { %2210 = vmatpush.msra.mxu0 %v2187_v19  ;;  %3853 = vmatpush.msra.mxu2 %v2187_v19  ;;  %v2144_v2 = vld [vmem:[%s4789_s17 + $0x48] sm:$0xff]  ;;  %v2128_v31 = vld [vmem:[#allocation2 + $0xd0] sm:$0xff]  ;;  %v2162_v30 = vld [vmem:[%s4789_s17 + $0xd8] sm:$0xff] }
 0x4f0   : > { %2323 = vmatpush.msra.mxu1 %v2171_v33  ;;  %3869 = vmatpush.msra.mxu3 %v2171_v33  ;;  %v2112_v10 = vld [vmem:[#allocation2 + $0x88] sm:$0xff]  ;;  %v2161_v17 = vld [vmem:[%s4789_s17 + $0xd0] sm:$0xff]  ;;  %v2146_v37 = vld [vmem:[%s4789_s17 + $0x58] sm:$0xff] }
 0x4f1   : > { %2211 = vmatpush.msra.mxu0 %v2186_v14  ;;  %3854 = vmatpush.msra.mxu2 %v2186_v14  ;;  %v2145_v20 = vld [vmem:[%s4789_s17 + $0x50] sm:$0xff]  ;;  %v2113_v29 = vld [vmem:[#allocation2 + $0xe8] sm:$0xff]  ;;  %v2114_v47 = vld [vmem:[#allocation2 + $0xb8] sm:$0xff] }
 0x4f2   : > { %2324 = vmatpush.msra.mxu1 %v2170_v12  ;;  %3870 = vmatpush.msra.mxu3 %v2170_v12  ;;  %v2129_v21 = vld [vmem:[#allocation2 + $0x10] sm:$0xff]  ;;  %v2130_v38 = vld [vmem:[#allocation2 + $0x28] sm:$0xff]  ;;  %v2163_v48 = vld [vmem:[%s4789_s17 + $0xe0] sm:$0xff] }
 0x4f3   : > { %2212 = vmatpush.msra.mxu0 %v2185_v25  ;;  %3855 = vmatpush.msra.mxu2 %v2185_v25  ;;  %v2147_v63 = vld [vmem:[%s4789_s17 + $0x60] sm:$0xff]  ;;  %v2164_v16 = vld [vmem:[%s4789_s17 + $0xe8] sm:$0xff]  ;;  %v2132_v19 = vld [vmem:[#allocation2 + $0xf8] sm:$0xff] }
 0x4f4   : > { %2325 = vmatpush.msra.mxu1 %v2169_v62  ;;  %3871 = vmatpush.msra.mxu3 %v2169_v62  ;;  %v2131_v0 = vld [vmem:[#allocation2 + $0xa0] sm:$0xff]  ;;  %v2148_v36 = vld [vmem:[%s4789_s17 + $0x68] sm:$0xff]  ;;  %v2116_v33 = vld [vmem:[#allocation2 + $0xf0] sm:$0xff] }
 0x4f5   : > { %2213 = vmatpush.msra.mxu0 %v2184_v42  ;;  %3856 = vmatpush.msra.mxu2 %v2184_v42  ;;  %v2115_v15 = vld [vmem:[#allocation2 + $0x60] sm:$0xff]  ;;  %v2165_v14 = vld [vmem:[%s4789_s17 + $0xf0] sm:$0xff]  ;;  %v2117_v62 = vld [vmem:[#allocation2 + $0x8] sm:$0xff] }
 0x4f6   : > { %2326 = vmatpush.msra.mxu1 %v2168_v34  ;;  %3872 = vmatpush.msra.mxu3 %v2168_v34  ;;  %v2149_v12 = vld [vmem:[%s4789_s17 + $0x70] sm:$0xff]  ;;  %v2133_v25 = vld [vmem:[#allocation2 + $0x20] sm:$0xff]  ;;  %v2166_v42 = vld [vmem:[%s4789_s17 + $0xf8] sm:$0xff] }
 0x4f7   : > { %2214 = vmatpush.msra.mxu0 %v2183_v11  ;;  %3857 = vmatpush.msra.mxu2 %v2183_v11  ;;  %v2150_v34 = vld [vmem:[%s4789_s17 + $0x78] sm:$0xff] }
 0x4f8   : > { %2327 = vmatpush.msra.mxu1 %v2167_v45  ;;  %3873 = vmatpush.msra.mxu3 %v2167_v45  ;;  %v2134_v11 = vld [vmem:[#allocation2 + $0x98] sm:$0xff] }
 0x4f9   : > { %2215 = vmatmul.f32.vlgmr.msra.gmra.mxu0 %v2135_v9  ;;  %2263 = vmatmul.f32.vlgmr.msra.gmra.mxu2 %v2151_v23  ;;  %v2118_v45 = vld [vmem:[#allocation2 + $0x78] sm:$0xff]  ;;  %v5626_v23 = vld [vmem:[%s6388_s28] ss:$0 sm:$0xff] }
 0x4fa   : > { %2328 = vmatmul.f32.vlgmr.msra.gmra.mxu1 %v2103_v7  ;;  %2376 = vmatmul.f32.vlgmr.msra.gmra.mxu3 %v2119_v32 }
 0x501   : > { %2218 = vmatmul.f32.gmra.mxu0 %v2136_v58  ;;  %2266 = vmatmul.f32.gmra.mxu2 %v2152_v27 }
 0x502   : > { %2331 = vmatmul.f32.gmra.mxu1 %v2104_v35  ;;  %2379 = vmatmul.f32.gmra.mxu3 %v2120_v51 }
 0x509   : > { %2221 = vmatmul.f32.gmra.mxu0 %v2137_v53  ;;  %2269 = vmatmul.f32.gmra.mxu2 %v2153_v28 }
 0x50a   : > { %2334 = vmatmul.f32.gmra.mxu1 %v2105_v57  ;;  %2382 = vmatmul.f32.gmra.mxu3 %v2121_v54 }
 0x511   : > { %2224 = vmatmul.f32.gmra.mxu0 %v2138_v22  ;;  %2272 = vmatmul.f32.gmra.mxu2 %v2154_v43 }
 0x512   : > { %2337 = vmatmul.f32.gmra.mxu1 %v2106_v50  ;;  %2385 = vmatmul.f32.gmra.mxu3 %v2122_v52 }
 0x519   : > { %2227 = vmatmul.f32.gmra.mxu0 %v2139_v49  ;;  %2275 = vmatmul.f32.gmra.mxu2 %v2155_v41 }
 0x51a   : > { %2340 = vmatmul.f32.gmra.mxu1 %v2107_v26  ;;  %2388 = vmatmul.f32.gmra.mxu3 %v2123_v13 }
 0x521   : > { %2278 = vmatmul.f32.gmra.mxu2 %v2156_v18  ;;  %2230 = vmatmul.f32.gmra.mxu0 %v2140_v3 }
 0x522   : > { %2391 = vmatmul.f32.gmra.mxu3 %v2124_v46  ;;  %2343 = vmatmul.f32.gmra.mxu1 %v2108_v61 }
 0x529   : > { %2281 = vmatmul.f32.gmra.mxu2 %v2157_v44  ;;  %2233 = vmatmul.f32.gmra.mxu0 %v2141_v56 }
 0x52a   : > { %2394 = vmatmul.f32.gmra.mxu3 %v2125_v24  ;;  %2346 = vmatmul.f32.gmra.mxu1 %v2109_v6 }
 0x531   : > { %2284 = vmatmul.f32.gmra.mxu2 %v2158_v8  ;;  %2236 = vmatmul.f32.gmra.mxu0 %v2142_v55 }
 0x532   : > { %2397 = vmatmul.f32.gmra.mxu3 %v2126_v5  ;;  %2349 = vmatmul.f32.gmra.mxu1 %v2110_v4 }
 0x539   : > { %2287 = vmatmul.f32.gmra.mxu2 %v2159_v40  ;;  %2239 = vmatmul.f32.gmra.mxu0 %v2143_v39 }
 0x53a   : > { %2400 = vmatmul.f32.gmra.mxu3 %v2127_v60  ;;  %2352 = vmatmul.f32.gmra.mxu1 %v2111_v1 }
 0x541   : > { %2290 = vmatmul.f32.gmra.mxu2 %v2160_v59  ;;  %2242 = vmatmul.f32.gmra.mxu0 %v2144_v2 }
 0x542   : > { %2403 = vmatmul.f32.gmra.mxu3 %v2128_v31  ;;  %2355 = vmatmul.f32.gmra.mxu1 %v2112_v10 }
 0x549   : > { %2293 = vmatmul.f32.gmra.mxu2 %v2161_v17  ;;  %2245 = vmatmul.f32.gmra.mxu0 %v2145_v20 }
 0x54a   : > { %2406 = vmatmul.f32.gmra.mxu3 %v2129_v21  ;;  %2358 = vmatmul.f32.gmra.mxu1 %v2113_v29 }
 0x551   : > { %2296 = vmatmul.f32.gmra.mxu2 %v2162_v30  ;;  %2248 = vmatmul.f32.gmra.mxu0 %v2146_v37 }
 0x552   : > { %2409 = vmatmul.f32.gmra.mxu3 %v2130_v38  ;;  %2361 = vmatmul.f32.gmra.mxu1 %v2114_v47 }
 0x559   : > { %2299 = vmatmul.f32.gmra.mxu2 %v2163_v48  ;;  %2251 = vmatmul.f32.gmra.mxu0 %v2147_v63 }
 0x55a   : > { %2412 = vmatmul.f32.gmra.mxu3 %v2131_v0  ;;  %2364 = vmatmul.f32.gmra.mxu1 %v2115_v15 }
 0x561   : > { %2302 = vmatmul.f32.gmra.mxu2 %v2164_v16  ;;  %2254 = vmatmul.f32.gmra.mxu0 %v2148_v36 }
 0x562   : > { %2415 = vmatmul.f32.gmra.mxu3 %v2132_v19  ;;  %2367 = vmatmul.f32.gmra.mxu1 %v2116_v33 }
 0x569   : > { %2305 = vmatmul.f32.gmra.mxu2 %v2165_v14  ;;  %2257 = vmatmul.f32.gmra.mxu0 %v2149_v12 }
 0x56a   : > { %2418 = vmatmul.f32.gmra.mxu3 %v2133_v25  ;;  %2370 = vmatmul.f32.gmra.mxu1 %v2117_v62 }
 0x571   : > { %2308 = vmatmul.f32.gmra.mxu2 %v2166_v42  ;;  %2260 = vmatmul.f32.gmra.mxu0 %v2150_v34 }
 0x572   : > { %2421 = vmatmul.f32.gmra.mxu3 %v2134_v11  ;;  %2373 = vmatmul.f32.gmra.mxu1 %v2118_v45 }
 0x576   : > { %v2216_v9 = vpop.f32.mrf.mxu0 }
 0x577   : > { %v2329_v7 = vpop.f32.mrf.mxu1 }
 0x578   : > { %v2330_v32 = vadd.f32 %v2329_v7, %v2216_v9 }
 0x57a   : > { %v5629_v58 = vadd.f32 %v5626_v23, %v2330_v32 }
 0x57c   : > { %2461 = vadd.xlane.f32.xlu0 %v5629_v58  ;;  %v2264_v27 = vpop.f32.mrf.mxu2 }
 0x57d   : > { %v2377_v35 = vpop.f32.mrf.mxu3 }
 0x57e   : > { %v2378_v51 = vadd.f32 %v2377_v35, %v2264_v27  ;;  %v2219_v53 = vpop.f32.mrf.mxu0 }
 0x57f   : > { %v2332_v28 = vpop.f32.mrf.mxu1 }
 0x580   : > { %v2333_v57 = vadd.f32 %v2332_v28, %v2219_v53  ;;  %v5633_v54 = vadd.f32 %v5626_v23, %v2378_v51 }
 0x582   : > { %2493 = vadd.xlane.f32.xlu1 %v5633_v54  ;;  %v5637_v22 = vadd.f32 %v5626_v23, %v2333_v57 }
 0x584   : > { %2463 = vadd.xlane.f32.xlu0 %v5637_v22  ;;  %v2267_v43 = vpop.f32.mrf.mxu2 }
 0x585   : > { %v2380_v50 = vpop.f32.mrf.mxu3 }
 0x586   : > { %v2381_v52 = vadd.f32 %v2380_v50, %v2267_v43  ;;  %v2222_v49 = vpop.f32.mrf.mxu0 }
 0x587   : > { %v2335_v41 = vpop.f32.mrf.mxu1 }
 0x588   : > { %v2336_v26 = vadd.f32 %v2335_v41, %v2222_v49  ;;  %v5641_v13 = vadd.f32 %v5626_v23, %v2381_v52 }
 0x58a   : > { %2495 = vadd.xlane.f32.xlu2 %v5641_v13  ;;  %v5645_v18 = vadd.f32 %v5626_v23, %v2336_v26 }
 0x58c   : > { %2465 = vadd.xlane.f32.xlu1 %v5645_v18  ;;  %v2270_v3 = vpop.f32.mrf.mxu2 }
 0x58d   : > { %v2383_v46 = vpop.f32.mrf.mxu3 }
 0x58e   : > { %v2384_v61 = vadd.f32 %v2383_v46, %v2270_v3  ;;  %v2225_v44 = vpop.f32.mrf.mxu0 }
 0x58f   : > { %v2338_v56 = vpop.f32.mrf.mxu1 }
 0x590   : > { %v2339_v24 = vadd.f32 %v2338_v56, %v2225_v44  ;;  %v5649_v6 = vadd.f32 %v5626_v23, %v2384_v61 }
 0x592   : > { %2497 = vadd.xlane.f32.xlu0 %v5649_v6  ;;  %v5653_v8 = vadd.f32 %v5626_v23, %v2339_v24 }
 0x594   : > { %2467 = vadd.xlane.f32.xlu1 %v5653_v8  ;;  %v2273_v55 = vpop.f32.mrf.mxu2 }
 0x595   : > { %v2386_v5 = vpop.f32.mrf.mxu3 }
 0x596   : > { %v2387_v4 = vadd.f32 %v2386_v5, %v2273_v55  ;;  %v2228_v40 = vpop.f32.mrf.mxu0 }
 0x597   : > { %v2341_v39 = vpop.f32.mrf.mxu1 }
 0x598   : > { %v2342_v60 = vadd.f32 %v2341_v39, %v2228_v40  ;;  %v5660_v59 = vadd.f32 %v5626_v23, %v2387_v4 }
 0x59a   : > { %v5657_v1 = vadd.f32 %v5626_v23, %v2342_v60 }
 0x59c   : > { %2469 = vadd.xlane.f32.xlu2 %v5657_v1  ;;  %2499 = vadd.xlane.f32.xlu1 %v5660_v59  ;;  %v2276_v2 = vpop.f32.mrf.mxu2 }
 0x59d   : > { %v2389_v31 = vpop.f32.mrf.mxu3 }
 0x59e   : > { %v2390_v10 = vadd.f32 %v2389_v31, %v2276_v2  ;;  %v2231_v17 = vpop.f32.mrf.mxu0 }
 0x59f   : > { %v2344_v20 = vpop.f32.mrf.mxu1 }
 0x5a0   : > { %v5665_v21 = vadd.f32 %v5626_v23, %v2390_v10  ;;  %v2345_v37 = vadd.f32 %v2344_v20, %v2231_v17  ;;  %v4491_v17 = vmov 128.0  }
 0x5a1   : > { %4031 = vrcp.f32 %v4491_v17 }
 0x5a2   : > { %v5673_v0 = vadd.f32 %v5626_v23, %v2345_v37 }
 0x5a4   : > { %2501 = vadd.xlane.f32.xlu2 %v5665_v21  ;;  %v2279_v29 = vpop.f32.mrf.mxu2 }
 0x5a5   : > { %v2392_v30 = vpop.f32.mrf.mxu3 }
 0x5a6   : > { %v2393_v38 = vadd.f32 %v2392_v30, %v2279_v29  ;;  %v2234_v47 = vpop.f32.mrf.mxu0 }
 0x5a7   : > { %v2347_v48 = vpop.f32.mrf.mxu1 }
 0x5a8   : > { %v5669_v63 = vadd.f32 %v5626_v23, %v2393_v38  ;;  %v2348_v15 = vadd.f32 %v2347_v48, %v2234_v47  ;;  %v4032_v48 = vpop.eup %4031 }
 0x5a9   : > { %vm2530_vm4 = vweird.f32 %v4032_v48 }
 0x5aa   : > { %2503 = vadd.xlane.f32.xlu0 %v5669_v63  ;;  %v5677_v33 = vadd.f32 %v5626_v23, %v2348_v15 }
 0x5ac   : > { %2471 = vadd.xlane.f32.xlu2 %v5673_v0  ;;  %v2282_v16 = vpop.f32.mrf.mxu2 }
 0x5ad   : > { %v2395_v36 = vpop.f32.mrf.mxu3 }
 0x5ae   : > { %v2396_v19 = vadd.f32 %v2395_v36, %v2282_v16  ;;  %v2237_v14 = vpop.f32.mrf.mxu0 }
 0x5af   : > { %v2350_v12 = vpop.f32.mrf.mxu1 }
 0x5b0   : > { %v5680_v25 = vadd.f32 %v5626_v23, %v2396_v19  ;;  %v2351_v62 = vadd.f32 %v2350_v12, %v2237_v14  ;;  %v2526_v12 = vmul.f32 128.0, %v4032_v48 }
 0x5b2   : > { %2505 = vadd.xlane.f32.xlu1 %v5680_v25  ;;  %2473 = vadd.xlane.f32.xlu0 %v5677_v33  ;;  %v5685_v45 = vadd.f32 %v5626_v23, %v2351_v62 }
 0x5b4   : > { %v2285_v42 = vpop.f32.mrf.mxu2 }
 0x5b5   : > { %v2398_v34 = vpop.f32.mrf.mxu3 }
 0x5b6   : > { %v2399_v11 = vadd.f32 %v2398_v34, %v2285_v42  ;;  %v2240_v9 = vpop.f32.mrf.mxu0 }
 0x5b7   : > { %v2353_v7 = vpop.f32.mrf.mxu1 }
 0x5b8   : > { %v5688_v32 = vadd.f32 %v5626_v23, %v2399_v11  ;;  %v2354_v27 = vadd.f32 %v2353_v7, %v2240_v9  ;;  %v2527_v11 = vsub.f32 1.0, %v2526_v12 }
 0x5ba   : > { %2507 = vadd.xlane.f32.xlu2 %v5688_v32  ;;  %2475 = vadd.xlane.f32.xlu1 %v5685_v45  ;;  %v5693_v28 = vadd.f32 %v5626_v23, %v2354_v27 }
 0x5bc   : > { %v2288_v35 = vpop.f32.mrf.mxu2 }
 0x5bd   : > { %v2401_v51 = vpop.f32.mrf.mxu3 }
 0x5be   : > { %v2402_v53 = vadd.f32 %v2401_v51, %v2288_v35  ;;  %v2243_v57 = vpop.f32.mrf.mxu0 }
 0x5bf   : > { %v2356_v43 = vpop.f32.mrf.mxu1 }
 0x5c0   : > { %v5696_v50 = vadd.f32 %v5626_v23, %v2402_v53  ;;  %v2357_v52 = vadd.f32 %v2356_v43, %v2243_v57  ;;  %v2528_v53 = vmul.f32 %v4032_v48, %v2527_v11 }
 0x5c2   : > { %2477 = vadd.xlane.f32.xlu2 %v5693_v28  ;;  %2509 = vadd.xlane.f32.xlu0 %v5696_v50  ;;  %v5701_v3 = vadd.f32 %v5626_v23, %v2357_v52 }
 0x5c4   : > { %v2291_v49 = vpop.f32.mrf.mxu2 }
 0x5c5   : > { %v2404_v41 = vpop.f32.mrf.mxu3 }
 0x5c6   : > { %v2405_v26 = vadd.f32 %v2404_v41, %v2291_v49  ;;  %v2246_v46 = vpop.f32.mrf.mxu0  ;;  %v2529_v49 = vadd.f32 %v4032_v48, %v2528_v53 }
 0x5c7   : > { %v2359_v61 = vpop.f32.mrf.mxu1 }
 0x5c8   : > { %v5704_v44 = vadd.f32 %v5626_v23, %v2405_v26  ;;  %v2360_v56 = vadd.f32 %v2359_v61, %v2246_v46  ;;  %v5740_v61 = vsel %vm2530_vm4, %v4032_v48, %v2529_v49 }
 0x5ca   : > { %2511 = vadd.xlane.f32.xlu1 %v5704_v44  ;;  %2479 = vadd.xlane.f32.xlu0 %v5701_v3  ;;  %v5709_v4 = vadd.f32 %v5626_v23, %v2360_v56 }
 0x5cc   : > { %v2294_v24 = vpop.f32.mrf.mxu2 }
 0x5cd   : > { %v2407_v55 = vpop.f32.mrf.mxu3 }
 0x5ce   : > { %v2408_v5 = vadd.f32 %v2407_v55, %v2294_v24  ;;  %v2249_v40 = vpop.f32.mrf.mxu0 }
 0x5cf   : > { %v2362_v39 = vpop.f32.mrf.mxu1 }
 0x5d0   : > { %v5712_v60 = vadd.f32 %v5626_v23, %v2408_v5  ;;  %v2363_v2 = vadd.f32 %v2362_v39, %v2249_v40 }
 0x5d2   : > { %2513 = vadd.xlane.f32.xlu2 %v5712_v60  ;;  %2481 = vadd.xlane.f32.xlu1 %v5709_v4  ;;  %v5717_v29 = vadd.f32 %v5626_v23, %v2363_v2 }
 0x5d4   : > { %v2297_v31 = vpop.f32.mrf.mxu2 }
 0x5d5   : > { %v2410_v10 = vpop.f32.mrf.mxu3 }
 0x5d6   : > { %v2411_v20 = vadd.f32 %v2410_v10, %v2297_v31  ;;  %v2252_v30 = vpop.f32.mrf.mxu0 }
 0x5d7   : > { %v2365_v37 = vpop.f32.mrf.mxu1 }
 0x5d8   : > { %v5720_v38 = vadd.f32 %v5626_v23, %v2411_v20  ;;  %v2366_v47 = vadd.f32 %v2365_v37, %v2252_v30 }
 0x5da   : > { %2483 = vadd.xlane.f32.xlu2 %v5717_v29  ;;  %2515 = vadd.xlane.f32.xlu0 %v5720_v38  ;;  %v5725_v19 = vadd.f32 %v5626_v23, %v2366_v47 }
 0x5dc   : > { %v2300_v15 = vpop.f32.mrf.mxu2 }
 0x5dd   : > { %v2413_v16 = vpop.f32.mrf.mxu3 }
 0x5de   : > { %v2414_v36 = vadd.f32 %v2413_v16, %v2300_v15  ;;  %v2255_v14 = vpop.f32.mrf.mxu0 }
 0x5df   : > { %v2368_v62 = vpop.f32.mrf.mxu1 }
 0x5e0   : > { %v5728_v42 = vadd.f32 %v5626_v23, %v2414_v36  ;;  %v2369_v34 = vadd.f32 %v2368_v62, %v2255_v14 }
 0x5e2   : > { %2517 = vadd.xlane.f32.xlu1 %v5728_v42  ;;  %2485 = vadd.xlane.f32.xlu0 %v5725_v19  ;;  %v5733_v35 = vadd.f32 %v5626_v23, %v2369_v34 }
 0x5e4   : > { %v2303_v9 = vpop.f32.mrf.mxu2 }
 0x5e5   : > { %v2416_v7 = vpop.f32.mrf.mxu3 }
 0x5e6   : > { %v2417_v27 = vadd.f32 %v2416_v7, %v2303_v9  ;;  %v2258_v51 = vpop.f32.mrf.mxu0 }
 0x5e7   : > { %v2371_v57 = vpop.f32.mrf.mxu1 }
 0x5e8   : > { %v5736_v43 = vadd.f32 %v5626_v23, %v2417_v27  ;;  %v2372_v52 = vadd.f32 %v2371_v57, %v2258_v51 }
 0x5ea   : > { %2519 = vadd.xlane.f32.xlu2 %v5736_v43  ;;  %2487 = vadd.xlane.f32.xlu1 %v5733_v35  ;;  %v5743_v56 = vadd.f32 %v5626_v23, %v2372_v52 }
 0x5ec   : > { %v2306_v41 = vpop.f32.mrf.mxu2 }
 0x5ed   : > { %v2419_v26 = vpop.f32.mrf.mxu3 }
 0x5ee   : > { %v2420_v46 = vadd.f32 %v2419_v26, %v2306_v41  ;;  %v2261_v24 = vpop.f32.mrf.mxu0 }
 0x5ef   : > { %v2462_v55 = vpop.xlane.xlu0 %2461  ;;  %v2374_v5 = vpop.f32.mrf.mxu1 }
 0x5f0   : > { %v5746_v40 = vadd.f32 %v5626_v23, %v2420_v46  ;;  %v2532_v39 = vmul.f32 %v5740_v61, %v2462_v55  ;;  %v2375_v2 = vadd.f32 %v2374_v5, %v2261_v24 }
 0x5f2   : > { %2489 = vadd.xlane.f32.xlu2 %v5743_v56  ;;  %2521 = vadd.xlane.f32.xlu0 %v5746_v40  ;;  %v5752_v10 = vsub.f32 %v5629_v58, %v2532_v39  ;;  %v5755_v37 = vadd.f32 %v5626_v23, %v2375_v2 }
 0x5f4   : > { %v2309_v31 = vpop.f32.mrf.mxu2  ;;  %v2596_v15 = vmul.f32 %v5752_v10, %v5752_v10 }
 0x5f5   : > { %v2422_v17 = vpop.f32.mrf.mxu3  ;;  %v2494_v20 = vpop.xlane.xlu1 %2493 }
 0x5f6   : > { %v2423_v30 = vadd.f32 %v2422_v17, %v2309_v31  ;;  %v2548_v47 = vmul.f32 %v5740_v61, %v2494_v20 }
 0x5f7   : > { %v2464_v16 = vpop.xlane.xlu0 %2463 }
 0x5f8   : > { %v5759_v48 = vadd.f32 %v5626_v23, %v2423_v30  ;;  %v5766_v58 = vsub.f32 %v5633_v54, %v2548_v47  ;;  %v2533_v62 = vmul.f32 %v5740_v61, %v2464_v16 }
 0x5fa   : > { %2523 = vadd.xlane.f32.xlu1 %v5759_v48  ;;  %2491 = vadd.xlane.f32.xlu0 %v5755_v37  ;;  %v2612_v34 = vmul.f32 %v5766_v58, %v5766_v58  ;;  %v5779_v9 = vsub.f32 %v5637_v22, %v2533_v62 }
 0x5fb   : > { %2628 = vadd.xlane.f32.xlu2 %v2596_v15 }
 0x5fc   : > { %v2597_v57 = vmul.f32 %v5779_v9, %v5779_v9 }
 0x5fd   : > { %v2496_v36 = vpop.xlane.xlu2 %2495 }
 0x5fe   : > { %v2549_v14 = vmul.f32 %v5740_v61, %v2496_v36 }
 0x5ff   : > { %v2466_v12 = vpop.xlane.xlu1 %2465 }
 0x600   : > { %v5771_v23 = vsub.f32 %v5641_v13, %v2549_v14  ;;  %v2534_v11 = vmul.f32 %v5740_v61, %v2466_v12 }
 0x602   : > { %2660 = vadd.xlane.f32.xlu0 %v2612_v34  ;;  %v2613_v54 = vmul.f32 %v5771_v23, %v5771_v23  ;;  %v5782_v27 = vsub.f32 %v5645_v18, %v2534_v11 }
 0x604   : > { %2662 = vadd.xlane.f32.xlu1 %v2613_v54  ;;  %v2598_v22 = vmul.f32 %v5782_v27, %v5782_v27 }
 0x605   : > { %v2498_v7 = vpop.xlane.xlu0 %2497 }
 0x606   : > { %v2550_v13 = vmul.f32 %v5740_v61, %v2498_v7 }
 0x607   : > { %v2468_v51 = vpop.xlane.xlu1 %2467 }
 0x608   : > { %v5786_v53 = vsub.f32 %v5649_v6, %v2550_v13  ;;  %v2535_v52 = vmul.f32 %v5740_v61, %v2468_v51 }
 0x60a   : > { %2630 = vadd.xlane.f32.xlu0 %v2597_v57  ;;  %v2614_v49 = vmul.f32 %v5786_v53, %v5786_v53  ;;  %v5796_v18 = vsub.f32 %v5653_v8, %v2535_v52 }
 0x60c   : > { %2632 = vadd.xlane.f32.xlu1 %v2598_v22  ;;  %2664 = vadd.xlane.f32.xlu2 %v2614_v49  ;;  %v2599_v24 = vmul.f32 %v5796_v18, %v5796_v18 }
 0x60f   : > { %v2470_v41 = vpop.xlane.xlu2 %2469  ;;  %v2500_v6 = vpop.xlane.xlu1 %2499 }
 0x610   : > { %v2551_v26 = vmul.f32 %v5740_v61, %v2500_v6  ;;  %v2536_v55 = vmul.f32 %v5740_v61, %v2470_v41 }
 0x612   : > { %v5800_v46 = vsub.f32 %v5660_v59, %v2551_v26  ;;  %v5808_v8 = vsub.f32 %v5657_v1, %v2536_v55 }
 0x614   : > { %2634 = vadd.xlane.f32.xlu2 %v2599_v24  ;;  %v2615_v5 = vmul.f32 %v5800_v46, %v5800_v46  ;;  %v2600_v17 = vmul.f32 %v5808_v8, %v5808_v8 }
 0x616   : > { %2666 = vadd.xlane.f32.xlu0 %v2615_v5 }
 0x617   : > { %v2502_v39 = vpop.xlane.xlu2 %2501 }
 0x618   : > { %v2552_v2 = vmul.f32 %v5740_v61, %v2502_v39 }
 0x61a   : > { %v5812_v31 = vsub.f32 %v5665_v21, %v2552_v2 }
 0x61c   : > { %v2616_v59 = vmul.f32 %v5812_v31, %v5812_v31 }
 0x61d   : > { %v2504_v20 = vpop.xlane.xlu0 %2503 }
 0x61e   : > { %v2553_v30 = vmul.f32 %v5740_v61, %v2504_v20  ;;  %2668 = vadd.xlane.f32.xlu1 %v2616_v59  ;;  %2636 = vadd.xlane.f32.xlu0 %v2600_v17 }
 0x61f   : > { %v2472_v47 = vpop.xlane.xlu2 %2471 }
 0x620   : > { %v5820_v1 = vsub.f32 %v5669_v63, %v2553_v30  ;;  %v2537_v15 = vmul.f32 %v5740_v61, %v2472_v47 }
 0x622   : > { %v5824_v21 = vsub.f32 %v5673_v0, %v2537_v15  ;;  %v2617_v16 = vmul.f32 %v5820_v1, %v5820_v1 }
 0x624   : > { %2670 = vadd.xlane.f32.xlu2 %v2617_v16  ;;  %v2601_v36 = vmul.f32 %v5824_v21, %v5824_v21 }
 0x625   : > { %v2506_v14 = vpop.xlane.xlu1 %2505  ;;  %v2474_v12 = vpop.xlane.xlu0 %2473 }
 0x626   : > { %v2554_v62 = vmul.f32 %v5740_v61, %v2506_v14  ;;  %v2538_v34 = vmul.f32 %v5740_v61, %v2474_v12  ;;  %2638 = vadd.xlane.f32.xlu1 %v2601_v36 }
 0x628   : > { %v5833_v63 = vsub.f32 %v5680_v25, %v2554_v62  ;;  %v5836_v0 = vsub.f32 %v5677_v33, %v2538_v34 }
 0x62a   : > { %v2618_v11 = vmul.f32 %v5833_v63, %v5833_v63  ;;  %v2602_v54 = vmul.f32 %v5836_v0, %v5836_v0 }
 0x62c   : > { %2672 = vadd.xlane.f32.xlu0 %v2618_v11  ;;  %2640 = vadd.xlane.f32.xlu2 %v2602_v54 }
 0x62d   : > { %v2508_v7 = vpop.xlane.xlu2 %2507  ;;  %v2476_v13 = vpop.xlane.xlu1 %2475 }
 0x62e   : > { %v2555_v51 = vmul.f32 %v5740_v61, %v2508_v7  ;;  %v2539_v57 = vmul.f32 %v5740_v61, %v2476_v13 }
 0x630   : > { %v5845_v25 = vsub.f32 %v5688_v32, %v2555_v51  ;;  %v5848_v33 = vsub.f32 %v5685_v45, %v2539_v57 }
 0x632   : > { %v2619_v52 = vmul.f32 %v5845_v25, %v5845_v25  ;;  %v2603_v22 = vmul.f32 %v5848_v33, %v5848_v33 }
 0x634   : > { %2674 = vadd.xlane.f32.xlu1 %v2619_v52  ;;  %2642 = vadd.xlane.f32.xlu0 %v2603_v22 }
 0x635   : > { %v2478_v49 = vpop.xlane.xlu2 %2477  ;;  %v2510_v41 = vpop.xlane.xlu0 %2509 }
 0x636   : > { %v2540_v6 = vmul.f32 %v5740_v61, %v2478_v49  ;;  %v2556_v26 = vmul.f32 %v5740_v61, %v2510_v41 }
 0x638   : > { %v5857_v32 = vsub.f32 %v5693_v28, %v2540_v6  ;;  %v5860_v45 = vsub.f32 %v5696_v50, %v2556_v26 }
 0x63a   : > { %v2604_v24 = vmul.f32 %v5857_v32, %v5857_v32  ;;  %v2620_v55 = vmul.f32 %v5860_v45, %v5860_v45 }
 0x63c   : > { %2644 = vadd.xlane.f32.xlu1 %v2604_v24  ;;  %2676 = vadd.xlane.f32.xlu2 %v2620_v55 }
 0x63d   : > { %v2512_v5 = vpop.xlane.xlu1 %2511  ;;  %v2480_v39 = vpop.xlane.xlu0 %2479 }
 0x63e   : > { %v2557_v2 = vmul.f32 %v5740_v61, %v2512_v5  ;;  %v2541_v59 = vmul.f32 %v5740_v61, %v2480_v39 }
 0x640   : > { %v5869_v28 = vsub.f32 %v5704_v44, %v2557_v2  ;;  %v5872_v50 = vsub.f32 %v5701_v3, %v2541_v59 }
 0x642   : > { %v2621_v17 = vmul.f32 %v5869_v28, %v5869_v28  ;;  %v2605_v20 = vmul.f32 %v5872_v50, %v5872_v50 }
 0x644   : > { %2678 = vadd.xlane.f32.xlu0 %v2621_v17  ;;  %2646 = vadd.xlane.f32.xlu2 %v2605_v20 }
 0x645   : > { %v2514_v30 = vpop.xlane.xlu2 %2513  ;;  %v2482_v47 = vpop.xlane.xlu1 %2481 }
 0x646   : > { %v2558_v15 = vmul.f32 %v5740_v61, %v2514_v30  ;;  %v2542_v16 = vmul.f32 %v5740_v61, %v2482_v47 }
 0x648   : > { %v5881_v44 = vsub.f32 %v5712_v60, %v2558_v15  ;;  %v5884_v3 = vsub.f32 %v5709_v4, %v2542_v16 }
 0x64a   : > { %v2622_v36 = vmul.f32 %v5881_v44, %v5881_v44  ;;  %v2606_v14 = vmul.f32 %v5884_v3, %v5884_v3 }
 0x64c   : > { %2680 = vadd.xlane.f32.xlu1 %v2622_v36  ;;  %2648 = vadd.xlane.f32.xlu0 %v2606_v14 }
 0x64d   : > { %v2484_v12 = vpop.xlane.xlu2 %2483  ;;  %v2516_v62 = vpop.xlane.xlu0 %2515 }
 0x64e   : > { %v2543_v34 = vmul.f32 %v5740_v61, %v2484_v12  ;;  %v2559_v11 = vmul.f32 %v5740_v61, %v2516_v62 }
 0x650   : > { %v5893_v60 = vsub.f32 %v5717_v29, %v2543_v34  ;;  %v5896_v4 = vsub.f32 %v5720_v38, %v2559_v11 }
 0x652   : > { %v2607_v54 = vmul.f32 %v5893_v60, %v5893_v60  ;;  %v2623_v7 = vmul.f32 %v5896_v4, %v5896_v4 }
 0x654   : > { %2650 = vadd.xlane.f32.xlu1 %v2607_v54  ;;  %2682 = vadd.xlane.f32.xlu2 %v2623_v7 }
 0x655   : > { %v2518_v13 = vpop.xlane.xlu1 %2517  ;;  %v2486_v51 = vpop.xlane.xlu0 %2485 }
 0x656   : > { %v2560_v57 = vmul.f32 %v5740_v61, %v2518_v13  ;;  %v2544_v52 = vmul.f32 %v5740_v61, %v2486_v51 }
 0x658   : > { %v5905_v29 = vsub.f32 %v5728_v42, %v2560_v57  ;;  %v5908_v38 = vsub.f32 %v5725_v19, %v2544_v52 }
 0x65a   : > { %v2624_v22 = vmul.f32 %v5905_v29, %v5905_v29  ;;  %v2608_v49 = vmul.f32 %v5908_v38, %v5908_v38 }
 0x65c   : > { %2684 = vadd.xlane.f32.xlu0 %v2624_v22  ;;  %2652 = vadd.xlane.f32.xlu2 %v2608_v49 }
 0x65d   : > { %v2520_v41 = vpop.xlane.xlu2 %2519  ;;  %v2488_v6 = vpop.xlane.xlu1 %2487 }
 0x65e   : > { %v2545_v26 = vmul.f32 %v5740_v61, %v2488_v6  ;;  %v2561_v2 = vmul.f32 %v5740_v61, %v2520_v41 }
 0x660   : > { %v5916_v24 = vsub.f32 %v5733_v35, %v2545_v26  ;;  %v5928_v20 = vsub.f32 %v5736_v43, %v2561_v2 }
 0x662   : > { %v2609_v42 = vmul.f32 %v5916_v24, %v5916_v24  ;;  %v2625_v12 = vmul.f32 %v5928_v20, %v5928_v20 }
 0x664   : > { %2654 = vadd.xlane.f32.xlu0 %v2609_v42 }
 0x665   : > { %v2490_v19 = vpop.xlane.xlu2 %2489  ;;  %v2522_v55 = vpop.xlane.xlu0 %2521 }
 0x666   : > { %v2546_v5 = vmul.f32 %v5740_v61, %v2490_v19  ;;  %v2562_v34 = vmul.f32 %v5740_v61, %v2522_v55 }
 0x668   : > { %v5922_v39 = vsub.f32 %v5743_v56, %v2546_v5  ;;  %v5948_v11 = vsub.f32 %v5746_v40, %v2562_v34 }
 0x66a   : > { %v2610_v59 = vmul.f32 %v5922_v39, %v5922_v39  ;;  %v2626_v22 = vmul.f32 %v5948_v11, %v5948_v11 }
 0x66c   : > { %2656 = vadd.xlane.f32.xlu1 %v2610_v59 }
 0x66d   : > { %v2524_v17 = vpop.xlane.xlu1 %2523  ;;  %v2492_v35 = vpop.xlane.xlu0 %2491 }
 0x66e   : > { %v2563_v30 = vmul.f32 %v5740_v61, %v2524_v17  ;;  %v2629_v47 = vpop.xlane.xlu2 %2628  ;;  %v2547_v15 = vmul.f32 %v5740_v61, %v2492_v35 }
 0x66f   : > { %v2692_v16 = vmul.f32 %v2629_v47, %v5740_v61 }
 0x670   : > { %v5934_v56 = vsub.f32 %v5759_v48, %v2563_v30  ;;  %v5937_v36 = vsub.f32 %v5755_v37, %v2547_v15 }
 0x671   : > { %v2724_v14 = vadd.f32 1e-05, %v2692_v16 }
 0x672   : > { %v2627_v43 = vmul.f32 %v5934_v56, %v5934_v56  ;;  %v2611_v62 = vmul.f32 %v5937_v36, %v5937_v36 }
 0x673   : > { %4033 = vrsqrt.f32 %v2724_v14  ;;  %vm2762_vm6 = vweird.f32 %v2724_v14 }
 0x674   : > { %2686 = vadd.xlane.f32.xlu1 %v2625_v12  ;;  %2690 = vadd.xlane.f32.xlu0 %v2627_v43 }
 0x675   : > { %2658 = vadd.xlane.f32.xlu2 %v2611_v62  ;;  %v2661_v48 = vpop.xlane.xlu0 %2660 }
 0x676   : > { %v2708_v37 = vmul.f32 %v2661_v48, %v5740_v61 }
 0x677   : > { %v2663_v54 = vpop.xlane.xlu1 %2662 }
 0x678   : > { %v2740_v7 = vadd.f32 1e-05, %v2708_v37  ;;  %v2709_v13 = vmul.f32 %v2663_v54, %v5740_v61 }
 0x679   : > { %v4034_v51 = vpop.eup %4033 }
 0x67a   : > { %v2757_v57 = vmul.f32 %v4034_v51, %v2724_v14  ;;  %4035 = vrsqrt.f32 %v2740_v7  ;;  %v2741_v52 = vadd.f32 1e-05, %v2709_v13  ;;  %vm2763_vm5 = vweird.f32 %v4034_v51 }
 0x67b   : > { %vm2764_vm7 = vmor %vm2762_vm6, %vm2763_vm5  ;;  %vm2922_vm9 = vweird.f32 %v2740_v7 }
 0x67c   : > { %v2758_v49 = vmul.f32 %v4034_v51, %v2757_v57  ;;  %4037 = vrsqrt.f32 %v2741_v52  ;;  %vm2932_vm12 = vweird.f32 %v2741_v52 }
 0x67d   : > { %2688 = vadd.xlane.f32.xlu2 %v2626_v22  ;;  %v2631_v41 = vpop.xlane.xlu0 %2630 }
 0x67e   : > { %v2759_v6 = vmul.f32 0.5, %v2758_v49  ;;  %v2693_v26 = vmul.f32 %v2631_v41, %v5740_v61 }
 0x67f   : > { %v2633_v40 = vpop.xlane.xlu1 %2632  ;;  %v2665_v42 = vpop.xlane.xlu2 %2664 }
 0x680   : > { %v4036_v19 = vpop.eup %4035  ;;  %v2760_v55 = vsub.f32 1.5, %v2759_v6  ;;  %v5954_v5 = vadd.f32 1e-05, %v2693_v26  ;;  %v2694_v2 = vmul.f32 %v2633_v40, %v5740_v61  ;;  %v2710_v59 = vmul.f32 %v2665_v42, %v5740_v61 }
 0x681   : > { %v2917_v17 = vmul.f32 %v4036_v19, %v2740_v7  ;;  %vm2923_vm8 = vweird.f32 %v4036_v19 }
 0x682   : > { %v2761_v35 = vmul.f32 %v4034_v51, %v2760_v55  ;;  %4039 = vrsqrt.f32 %v5954_v5  ;;  %v5959_v30 = vadd.f32 1e-05, %v2694_v2  ;;  %v4038_v47 = vpop.eup %4037  ;;  %v5961_v16 = vadd.f32 1e-05, %v2710_v59  ;;  %vm2924_vm10 = vmor %vm2922_vm9, %vm2923_vm8 }
 0x683   : > { %v2918_v15 = vmul.f32 %v4036_v19, %v2917_v17  ;;  %v2927_v43 = vmul.f32 %v4038_v47, %v2741_v52  ;;  %vm2933_vm11 = vweird.f32 %v4038_v47  ;;  %vm2772_vm15 = vweird.f32 %v5954_v5 }
 0x684   : > { %v2765_v12 = vsel %vm2764_vm7, %v4034_v51, %v2761_v35  ;;  %4041 = vrsqrt.f32 %v5959_v30  ;;  %vm2934_vm13 = vmor %vm2932_vm12, %vm2933_vm11  ;;  %vm2782_vm3 = vweird.f32 %v5959_v30  ;;  %vm2942_vm5 = vweird.f32 %v5961_v16 }
 0x685   : > { %v3076_v62 = vmul.f32 %v2765_v12, %v5752_v10  ;;  %v2919_v34 = vmul.f32 0.5, %v2918_v15  ;;  %4043 = vrsqrt.f32 %v5961_v16  ;;  %v2928_v14 = vmul.f32 %v4038_v47, %v2927_v43 }
 0x687   : > { %v3108_v48 = vmax.f32 %v3076_v62, 0.0  ;;  %v2920_v37 = vsub.f32 1.5, %v2919_v34  ;;  %v2635_v54 = vpop.xlane.xlu2 %2634  ;;  %v2929_v57 = vmul.f32 0.5, %v2928_v14 }
 0x688   : > { %v4040_v13 = vpop.eup %4039  ;;  %v2695_v22 = vmul.f32 %v2635_v54, %v5740_v61 }
 0x689   : > { %3140 = vst [vmem:[%s4831_s9] sm:$0xff] %v3108_v48  ;;  %v2921_v49 = vmul.f32 %v4036_v19, %v2920_v37  ;;  %v2767_v51 = vmul.f32 %v4040_v13, %v5954_v5  ;;  %v2667_v41 = vpop.xlane.xlu0 %2666  ;;  %v2930_v10 = vsub.f32 1.5, %v2929_v57  ;;  %vm2773_vm14 = vweird.f32 %v4040_v13 }
 0x68a   : > { %v4042_v6 = vpop.eup %4041  ;;  %v5969_v26 = vadd.f32 1e-05, %v2695_v22  ;;  %v2711_v40 = vmul.f32 %v2667_v41, %v5740_v61  ;;  %vm2774_vm1 = vmor %vm2772_vm15, %vm2773_vm14 }
 0x68b   : > { %v4044_v42 = vpop.eup %4043  ;;  %v2925_v55 = vsel %vm2924_vm10, %v4036_v19, %v2921_v49  ;;  %v2768_v2 = vmul.f32 %v4040_v13, %v2767_v51  ;;  %v2777_v59 = vmul.f32 %v4042_v6, %v5959_v30  ;;  %v2931_v7 = vmul.f32 %v4038_v47, %v2930_v10 }
 0x68c   : > { %v3092_v17 = vmul.f32 %v2925_v55, %v5766_v58  ;;  %v2937_v35 = vmul.f32 %v4044_v42, %v5961_v16  ;;  %4045 = vrsqrt.f32 %v5969_v26  ;;  %v5976_v14 = vadd.f32 1e-05, %v2711_v40 }
 0x68d   : > { %v2769_v15 = vmul.f32 0.5, %v2768_v2  ;;  %v2778_v12 = vmul.f32 %v4042_v6, %v2777_v59  ;;  %v2935_v62 = vsel %vm2934_vm13, %v4038_v47, %v2931_v7  ;;  %vm2783_vm0 = vweird.f32 %v4042_v6 }
 0x68e   : > { %v3124_v43 = vmax.f32 %v3092_v17, 0.0  ;;  %v2938_v34 = vmul.f32 %v4044_v42, %v2937_v35  ;;  %v3093_v19 = vmul.f32 %v2935_v62, %v5771_v23  ;;  %4047 = vrsqrt.f32 %v5976_v14  ;;  %vm2784_vm4 = vmor %vm2782_vm3, %vm2783_vm0 }
 0x68f   : > { %v2770_v48 = vsub.f32 1.5, %v2769_v15  ;;  %v2779_v58 = vmul.f32 0.5, %v2778_v12  ;;  %vm2943_vm2 = vweird.f32 %v4044_v42  ;;  %vm2792_vm8 = vweird.f32 %v5969_v26 }
 0x690   : > { %3156 = vst [vmem:[%s4831_s9 + $0x80] sm:$0xff] %v3124_v43  ;;  %v2939_v52 = vmul.f32 0.5, %v2938_v34  ;;  %v3125_v37 = vmax.f32 %v3093_v19, 0.0  ;;  %vm2944_vm6 = vmor %vm2942_vm5, %vm2943_vm2  ;;  %vm2952_vm11 = vweird.f32 %v5976_v14 }
 0x691   : > { %v2771_v54 = vmul.f32 %v4040_v13, %v2770_v48  ;;  %v2780_v57 = vsub.f32 1.5, %v2779_v58  ;;  %v2669_v47 = vpop.xlane.xlu1 %2668  ;;  %v2637_v22 = vpop.xlane.xlu0 %2636 }
 0x692   : > { %v2940_v49 = vsub.f32 1.5, %v2939_v52  ;;  %v2712_v23 = vmul.f32 %v2669_v47, %v5740_v61  ;;  %v2696_v51 = vmul.f32 %v2637_v22, %v5740_v61  ;;  %v4046_v41 = vpop.eup %4045  ;;  %3157 = vst [vmem:[%s4831_s9 + $0x88] sm:$0xff] %v3125_v37 }
 0x693   : > { %v2775_v10 = vsel %vm2774_vm1, %v4040_v13, %v2771_v54  ;;  %v2781_v5 = vmul.f32 %v4042_v6, %v2780_v57  ;;  %v2787_v2 = vmul.f32 %v4046_v41, %v5969_v26  ;;  %vm2793_vm7 = vweird.f32 %v4046_v41 }
 0x694   : > { %v3077_v40 = vmul.f32 %v2775_v10, %v5779_v9  ;;  %v2941_v55 = vmul.f32 %v4044_v42, %v2940_v49  ;;  %v5989_v17 = vadd.f32 1e-05, %v2712_v23  ;;  %v5991_v7 = vadd.f32 1e-05, %v2696_v51  ;;  %v4048_v35 = vpop.eup %4047  ;;  %vm2794_vm9 = vmor %vm2792_vm8, %vm2793_vm7 }
 0x695   : > { %v2785_v59 = vsel %vm2784_vm4, %v4042_v6, %v2781_v5  ;;  %v2788_v9 = vmul.f32 %v4046_v41, %v2787_v2  ;;  %v2947_v16 = vmul.f32 %v4048_v35, %v5976_v14  ;;  %vm2953_vm10 = vweird.f32 %v4048_v35 }
 0x696   : > { %v3109_v13 = vmax.f32 %v3077_v40, 0.0  ;;  %v3078_v30 = vmul.f32 %v2785_v59, %v5782_v27  ;;  %v2945_v15 = vsel %vm2944_vm6, %v4044_v42, %v2941_v55  ;;  %4049 = vrsqrt.f32 %v5989_v17  ;;  %vm2954_vm12 = vmor %vm2952_vm11, %vm2953_vm10 }
 0x697   : > { %v3094_v12 = vmul.f32 %v2945_v15, %v5786_v53  ;;  %v2671_v6 = vpop.xlane.xlu2 %2670  ;;  %v2789_v62 = vmul.f32 0.5, %v2788_v9  ;;  %4051 = vrsqrt.f32 %v5991_v7  ;;  %v2948_v19 = vmul.f32 %v4048_v35, %v2947_v16 }
 0x698   : > { %3141 = vst [vmem:[%s4831_s9 + $0x8] sm:$0xff] %v3109_v13  ;;  %v3110_v43 = vmax.f32 %v3078_v30, 0.0  ;;  %v2713_v48 = vmul.f32 %v2671_v6, %v5740_v61  ;;  %vm2962_vm15 = vweird.f32 %v5989_v17  ;;  %vm2802_vm1 = vweird.f32 %v5991_v7 }
 0x699   : > { %v3126_v34 = vmax.f32 %v3094_v12, 0.0  ;;  %v2639_v27 = vpop.xlane.xlu1 %2638  ;;  %v2790_v42 = vsub.f32 1.5, %v2789_v62  ;;  %v2949_v58 = vmul.f32 0.5, %v2948_v19 }
 0x69a   : > { %3142 = vst [vmem:[%s4831_s9 + $0x10] sm:$0xff] %v3110_v43  ;;  %v2697_v53 = vmul.f32 %v2639_v27, %v5740_v61  ;;  %v6003_v52 = vadd.f32 1e-05, %v2713_v48 }
 0x69b   : > { %3158 = vst [vmem:[%s4831_s9 + $0x90] sm:$0xff] %v3126_v34  ;;  %v2791_v37 = vmul.f32 %v4046_v41, %v2790_v42  ;;  %v2950_v47 = vsub.f32 1.5, %v2949_v58 }
 0x69c   : > { %v6006_v54 = vadd.f32 1e-05, %v2697_v53  ;;  %v4050_v57 = vpop.eup %4049  ;;  %4053 = vrsqrt.f32 %v6003_v52  ;;  %vm2972_vm5 = vweird.f32 %v6003_v52 }
 0x69d   : > { %v4052_v22 = vpop.eup %4051  ;;  %v2795_v49 = vsel %vm2794_vm9, %v4046_v41, %v2791_v37  ;;  %v2957_v23 = vmul.f32 %v4050_v57, %v5989_v17  ;;  %v2951_v10 = vmul.f32 %v4048_v35, %v2950_v47  ;;  %vm2963_vm13 = vweird.f32 %v4050_v57 }
 0x69e   : > { %4055 = vrsqrt.f32 %v6006_v54  ;;  %v3079_v51 = vmul.f32 %v2795_v49, %v5796_v18  ;;  %v2797_v26 = vmul.f32 %v4052_v22, %v5991_v7  ;;  %vm2803_vm14 = vweird.f32 %v4052_v22  ;;  %vm2964_vm0 = vmor %vm2962_vm15, %vm2963_vm13 }
 0x69f   : > { %v2641_v5 = vpop.xlane.xlu2 %2640  ;;  %v2673_v40 = vpop.xlane.xlu0 %2672  ;;  %v2958_v55 = vmul.f32 %v4050_v57, %v2957_v23  ;;  %v2955_v13 = vsel %vm2954_vm12, %v4048_v35, %v2951_v10  ;;  %vm2804_vm2 = vmor %vm2802_vm1, %vm2803_vm14  ;;  %vm2812_vm7 = vweird.f32 %v6006_v54 }
 0x6a0   : > { %v2698_v2 = vmul.f32 %v2641_v5, %v5740_v61  ;;  %v2714_v41 = vmul.f32 %v2673_v40, %v5740_v61  ;;  %v3111_v59 = vmax.f32 %v3079_v51, 0.0  ;;  %v2798_v30 = vmul.f32 %v4052_v22, %v2797_v26 }
 0x6a1   : > { %v3095_v15 = vmul.f32 %v2955_v13, %v5800_v46  ;;  %v2959_v18 = vmul.f32 0.5, %v2958_v55 }
 0x6a2   : > { %v6017_v9 = vadd.f32 1e-05, %v2698_v2  ;;  %v6019_v14 = vadd.f32 1e-05, %v2714_v41  ;;  %v4054_v12 = vpop.eup %4053  ;;  %3143 = vst [vmem:[%s4831_s9 + $0x18] sm:$0xff] %v3111_v59  ;;  %v2799_v16 = vmul.f32 0.5, %v2798_v30 }
 0x6a3   : > { %v3127_v43 = vmax.f32 %v3095_v15, 0.0  ;;  %v2960_v62 = vsub.f32 1.5, %v2959_v18  ;;  %v2967_v34 = vmul.f32 %v4054_v12, %v6003_v52  ;;  %vm2973_vm3 = vweird.f32 %v4054_v12 }
 0x6a4   : > { %v4056_v6 = vpop.eup %4055  ;;  %v2800_v19 = vsub.f32 1.5, %v2799_v16  ;;  %4057 = vrsqrt.f32 %v6017_v9  ;;  %vm2974_vm6 = vmor %vm2972_vm5, %vm2973_vm3  ;;  %vm2822_vm11 = vweird.f32 %v6017_v9  ;;  %vm2982_vm13 = vweird.f32 %v6019_v14 }
 0x6a5   : > { %v2807_v35 = vmul.f32 %v4056_v6, %v6006_v54  ;;  %3159 = vst [vmem:[%s4831_s9 + $0x98] sm:$0xff] %v3127_v43  ;;  %v2961_v46 = vmul.f32 %v4050_v57, %v2960_v62  ;;  %v2968_v48 = vmul.f32 %v4054_v12, %v2967_v34  ;;  %4059 = vrsqrt.f32 %v6019_v14 }
 0x6a6   : > { %v2801_v27 = vmul.f32 %v4052_v22, %v2800_v19  ;;  %vm2813_vm4 = vweird.f32 %v4056_v6 }
 0x6a7   : > { %v2808_v42 = vmul.f32 %v4056_v6, %v2807_v35  ;;  %v2675_v53 = vpop.xlane.xlu1 %2674  ;;  %v2643_v58 = vpop.xlane.xlu0 %2642  ;;  %v2965_v37 = vsel %vm2964_vm0, %v4050_v57, %v2961_v46  ;;  %v2969_v47 = vmul.f32 0.5, %v2968_v48  ;;  %vm2814_vm8 = vmor %vm2812_vm7, %vm2813_vm4 }
 0x6a8   : > { %v2715_v49 = vmul.f32 %v2675_v53, %v5740_v61  ;;  %v2699_v23 = vmul.f32 %v2643_v58, %v5740_v61  ;;  %v3096_v17 = vmul.f32 %v2965_v37, %v5812_v31  ;;  %v2805_v51 = vsel %vm2804_vm2, %v4052_v22, %v2801_v27 }
 0x6a9   : > { %v2809_v10 = vmul.f32 0.5, %v2808_v42  ;;  %v3080_v26 = vmul.f32 %v2805_v51, %v5808_v8  ;;  %v2970_v7 = vsub.f32 1.5, %v2969_v47 }
 0x6aa   : > { %v6034_v5 = vadd.f32 1e-05, %v2715_v49  ;;  %v6036_v40 = vadd.f32 1e-05, %v2699_v23  ;;  %v4058_v57 = vpop.eup %4057  ;;  %v3128_v55 = vmax.f32 %v3096_v17, 0.0 }
 0x6ab   : > { %v2810_v2 = vsub.f32 1.5, %v2809_v10  ;;  %v4060_v41 = vpop.eup %4059  ;;  %v3112_v59 = vmax.f32 %v3080_v26, 0.0  ;;  %v2971_v13 = vmul.f32 %v4054_v12, %v2970_v7  ;;  %v2817_v31 = vmul.f32 %v4058_v57, %v6017_v9 }
 0x6ac   : > { %3160 = vst [vmem:[%s4831_s9 + $0xa0] sm:$0xff] %v3128_v55  ;;  %v2977_v22 = vmul.f32 %v4060_v41, %v6019_v14  ;;  %4061 = vrsqrt.f32 %v6034_v5  ;;  %vm2823_vm9 = vweird.f32 %v4058_v57  ;;  %vm2983_vm10 = vweird.f32 %v4060_v41 }
 0x6ad   : > { %v2811_v8 = vmul.f32 %v4056_v6, %v2810_v2  ;;  %3144 = vst [vmem:[%s4831_s9 + $0x20] sm:$0xff] %v3112_v59  ;;  %v2975_v30 = vsel %vm2974_vm6, %v4054_v12, %v2971_v13  ;;  %v2818_v15 = vmul.f32 %v4058_v57, %v2817_v31  ;;  %4063 = vrsqrt.f32 %v6036_v40  ;;  %vm2824_vm12 = vmor %vm2822_vm11, %vm2823_vm9 }
 0x6ae   : > { %v3097_v52 = vmul.f32 %v2975_v30, %v5820_v1  ;;  %v2978_v16 = vmul.f32 %v4060_v41, %v2977_v22  ;;  %vm2984_vm14 = vmor %vm2982_vm13, %vm2983_vm10  ;;  %vm2992_vm1 = vweird.f32 %v6034_v5  ;;  %vm2832_vm3 = vweird.f32 %v6036_v40 }
 0x6af   : > { %v2815_v18 = vsel %vm2814_vm8, %v4056_v6, %v2811_v8  ;;  %v2645_v43 = vpop.xlane.xlu1 %2644  ;;  %v2677_v62 = vpop.xlane.xlu2 %2676  ;;  %v2819_v54 = vmul.f32 0.5, %v2818_v15 }
 0x6b0   : > { %v3081_v34 = vmul.f32 %v2815_v18, %v5824_v21  ;;  %v2700_v19 = vmul.f32 %v2645_v43, %v5740_v61  ;;  %v2716_v35 = vmul.f32 %v2677_v62, %v5740_v61  ;;  %v3129_v12 = vmax.f32 %v3097_v52, 0.0 }
 0x6b1   : > { %v2979_v46 = vmul.f32 0.5, %v2978_v16  ;;  %v2820_v27 = vsub.f32 1.5, %v2819_v54 }
 0x6b2   : > { %v3113_v48 = vmax.f32 %v3081_v34, 0.0  ;;  %v6051_v42 = vadd.f32 1e-05, %v2700_v19  ;;  %v6053_v1 = vadd.f32 1e-05, %v2716_v35  ;;  %v4062_v6 = vpop.eup %4061  ;;  %3161 = vst [vmem:[%s4831_s9 + $0xa8] sm:$0xff] %v3129_v12 }
 0x6b3   : > { %v2980_v53 = vsub.f32 1.5, %v2979_v46  ;;  %v4064_v21 = vpop.eup %4063  ;;  %v2821_v58 = vmul.f32 %v4058_v57, %v2820_v27  ;;  %v2987_v37 = vmul.f32 %v4062_v6, %v6034_v5  ;;  %vm2993_vm15 = vweird.f32 %v4062_v6 }
 0x6b4   : > { %3145 = vst [vmem:[%s4831_s9 + $0x28] sm:$0xff] %v3113_v48  ;;  %4065 = vrsqrt.f32 %v6051_v42  ;;  %v2827_v49 = vmul.f32 %v4064_v21, %v6036_v40  ;;  %vm2833_vm0 = vweird.f32 %v4064_v21  ;;  %vm2994_vm2 = vmor %vm2992_vm1, %vm2993_vm15  ;;  %vm2842_vm6 = vweird.f32 %v6051_v42 }
 0x6b5   : > { %v2981_v47 = vmul.f32 %v4060_v41, %v2980_v53  ;;  %v2825_v23 = vsel %vm2824_vm12, %v4058_v57, %v2821_v58  ;;  %v2988_v17 = vmul.f32 %v4062_v6, %v2987_v37  ;;  %4067 = vrsqrt.f32 %v6053_v1  ;;  %vm2834_vm4 = vmor %vm2832_vm3, %vm2833_vm0 }
 0x6b6   : > { %v3082_v51 = vmul.f32 %v2825_v23, %v5836_v0  ;;  %v2828_v9 = vmul.f32 %v4064_v21, %v2827_v49  ;;  %vm3002_vm9 = vweird.f32 %v6053_v1 }
 0x6b7   : > { %v2985_v10 = vsel %vm2984_vm14, %v4060_v41, %v2981_v47  ;;  %v2647_v26 = vpop.xlane.xlu2 %2646  ;;  %v2679_v7 = vpop.xlane.xlu0 %2678  ;;  %v2989_v2 = vmul.f32 0.5, %v2988_v17 }
 0x6b8   : > { %v3098_v55 = vmul.f32 %v2985_v10, %v5833_v63  ;;  %v2701_v14 = vmul.f32 %v2647_v26, %v5740_v61  ;;  %v2717_v59 = vmul.f32 %v2679_v7, %v5740_v61  ;;  %v3114_v57 = vmax.f32 %v3082_v51, 0.0 }
 0x6b9   : > { %v2829_v13 = vmul.f32 0.5, %v2828_v9  ;;  %v2990_v22 = vsub.f32 1.5, %v2989_v2 }
 0x6ba   : > { %v4066_v31 = vpop.eup %4065  ;;  %v3130_v8 = vmax.f32 %v3098_v55, 0.0  ;;  %v6068_v0 = vadd.f32 1e-05, %v2701_v14  ;;  %v6070_v41 = vadd.f32 1e-05, %v2717_v59  ;;  %3146 = vst [vmem:[%s4831_s9 + $0x30] sm:$0xff] %v3114_v57 }
 0x6bb   : > { %v2830_v30 = vsub.f32 1.5, %v2829_v13  ;;  %v2837_v63 = vmul.f32 %v4066_v31, %v6051_v42  ;;  %v4068_v15 = vpop.eup %4067  ;;  %v2991_v52 = vmul.f32 %v4062_v6, %v2990_v22  ;;  %vm2843_vm5 = vweird.f32 %v4066_v31 }
 0x6bc   : > { %3162 = vst [vmem:[%s4831_s9 + $0xb0] sm:$0xff] %v3130_v8  ;;  %4069 = vrsqrt.f32 %v6068_v0  ;;  %v2997_v43 = vmul.f32 %v4068_v15, %v6053_v1  ;;  %vm3003_vm7 = vweird.f32 %v4068_v15  ;;  %vm2844_vm8 = vmor %vm2842_vm6, %vm2843_vm5  ;;  %vm2852_vm12 = vweird.f32 %v6068_v0 }
 0x6bd   : > { %v2831_v18 = vmul.f32 %v4064_v21, %v2830_v30  ;;  %v2838_v16 = vmul.f32 %v4066_v31, %v2837_v63  ;;  %v2995_v62 = vsel %vm2994_vm2, %v4062_v6, %v2991_v52  ;;  %4071 = vrsqrt.f32 %v6070_v41  ;;  %vm3004_vm10 = vmor %vm3002_vm9, %vm3003_vm7 }
 0x6be   : > { %v3099_v34 = vmul.f32 %v2995_v62, %v5845_v25  ;;  %v2998_v5 = vmul.f32 %v4068_v15, %v2997_v43  ;;  %vm3012_vm15 = vweird.f32 %v6070_v41 }
 0x6bf   : > { %v2835_v54 = vsel %vm2834_vm4, %v4064_v21, %v2831_v18  ;;  %v2839_v19 = vmul.f32 0.5, %v2838_v16  ;;  %v2681_v35 = vpop.xlane.xlu1 %2680  ;;  %v2649_v12 = vpop.xlane.xlu0 %2648 }
 0x6c0   : > { %v3083_v46 = vmul.f32 %v2835_v54, %v5848_v33  ;;  %v2718_v48 = vmul.f32 %v2681_v35, %v5740_v61  ;;  %v2702_v40 = vmul.f32 %v2649_v12, %v5740_v61  ;;  %v3131_v27 = vmax.f32 %v3099_v34, 0.0 }
 0x6c1   : > { %v2840_v6 = vsub.f32 1.5, %v2839_v19  ;;  %v2999_v53 = vmul.f32 0.5, %v2998_v5 }
 0x6c2   : > { %v4070_v58 = vpop.eup %4069  ;;  %v3115_v37 = vmax.f32 %v3083_v46, 0.0  ;;  %v6086_v25 = vadd.f32 1e-05, %v2718_v48  ;;  %v6088_v21 = vadd.f32 1e-05, %v2702_v40  ;;  %3163 = vst [vmem:[%s4831_s9 + $0xb8] sm:$0xff] %v3131_v27 }
 0x6c3   : > { %v2841_v47 = vmul.f32 %v4066_v31, %v2840_v6  ;;  %v3000_v33 = vsub.f32 1.5, %v2999_v53  ;;  %v2847_v49 = vmul.f32 %v4070_v58, %v6068_v0  ;;  %v4072_v23 = vpop.eup %4071  ;;  %vm2853_vm11 = vweird.f32 %v4070_v58 }
 0x6c4   : > { %3147 = vst [vmem:[%s4831_s9 + $0x38] sm:$0xff] %v3115_v37  ;;  %4073 = vrsqrt.f32 %v6086_v25  ;;  %v3007_v10 = vmul.f32 %v4072_v23, %v6070_v41  ;;  %vm3013_vm13 = vweird.f32 %v4072_v23  ;;  %vm2854_vm14 = vmor %vm2852_vm12, %vm2853_vm11  ;;  %vm3022_vm2 = vweird.f32 %v6086_v25 }
 0x6c5   : > { %v2845_v17 = vsel %vm2844_vm8, %v4066_v31, %v2841_v47  ;;  %v3001_v51 = vmul.f32 %v4068_v15, %v3000_v33  ;;  %v2848_v42 = vmul.f32 %v4070_v58, %v2847_v49  ;;  %4075 = vrsqrt.f32 %v6088_v21  ;;  %vm3014_vm0 = vmor %vm3012_vm15, %vm3013_vm13 }
 0x6c6   : > { %v3084_v9 = vmul.f32 %v2845_v17, %v5857_v32  ;;  %v3008_v55 = vmul.f32 %v4072_v23, %v3007_v10  ;;  %vm2862_vm5 = vweird.f32 %v6088_v21 }
 0x6c7   : > { %v3005_v26 = vsel %vm3004_vm10, %v4068_v15, %v3001_v51  ;;  %v2849_v7 = vmul.f32 0.5, %v2848_v42  ;;  %v2651_v2 = vpop.xlane.xlu1 %2650  ;;  %v2683_v14 = vpop.xlane.xlu2 %2682 }
 0x6c8   : > { %v3116_v59 = vmax.f32 %v3084_v9, 0.0  ;;  %v3100_v1 = vmul.f32 %v3005_v26, %v5860_v45  ;;  %v2703_v57 = vmul.f32 %v2651_v2, %v5740_v61  ;;  %v2719_v13 = vmul.f32 %v2683_v14, %v5740_v61 }
 0x6c9   : > { %v2850_v31 = vsub.f32 1.5, %v2849_v7  ;;  %v3009_v32 = vmul.f32 0.5, %v3008_v55 }
 0x6ca   : > { %v4074_v8 = vpop.eup %4073  ;;  %3148 = vst [vmem:[%s4831_s9 + $0x40] sm:$0xff] %v3116_v59  ;;  %v3132_v22 = vmax.f32 %v3100_v1, 0.0  ;;  %v6103_v30 = vadd.f32 1e-05, %v2703_v57  ;;  %v6105_v63 = vadd.f32 1e-05, %v2719_v13 }
 0x6cb   : > { %v2851_v15 = vmul.f32 %v4070_v58, %v2850_v31  ;;  %v3010_v52 = vsub.f32 1.5, %v3009_v32  ;;  %v3017_v45 = vmul.f32 %v4074_v8, %v6086_v25  ;;  %v4076_v18 = vpop.eup %4075  ;;  %vm3023_vm1 = vweird.f32 %v4074_v8 }
 0x6cc   : > { %3164 = vst [vmem:[%s4831_s9 + $0xc0] sm:$0xff] %v3132_v22  ;;  %4077 = vrsqrt.f32 %v6103_v30  ;;  %v2857_v0 = vmul.f32 %v4076_v18, %v6088_v21  ;;  %vm2863_vm3 = vweird.f32 %v4076_v18  ;;  %vm3024_vm4 = vmor %vm3022_vm2, %vm3023_vm1  ;;  %vm2872_vm8 = vweird.f32 %v6103_v30 }
 0x6cd   : > { %v2855_v16 = vsel %vm2854_vm14, %v4070_v58, %v2851_v15  ;;  %v3011_v43 = vmul.f32 %v4072_v23, %v3010_v52  ;;  %v3018_v62 = vmul.f32 %v4074_v8, %v3017_v45  ;;  %4079 = vrsqrt.f32 %v6105_v63  ;;  %vm2864_vm6 = vmor %vm2862_vm5, %vm2863_vm3 }
 0x6ce   : > { %v3085_v34 = vmul.f32 %v2855_v16, %v5872_v50  ;;  %v2858_v5 = vmul.f32 %v4076_v18, %v2857_v0  ;;  %vm3032_vm11 = vweird.f32 %v6105_v63 }
 0x6cf   : > { %v3015_v54 = vsel %vm3014_vm0, %v4072_v23, %v3011_v43  ;;  %v3019_v19 = vmul.f32 0.5, %v3018_v62  ;;  %v2653_v35 = vpop.xlane.xlu2 %2652  ;;  %v2685_v12 = vpop.xlane.xlu0 %2684 }
 0x6d0   : > { %v3117_v46 = vmax.f32 %v3085_v34, 0.0  ;;  %v3101_v41 = vmul.f32 %v3015_v54, %v5869_v28  ;;  %v2704_v48 = vmul.f32 %v2653_v35, %v5740_v61  ;;  %v2720_v40 = vmul.f32 %v2685_v12, %v5740_v61 }
 0x6d1   : > { %v3020_v27 = vsub.f32 1.5, %v3019_v19  ;;  %v2859_v50 = vmul.f32 0.5, %v2858_v5 }
 0x6d2   : > { %v4078_v6 = vpop.eup %4077  ;;  %3149 = vst [vmem:[%s4831_s9 + $0x48] sm:$0xff] %v3117_v46  ;;  %v3133_v53 = vmax.f32 %v3101_v41, 0.0  ;;  %v6119_v58 = vadd.f32 1e-05, %v2704_v48  ;;  %v6121_v37 = vadd.f32 1e-05, %v2720_v40 }
 0x6d3   : > { %v3021_v47 = vmul.f32 %v4074_v8, %v3020_v27  ;;  %v2860_v33 = vsub.f32 1.5, %v2859_v50  ;;  %v2867_v28 = vmul.f32 %v4078_v6, %v6103_v30  ;;  %v4080_v49 = vpop.eup %4079  ;;  %vm2873_vm7 = vweird.f32 %v4078_v6 }
 0x6d4   : > { %3165 = vst [vmem:[%s4831_s9 + $0xc8] sm:$0xff] %v3133_v53  ;;  %4081 = vrsqrt.f32 %v6119_v58  ;;  %v3027_v25 = vmul.f32 %v4080_v49, %v6105_v63  ;;  %vm3033_vm9 = vweird.f32 %v4080_v49  ;;  %vm2874_vm10 = vmor %vm2872_vm8, %vm2873_vm7  ;;  %vm2882_vm14 = vweird.f32 %v6119_v58 }
 0x6d5   : > { %v3025_v23 = vsel %vm3024_vm4, %v4074_v8, %v3021_v47  ;;  %v2861_v17 = vmul.f32 %v4076_v18, %v2860_v33  ;;  %v2868_v51 = vmul.f32 %v4078_v6, %v2867_v28  ;;  %4083 = vrsqrt.f32 %v6121_v37  ;;  %vm3034_vm12 = vmor %vm3032_vm11, %vm3033_vm9 }
 0x6d6   : > { %v3102_v42 = vmul.f32 %v3025_v23, %v5881_v44  ;;  %v3028_v26 = vmul.f32 %v4080_v49, %v3027_v25  ;;  %vm3042_vm1 = vweird.f32 %v6121_v37 }
 0x6d7   : > { %v2865_v10 = vsel %vm2864_vm6, %v4076_v18, %v2861_v17  ;;  %v2869_v9 = vmul.f32 0.5, %v2868_v51  ;;  %v2655_v7 = vpop.xlane.xlu0 %2654 }
 0x6d8   : > { %v3134_v55 = vmax.f32 %v3102_v42, 0.0  ;;  %v3086_v21 = vmul.f32 %v2865_v10, %v5884_v3  ;;  %v2705_v2 = vmul.f32 %v2655_v7, %v5740_v61  ;;  %v3029_v59 = vmul.f32 0.5, %v3028_v26 }
 0x6d9   : > { %v2870_v14 = vsub.f32 1.5, %v2869_v9 }
 0x6da   : > { %v4082_v1 = vpop.eup %4081  ;;  %3166 = vst [vmem:[%s4831_s9 + $0xd0] sm:$0xff] %v3134_v55  ;;  %v3118_v57 = vmax.f32 %v3086_v21, 0.0  ;;  %v6134_v44 = vadd.f32 1e-05, %v2705_v2  ;;  %v3030_v31 = vsub.f32 1.5, %v3029_v59 }
 0x6db   : > { %v2871_v13 = vmul.f32 %v4078_v6, %v2870_v14  ;;  %v2877_v32 = vmul.f32 %v4082_v1, %v6119_v58  ;;  %v4084_v8 = vpop.eup %4083  ;;  %vm2883_vm13 = vweird.f32 %v4082_v1 }
 0x6dc   : > { %3150 = vst [vmem:[%s4831_s9 + $0x50] sm:$0xff] %v3118_v57  ;;  %4085 = vrsqrt.f32 %v6134_v44  ;;  %v3031_v22 = vmul.f32 %v4080_v49, %v3030_v31  ;;  %v3037_v30 = vmul.f32 %v4084_v8, %v6121_v37  ;;  %vm3043_vm15 = vweird.f32 %v4084_v8  ;;  %vm2884_vm0 = vmor %vm2882_vm14, %vm2883_vm13 }
 0x6dd   : > { %v2875_v3 = vsel %vm2874_vm10, %v4078_v6, %v2871_v13  ;;  %v2878_v15 = vmul.f32 %v4082_v1, %v2877_v32  ;;  %vm3044_vm2 = vmor %vm3042_vm1, %vm3043_vm15  ;;  %vm2892_vm4 = vweird.f32 %v6134_v44 }
 0x6de   : > { %v3087_v52 = vmul.f32 %v2875_v3, %v5893_v60  ;;  %v3035_v45 = vsel %vm3034_vm12, %v4080_v49, %v3031_v22  ;;  %v3038_v16 = vmul.f32 %v4084_v8, %v3037_v30 }
 0x6df   : > { %v2879_v18 = vmul.f32 0.5, %v2878_v15  ;;  %v2657_v43 = vpop.xlane.xlu1 %2656  ;;  %v3103_v0 = vmul.f32 %v3035_v45, %v5896_v4 }
 0x6e0   : > { %v3119_v62 = vmax.f32 %v3087_v52, 0.0  ;;  %v2706_v63 = vmul.f32 %v2657_v43, %v5740_v61  ;;  %v3039_v54 = vmul.f32 0.5, %v3038_v16 }
 0x6e1   : > { %v2880_v34 = vsub.f32 1.5, %v2879_v18  ;;  %v3135_v5 = vmax.f32 %v3103_v0, 0.0 }
 0x6e2   : > { %v4086_v19 = vpop.eup %4085  ;;  %3151 = vst [vmem:[%s4831_s9 + $0x58] sm:$0xff] %v3119_v62  ;;  %v2738_v60 = vadd.f32 1e-05, %v2706_v63  ;;  %v3040_v12 = vsub.f32 1.5, %v3039_v54 }
 0x6e3   : > { %v2881_v35 = vmul.f32 %v4082_v1, %v2880_v34  ;;  %v2887_v46 = vmul.f32 %v4086_v19, %v6134_v44  ;;  %3167 = vst [vmem:[%s4831_s9 + $0xd8] sm:$0xff] %v3135_v5  ;;  %vm2893_vm3 = vweird.f32 %v4086_v19 }
 0x6e4   : > { %4087 = vrsqrt.f32 %v2738_v60  ;;  %v3041_v41 = vmul.f32 %v4084_v8, %v3040_v12  ;;  %vm2894_vm5 = vmor %vm2892_vm4, %vm2893_vm3  ;;  %vm2902_vm7 = vweird.f32 %v2738_v60 }
 0x6e5   : > { %v2885_v4 = vsel %vm2884_vm0, %v4082_v1, %v2881_v35  ;;  %v2888_v48 = vmul.f32 %v4086_v19, %v2887_v46 }
 0x6e6   : > { %v3088_v40 = vmul.f32 %v2885_v4, %v5908_v38  ;;  %v3045_v27 = vsel %vm3044_vm2, %v4084_v8, %v3041_v41 }
 0x6e7   : > { %v2889_v50 = vmul.f32 0.5, %v2888_v48  ;;  %v2687_v6 = vpop.xlane.xlu1 %2686  ;;  %v2691_v53 = vpop.xlane.xlu0 %2690  ;;  %v3104_v47 = vmul.f32 %v3045_v27, %v5905_v29 }
 0x6e8   : > { %v3120_v58 = vmax.f32 %v3088_v40, 0.0  ;;  %v2721_v33 = vmul.f32 %v2687_v6, %v5740_v61  ;;  %v2659_v28 = vpop.xlane.xlu2 %2658  ;;  %v2723_v49 = vmul.f32 %v2691_v53, %v5740_v61 }
 0x6e9   : > { %v2890_v23 = vsub.f32 1.5, %v2889_v50  ;;  %v2707_v37 = vmul.f32 %v2659_v28, %v5740_v61  ;;  %v3136_v38 = vmax.f32 %v3104_v47, 0.0 }
 0x6ea   : > { %v4088_v17 = vpop.eup %4087  ;;  %3152 = vst [vmem:[%s4831_s9 + $0x60] sm:$0xff] %v3120_v58  ;;  %v2753_v51 = vadd.f32 1e-05, %v2721_v33  ;;  %v2755_v25 = vadd.f32 1e-05, %v2723_v49 }
 0x6eb   : > { %v2891_v42 = vmul.f32 %v4086_v19, %v2890_v23  ;;  %v2897_v10 = vmul.f32 %v4088_v17, %v2738_v60  ;;  %v2739_v29 = vadd.f32 1e-05, %v2707_v37  ;;  %3168 = vst [vmem:[%s4831_s9 + $0xe0] sm:$0xff] %v3136_v38  ;;  %vm2903_vm6 = vweird.f32 %v4088_v17 }
 0x6ec   : > { %4089 = vrsqrt.f32 %v2753_v51  ;;  %vm2904_vm8 = vmor %vm2902_vm7, %vm2903_vm6  ;;  %vm3052_vm11 = vweird.f32 %v2753_v51  ;;  %vm3072_vm0 = vweird.f32 %v2755_v25 }
 0x6ed   : > { %v2895_v9 = vsel %vm2894_vm5, %v4086_v19, %v2891_v42  ;;  %v2898_v26 = vmul.f32 %v4088_v17, %v2897_v10  ;;  %4091 = vrsqrt.f32 %v2739_v29  ;;  %vm2912_vm14 = vweird.f32 %v2739_v29 }
 0x6ee   : > { %v3089_v7 = vmul.f32 %v2895_v9, %v5916_v24  ;;  %4093 = vrsqrt.f32 %v2755_v25 }
 0x6ef   : > { %v2899_v55 = vmul.f32 0.5, %v2898_v26 }
 0x6f0   : > { %v3121_v21 = vmax.f32 %v3089_v7, 0.0  ;;  %v2689_v2 = vpop.xlane.xlu2 %2688 }
 0x6f1   : > { %v2900_v14 = vsub.f32 1.5, %v2899_v55  ;;  %v2722_v59 = vmul.f32 %v2689_v2, %v5740_v61 }
 0x6f2   : > { %v4090_v1 = vpop.eup %4089  ;;  %3153 = vst [vmem:[%s4831_s9 + $0x68] sm:$0xff] %v3121_v21 }
 0x6f3   : > { %v4092_v57 = vpop.eup %4091  ;;  %v2901_v44 = vmul.f32 %v4088_v17, %v2900_v14  ;;  %v3047_v13 = vmul.f32 %v4090_v1, %v2753_v51  ;;  %v2754_v31 = vadd.f32 1e-05, %v2722_v59  ;;  %vm3053_vm9 = vweird.f32 %v4090_v1 }
 0x6f4   : > { %v4094_v32 = vpop.eup %4093  ;;  %v2907_v8 = vmul.f32 %v4092_v57, %v2739_v29  ;;  %vm2913_vm10 = vweird.f32 %v4092_v57  ;;  %vm3054_vm13 = vmor %vm3052_vm11, %vm3053_vm9 }
 0x6f5   : > { %v2905_v24 = vsel %vm2904_vm8, %v4088_v17, %v2901_v44  ;;  %v3048_v3 = vmul.f32 %v4090_v1, %v3047_v13  ;;  %v3067_v22 = vmul.f32 %v4094_v32, %v2755_v25  ;;  %4095 = vrsqrt.f32 %v2754_v31  ;;  %vm2914_vm15 = vmor %vm2912_vm14, %vm2913_vm10 }
 0x6f6   : > { %v3090_v15 = vmul.f32 %v2905_v24, %v5922_v39  ;;  %v2908_v30 = vmul.f32 %v4092_v57, %v2907_v8  ;;  %vm3073_vm12 = vweird.f32 %v4094_v32  ;;  %vm3062_vm3 = vweird.f32 %v2754_v31 }
 0x6f7   : > { %v3049_v52 = vmul.f32 0.5, %v3048_v3  ;;  %v3068_v61 = vmul.f32 %v4094_v32, %v3067_v22  ;;  %vm3074_vm1 = vmor %vm3072_vm0, %vm3073_vm12 }
 0x6f8   : > { %v3122_v45 = vmax.f32 %v3090_v15, 0.0  ;;  %v2909_v18 = vmul.f32 0.5, %v2908_v30 }
 0x6f9   : > { %v3050_v16 = vsub.f32 1.5, %v3049_v52  ;;  %v3069_v43 = vmul.f32 0.5, %v3068_v61 }
 0x6fa   : > { %3154 = vst [vmem:[%s4831_s9 + $0x70] sm:$0xff] %v3122_v45  ;;  %v2910_v62 = vsub.f32 1.5, %v2909_v18 }
 0x6fb   : > { %v3051_v0 = vmul.f32 %v4090_v1, %v3050_v16  ;;  %v3070_v63 = vsub.f32 1.5, %v3069_v43  ;;  %v4096_v34 = vpop.eup %4095 }
 0x6fc   : > { %v2911_v54 = vmul.f32 %v4092_v57, %v2910_v62  ;;  %v3057_v5 = vmul.f32 %v4096_v34, %v2754_v31  ;;  %vm3063_vm2 = vweird.f32 %v4096_v34 }
 0x6fd   : > { %v3055_v39 = vsel %vm3054_vm13, %v4090_v1, %v3051_v0  ;;  %v3071_v19 = vmul.f32 %v4094_v32, %v3070_v63  ;;  %vm3064_vm4 = vmor %vm3062_vm3, %vm3063_vm2 }
 0x6fe   : > { %v3105_v60 = vmul.f32 %v3055_v39, %v5928_v20  ;;  %v2915_v35 = vsel %vm2914_vm15, %v4092_v57, %v2911_v54  ;;  %v3058_v4 = vmul.f32 %v4096_v34, %v3057_v5 }
 0x6ff   : > { %v3091_v12 = vmul.f32 %v2915_v35, %v5937_v36  ;;  %v3075_v46 = vsel %vm3074_vm1, %v4094_v32, %v3071_v19 }
 0x700   : > { %v3137_v41 = vmax.f32 %v3105_v60, 0.0  ;;  %v3107_v48 = vmul.f32 %v3075_v46, %v5934_v56  ;;  %v3059_v27 = vmul.f32 0.5, %v3058_v4 }
 0x701   : > { %v3123_v40 = vmax.f32 %v3091_v12, 0.0 }
 0x702   : > { %3169 = vst [vmem:[%s4831_s9 + $0xe8] sm:$0xff] %v3137_v41  ;;  %v3139_v50 = vmax.f32 %v3107_v48, 0.0  ;;  %v3060_v6 = vsub.f32 1.5, %v3059_v27 }
 0x703   : > { %3155 = vst [vmem:[%s4831_s9 + $0x78] sm:$0xff] %v3123_v40 }
 0x704   : > { %3171 = vst [vmem:[%s4831_s9 + $0xf8] sm:$0xff] %v3139_v50  ;;  %v3061_v53 = vmul.f32 %v4096_v34, %v3060_v6 }
 0x706   : > { %v3065_v20 = vsel %vm3064_vm4, %v4096_v34, %v3061_v53 }
 0x707   : > { %v3106_v36 = vmul.f32 %v3065_v20, %v5948_v11 }
 0x709   : > { %v3138_v58 = vmax.f32 %v3106_v36, 0.0 }
 0x70b   : > { %3170 = vst [vmem:[%s4831_s9 + $0xf0] sm:$0xff] %v3138_v58 }
 0x70c PF: > { %s6389_s23 = sld [smem:[#allocation32_spill]]  ;;  %s3185_s30 = sshll.u32 %s4831_s9, 4  ;;  %s3186_s30 = int_to_ptr.vmem [resolvable:$true] %s3185_s30 }
 0x70d   : > { %s6391_s10 = sld [smem:[#allocation66_spill]]  ;;  %s3173_s8 = scalar_lea.sflag [#allocation6], %s4785_s16 }
 0x712   : > { %s3729_s6 = sshll.u32 %s6389_s23, 8 }
 0x713   : > { %s6392_s22 = smov %s6391_s10  ;;  %s3184_s13 = scalar_lea.hbm %s6391_s10, %s3729_s6 }
 0x714   : > { %s3187_s21 = sshll.u32 %s3184_s13, 4  ;;  %s4357_s12 = scalar_lea.hbm %s6392_s22, 512  ;;  %s3188_s21 = int_to_ptr.hbm [resolvable:$true] %s3187_s21 }
 0x715   : > { %s4351_s1 = sshra.s32 %s3188_s21, 4  ;;  %s4352_s1 = int_to_ptr.hbm [resolvable:$true] %s4351_s1 }
 0x716   : > { %s4353_s25 = scalar_lea.hbm %s4352_s1, 256  ;;  %p4358_p13 = scmp.lt.s32.totalorder %s4352_s1, %s6392_s22 }
 0x717   : > { %p4354_p4 = scmp.ne.s32.totalorder %s4352_s1, %s4353_s25  ;;  %p4359_p5 = scmp.lt.s32.totalorder %s4357_s12, %s4353_s25 }
 0x719   : > { %p4355_p8 = pnand %p4354_p4, %p4651_p3  ;;  %p4360_p9 = por %p4359_p5, %p4358_p13 }
 0x71b   : > { %p4356_p10 = pneg %p4355_p8 }
 0x71d   : > { %p4361_p12 = pnand %p4360_p9, %p4356_p10 }
 0x71f   : > { %4364 = shalt.err (!%p4361_p12)
}
 0x720   : > { %s4492_s16 = smov 128   ;;  %s4493_s9 = smov 8  }
 0x721   : > { %3894 = dma.vmem_to_hbm [thread:$0]  (%p4651_p3), %s3186_s30, 4096, %s3188_s21, %s3173_s8, %s4492_s16, %s4492_s16, %s4493_s9  }
 0x722 PF: > { %s6393_s0 = sld [smem:[#allocation34_spill]] }
 0x723   : > { %s6394_s15 = sld [smem:[#allocation29_spill]] }
 0x724   : > { %s6395_s28 = sld [smem:[#allocation36_spill]] }
 0x728   : > { %p3931_p0 = scmp.ge.s32.totalorder %s6393_s0, 2 }
 0x729   : > { %s3202_s23 = sand.u32 1, %s6394_s15  }
 0x72a   : > { %p6396_p11 = scmp.ne.s32.totalorder %s6395_s28, 0  ;;  %s3203_s6 = scalar_lea.sflag [#allocation6], %s3202_s23 }
 0x72c   : > { %p3923_p2 = pnand %p3931_p0, %p6396_p11 }
 0x72e   : > { %p3924_p7 = pneg %p3923_p2 }
 0x730   : > { %4438 = dma.done.wait (%p3924_p7), %s3203_s6, 4096  }
 0x731   : > { %4440 = vsyncadd (%p3924_p7), %s3203_s6, 4294963200  ;;  %s35_s19 = sadd.s32 1, %s6393_s0   ;;  %s6397_s30 = sld [smem:[#allocation27_spill]] }
 0x732   : > { %p32_p6 = scmp.ge.s32.totalorder %s35_s19, 6   ;;  %s6398_s10 = sld [smem:[#allocation28_spill]] }
 0x733   : > { %s6399_s11 = sld [smem:[#allocation41_spill]]  ;;  %s6404_s13 = smov %s4463_s14 }
 0x734   : > { %s6400_s12 = sld [smem:[#allocation30_spill]]  ;;  %s6405_s14 = smov %s4723_s24 }
 0x735   : > { %s6401_s15 = sld [smem:[#allocation33_spill]]  ;;  %s6406_s16 = smov %s4479_s18 }
 0x736   : > { %s6402_s17 = sld [smem:[#allocation38_spill]] }
 0x737   : > { %s6403_s27 = sld [smem:[#allocation40_spill]] }
 0x739   :  { %34 = sbr.rel (!%p32_p6) target bundleno = 22 (0x16), region = 178 }
 0x73d   : > { %s6407_s18 = smov %s6403_s27 }
 0x73e   :  { %3209 = vsyncpa [#allocation5], 1 }
 0x73f   :  { %3211 = vsyncpa [#allocation5 + $0x1], 1 }
 0x740   :  { %3212 = vsyncpa [#allocation8], 1 }
 0x741   :  { %3214 = vsyncpa [#allocation8 + $0x1], 1 }
 0x742   :  { %3215 = vsyncpa [#allocation11], 1 }
 0x743   :  { %3217 = vsyncpa [#allocation11 + $0x1], 1 }
 0x744   :  { %3218 = vsyncpa [#allocation14], 1 }
 0x745   :  { %3220 = vsyncpa [#allocation14 + $0x1], 1 }
 0x746   :  { %3221 = vsyncpa [#allocation17], 1 }
 0x747   :  { %3222 = vsyncpa [#allocation6], 1 }
 0x748   :  { %3224 = vsyncpa [#allocation6 + $0x1], 1 }

</bundles_post_ra>
